<compile_context>
chip_gen: v6e
topology: v6e:2x2x1
jax: 0.10.0
libtpu: 0.0.40
codegen_flags: <defaults>
</compile_context>

<pallas_src>
import math
import functools

import jax
import jax.numpy as jnp
from jax.experimental import pallas as pl
from jax.experimental.pallas import tpu as pltpu

# Make the in-kernel MXU dots and the XLA reference use the same (full f32)
# matmul precision so the correctness check is not at the mercy of default
# reduced-precision passes.
jax.config.update("jax_default_matmul_precision", "highest")

# One-line switch for v6e/v7x native-MXU throughput (bf16 operands, f32 accum).
# Kept f32 for faithfulness to the PyTorch reference; re-validate tolerances if
# flipped to jnp.bfloat16.
MXU_DTYPE = jnp.float32


# ---------------------------------------------------------------------------
# Pallas kernel: one batch element per grid step (grid is parallel over B)
# ---------------------------------------------------------------------------
def decoder_layer_kernel(n_heads,
                         x_ref, enc_ref,
                         wq1_ref, wkv1_ref, wo1_ref,
                         wq2_ref, wkv2_ref, wo2_ref,
                         w1_ref, b1_ref, w2_ref, vec_ref,
                         out_ref):
    x = x_ref[...]        # (S, D) f32 (batch dim squeezed by BlockSpec)
    enc = enc_ref[...]    # (S, D) f32
    S, D = x.shape
    H = n_heads
    dh = D // H
    scale = 1.0 / math.sqrt(dh)

    vecs = vec_ref[...]   # (15, D)
    (bq1, bk1, bv1, bo1,
     bq2, bk2, bv2, bo2,
     b2f, g1, be1, g2, be2, g3, be3) = [vecs[i:i + 1] for i in range(15)]

    def layer_norm(t, g, b):
        mean = jnp.mean(t, axis=-1, keepdims=True)
        cent = t - mean
        var = jnp.mean(cent * cent, axis=-1, keepdims=True)   # unbiased=False
        # Reference LayerNorm never adds eps (faithful); zero-variance rows
        # would produce inf/NaN exactly like the torch module would.
        return g * (cent / jnp.sqrt(var)) + b

    def softmax(s):
        s = s - jnp.max(s, axis=-1, keepdims=True)
        e = jnp.exp(s)
        return e / jnp.sum(e, axis=-1, keepdims=True)          # exact divide

    def mm(a, b):
        return jnp.dot(a.astype(MXU_DTYPE), b.astype(MXU_DTYPE),
                       preferred_element_type=jnp.float32)

    def mha(q_src, kv_src, wq, bq, wkv, bk, bv, wo, bo):
        # Weight-stationary 2-D projections (no replicated weight copies).
        q = mm(q_src, wq) + bq          # (S, D)
        kv = mm(kv_src, wkv)            # (S, 2D)  packed [K | V]
        k = kv[:, :D] + bk
        v = kv[:, D:] + bv
        heads = []
        for h in range(H):              # static unroll; H is a compile-time int
            sl = slice(h * dh, (h + 1) * dh)
            qh, kh, vh = q[:, sl], k[:, sl], v[:, sl]
            s = jnp.einsum('qd,kd->qk', qh.astype(MXU_DTYPE), kh.astype(MXU_DTYPE),
                           preferred_element_type=jnp.float32) * scale
            p = softmax(s)
            heads.append(mm(p, vh))     # (S, dh)
        # Heads reassembled on the lane axis -> ONE (S,D)@(D,D) output matmul.
        o = jnp.concatenate(heads, axis=-1)
        return mm(o, wo) + bo

    # --- masked self-attention block (mask never reaches the attention op) ---
    attn = mha(x, x, wq1_ref[...], bq1, wkv1_ref[...], bk1, bv1, wo1_ref[...], bo1)
    x1 = layer_norm(attn + x, g1, be1)

    # --- encoder-decoder cross-attention block ---
    cross = mha(x1, enc, wq2_ref[...], bq2, wkv2_ref[...], bk2, bv2, wo2_ref[...], bo2)
    x2 = layer_norm(cross + x1, g2, be2)

    # --- feed-forward (no residual in the reference module) + LN3 ---
    hdn = jnp.maximum(mm(x2, w1_ref[...]) + b1_ref[...], 0.0)
    ff = mm(hdn, w2_ref[...]) + b2f
    out_ref[...] = layer_norm(ff, g3, be3)


# ---------------------------------------------------------------------------
# Host-side parameter packing (pure JAX, outside the kernel)
# ---------------------------------------------------------------------------
def pack_params(params):
    (wq1, bq1, wk1, bk1, wv1, bv1, wo1, bo1,
     wq2, bq2, wk2, bk2, wv2, bv2, wo2, bo2,
     w1, b1, w2, b2, g1, be1, g2, be2, g3, be3) = params
    D = wq1.shape[0]
    wkv1 = jnp.concatenate([wk1, wv1], axis=1)       # (D, 2D)
    wkv2 = jnp.concatenate([wk2, wv2], axis=1)       # (D, 2D)
    vecs = jnp.concatenate(
        [v.reshape(1, D) for v in (bq1, bk1, bv1, bo1,
                                   bq2, bk2, bv2, bo2,
                                   b2, g1, be1, g2, be2, g3, be3)], axis=0)  # (15, D)
    return wq1, wkv1, wo1, wq2, wkv2, wo2, w1, b1.reshape(1, -1), w2, vecs


# ---------------------------------------------------------------------------
# Wrapper
# ---------------------------------------------------------------------------
def decoder_layer(x_out, x_enc, trg_mask, src_mask, params, n_heads):
    # trg_mask / src_mask intentionally unused: the reference MultiHeadAttention
    # never forwards the mask to ScaledDotProductAttention.
    del trg_mask, src_mask
    B, S, D = x_out.shape
    wq1, wkv1, wo1, wq2, wkv2, wo2, w1, b1, w2, vecs = pack_params(params)
    HIDDEN = w1.shape[1]

    def batched(shape_rest):
        return pl.BlockSpec((None,) + shape_rest,
                            lambda b: (b,) + (0,) * len(shape_rest))

    def full(shape):
        return pl.BlockSpec(shape, lambda b: (0,) * len(shape))

    return pl.pallas_call(
        functools.partial(decoder_layer_kernel, n_heads),
        grid=(B,),
        in_specs=[
            batched((S, D)),          # x_out
            batched((S, D)),          # x_enc
            full((D, D)),             # wq1
            full((D, 2 * D)),         # wkv1
            full((D, D)),             # wo1
            full((D, D)),             # wq2
            full((D, 2 * D)),         # wkv2
            full((D, D)),             # wo2
            full((D, HIDDEN)),        # w1
            full((1, HIDDEN)),        # b1
            full((HIDDEN, D)),        # w2
            full((15, D)),            # packed (1,D) vectors
        ],
        out_specs=batched((S, D)),
        out_shape=jax.ShapeDtypeStruct((B, S, D), jnp.float32),
        compiler_params=pltpu.CompilerParams(
            dimension_semantics=("parallel",),
            vmem_limit_bytes=32 * 1024 * 1024),
    )(x_out, x_enc, wq1, wkv1, wo1, wq2, wkv2, wo2, w1, b1, w2, vecs)


# ---------------------------------------------------------------------------
# Pure-JAX reference (for correctness check)
# ---------------------------------------------------------------------------
def decoder_layer_ref(x, enc, params, n_heads):
    (wq1, bq1, wk1, bk1, wv1, bv1, wo1, bo1,
     wq2, bq2, wk2, bk2, wv2, bv2, wo2, bo2,
     w1, b1, w2, b2, g1, be1, g2, be2, g3, be3) = params

    def ln(t, g, b):
        m = jnp.mean(t, -1, keepdims=True)
        v = jnp.mean((t - m) ** 2, -1, keepdims=True)
        return g * (t - m) / jnp.sqrt(v) + b

    def mha(xq, xkv, wq, bq, wk, bk, wv, bv, wo, bo):
        B, S, D = xq.shape
        dh = D // n_heads
        q = (xq @ wq + bq).reshape(B, S, n_heads, dh).transpose(0, 2, 1, 3)
        k = (xkv @ wk + bk).reshape(B, S, n_heads, dh).transpose(0, 2, 1, 3)
        v = (xkv @ wv + bv).reshape(B, S, n_heads, dh).transpose(0, 2, 1, 3)
        s = jnp.einsum("bhqd,bhkd->bhqk", q, k) / math.sqrt(dh)
        p = jax.nn.softmax(s, axis=-1)
        o = jnp.einsum("bhqk,bhkd->bhqd", p, v).transpose(0, 2, 1, 3).reshape(B, S, D)
        return o @ wo + bo

    a = mha(x, x, wq1, bq1, wk1, bk1, wv1, bv1, wo1, bo1)
    x1 = ln(a + x, g1, be1)
    c = mha(x1, enc, wq2, bq2, wk2, bk2, wv2, bv2, wo2, bo2)
    x2 = ln(c + x1, g2, be2)
    h = jax.nn.relu(x2 @ w1 + b1)
    ff = h @ w2 + b2
    return ln(ff, g3, be3)


# ---------------------------------------------------------------------------
# Main
# ---------------------------------------------------------------------------
if __name__ == "__main__":
    B, S, D, H, HIDDEN = 2, 8, 32, 4, 32

    key = jax.random.PRNGKey(0)

    def linear_params(k, din, dout):
        k1, k2 = jax.random.split(k)
        w = jax.random.normal(k1, (din, dout), jnp.float32) * (1.0 / math.sqrt(din))
        b = jax.random.normal(k2, (1, dout), jnp.float32) * 0.02
        return w, b

    keys = jax.random.split(key, 16)
    # self-attention projections
    wq1, bq1 = linear_params(keys[0], D, D)
    wk1, bk1 = linear_params(keys[1], D, D)
    wv1, bv1 = linear_params(keys[2], D, D)
    wo1, bo1 = linear_params(keys[3], D, D)
    # cross-attention projections
    wq2, bq2 = linear_params(keys[4], D, D)
    wk2, bk2 = linear_params(keys[5], D, D)
    wv2, bv2 = linear_params(keys[6], D, D)
    wo2, bo2 = linear_params(keys[7], D, D)
    # feed-forward
    w1, b1 = linear_params(keys[8], D, HIDDEN)
    w2, b2 = linear_params(keys[9], HIDDEN, D)
    # layer norms (init matches the PyTorch module: gamma=1, beta=0)
    g1, be1 = jnp.ones((1, D), jnp.float32), jnp.zeros((1, D), jnp.float32)
    g2, be2 = jnp.ones((1, D), jnp.float32), jnp.zeros((1, D), jnp.float32)
    g3, be3 = jnp.ones((1, D), jnp.float32), jnp.zeros((1, D), jnp.float32)

    params = [wq1, bq1, wk1, bk1, wv1, bv1, wo1, bo1,
              wq2, bq2, wk2, bk2, wv2, bv2, wo2, bo2,
              w1, b1, w2, b2,
              g1, be1, g2, be2, g3, be3]

    kx, ke = jax.random.split(keys[10])
    x_out = jax.random.normal(kx, (B, S, D), jnp.float32)
    x_enc = jax.random.normal(ke, (B, S, D), jnp.float32)
    # masks constructed for API parity but unused (reference semantics)
    trg_mask = jnp.tril(jnp.ones((S, S), jnp.float32))
    src_mask = jnp.ones((S, S), jnp.float32)

    out = decoder_layer(x_out, x_enc, trg_mask, src_mask, params, n_heads=H)
    out = jax.block_until_ready(out)

    ref = decoder_layer_ref(x_out, x_enc, params, n_heads=H)
    assert out.shape == (B, S, D)
    # Exact divides everywhere and matched matmul precision; tolerance only
    # guards against f32 accumulation-order differences.
    assert jnp.allclose(out, ref, atol=2e-3, rtol=2e-3), "mismatch vs JAX reference"

    print("KERNEL_OK")
</pallas_src>

<mosaic_0001>
module attributes {stable_mosaic.version = 11 : i64} {
  func.func @decoder_layer_kernel(%arg0: i32, %arg1: memref<1x8x32xf32, #tpu.memory_space<vmem>>, %arg2: memref<1x8x32xf32, #tpu.memory_space<vmem>>, %arg3: memref<32x32xf32, #tpu.memory_space<vmem>>, %arg4: memref<32x64xf32, #tpu.memory_space<vmem>>, %arg5: memref<32x32xf32, #tpu.memory_space<vmem>>, %arg6: memref<32x32xf32, #tpu.memory_space<vmem>>, %arg7: memref<32x64xf32, #tpu.memory_space<vmem>>, %arg8: memref<32x32xf32, #tpu.memory_space<vmem>>, %arg9: memref<32x32xf32, #tpu.memory_space<vmem>>, %arg10: memref<1x32xf32, #tpu.memory_space<vmem>>, %arg11: memref<32x32xf32, #tpu.memory_space<vmem>>, %arg12: memref<15x32xf32, #tpu.memory_space<vmem>>, %arg13: memref<1x8x32xf32, #tpu.memory_space<vmem>>) attributes {dimension_semantics = [#tpu.dimension_semantics<parallel>], iteration_bounds = array<i64: 2>, scalar_prefetch = 0 : i64, scratch_operands = 0 : i64, tpu.core_type = #tpu.core_type<tc>, window_params = [{transform_indices = @transform_0, window_bounds = array<i64: 1, 8, 32>}, {transform_indices = @transform_1, window_bounds = array<i64: 1, 8, 32>}, {pipeline_mode = #tpu.pipeline_mode<synchronous>, transform_indices = @transform_2, window_bounds = array<i64: 32, 32>}, {pipeline_mode = #tpu.pipeline_mode<synchronous>, transform_indices = @transform_3, window_bounds = array<i64: 32, 64>}, {pipeline_mode = #tpu.pipeline_mode<synchronous>, transform_indices = @transform_4, window_bounds = array<i64: 32, 32>}, {pipeline_mode = #tpu.pipeline_mode<synchronous>, transform_indices = @transform_5, window_bounds = array<i64: 32, 32>}, {pipeline_mode = #tpu.pipeline_mode<synchronous>, transform_indices = @transform_6, window_bounds = array<i64: 32, 64>}, {pipeline_mode = #tpu.pipeline_mode<synchronous>, transform_indices = @transform_7, window_bounds = array<i64: 32, 32>}, {pipeline_mode = #tpu.pipeline_mode<synchronous>, transform_indices = @transform_8, window_bounds = array<i64: 32, 32>}, {pipeline_mode = #tpu.pipeline_mode<synchronous>, transform_indices = @transform_9, window_bounds = array<i64: 1, 32>}, {pipeline_mode = #tpu.pipeline_mode<synchronous>, transform_indices = @transform_10, window_bounds = array<i64: 32, 32>}, {pipeline_mode = #tpu.pipeline_mode<synchronous>, transform_indices = @transform_11, window_bounds = array<i64: 15, 32>}, {transform_indices = @transform_12, window_bounds = array<i64: 1, 8, 32>}]} {
    %c0 = arith.constant 0 : index
    %c0_0 = arith.constant 0 : index
    %c0_1 = arith.constant 0 : index
    %0 = vector.load %arg1[%c0, %c0_0, %c0_1] : memref<1x8x32xf32, #tpu.memory_space<vmem>>, vector<1x8x32xf32>
    %1 = vector.shape_cast %0 : vector<1x8x32xf32> to vector<8x32xf32>
    %c0_2 = arith.constant 0 : index
    %c0_3 = arith.constant 0 : index
    %c0_4 = arith.constant 0 : index
    %2 = vector.load %arg2[%c0_2, %c0_3, %c0_4] : memref<1x8x32xf32, #tpu.memory_space<vmem>>, vector<1x8x32xf32>
    %3 = vector.shape_cast %2 : vector<1x8x32xf32> to vector<8x32xf32>
    %c0_5 = arith.constant 0 : index
    %c0_6 = arith.constant 0 : index
    %4 = vector.load %arg12[%c0_5, %c0_6] : memref<15x32xf32, #tpu.memory_space<vmem>>, vector<15x32xf32>
    %5 = vector.extract_strided_slice %4 {offsets = [0, 0], sizes = [1, 32], strides = [1, 1]} : vector<15x32xf32> to vector<1x32xf32>
    %6 = vector.extract_strided_slice %4 {offsets = [1, 0], sizes = [1, 32], strides = [1, 1]} : vector<15x32xf32> to vector<1x32xf32>
    %7 = vector.extract_strided_slice %4 {offsets = [2, 0], sizes = [1, 32], strides = [1, 1]} : vector<15x32xf32> to vector<1x32xf32>
    %8 = vector.extract_strided_slice %4 {offsets = [3, 0], sizes = [1, 32], strides = [1, 1]} : vector<15x32xf32> to vector<1x32xf32>
    %9 = vector.extract_strided_slice %4 {offsets = [4, 0], sizes = [1, 32], strides = [1, 1]} : vector<15x32xf32> to vector<1x32xf32>
    %10 = vector.extract_strided_slice %4 {offsets = [5, 0], sizes = [1, 32], strides = [1, 1]} : vector<15x32xf32> to vector<1x32xf32>
    %11 = vector.extract_strided_slice %4 {offsets = [6, 0], sizes = [1, 32], strides = [1, 1]} : vector<15x32xf32> to vector<1x32xf32>
    %12 = vector.extract_strided_slice %4 {offsets = [7, 0], sizes = [1, 32], strides = [1, 1]} : vector<15x32xf32> to vector<1x32xf32>
    %13 = vector.extract_strided_slice %4 {offsets = [8, 0], sizes = [1, 32], strides = [1, 1]} : vector<15x32xf32> to vector<1x32xf32>
    %14 = vector.extract_strided_slice %4 {offsets = [9, 0], sizes = [1, 32], strides = [1, 1]} : vector<15x32xf32> to vector<1x32xf32>
    %15 = vector.extract_strided_slice %4 {offsets = [10, 0], sizes = [1, 32], strides = [1, 1]} : vector<15x32xf32> to vector<1x32xf32>
    %16 = vector.extract_strided_slice %4 {offsets = [11, 0], sizes = [1, 32], strides = [1, 1]} : vector<15x32xf32> to vector<1x32xf32>
    %17 = vector.extract_strided_slice %4 {offsets = [12, 0], sizes = [1, 32], strides = [1, 1]} : vector<15x32xf32> to vector<1x32xf32>
    %18 = vector.extract_strided_slice %4 {offsets = [13, 0], sizes = [1, 32], strides = [1, 1]} : vector<15x32xf32> to vector<1x32xf32>
    %19 = vector.extract_strided_slice %4 {offsets = [14, 0], sizes = [1, 32], strides = [1, 1]} : vector<15x32xf32> to vector<1x32xf32>
    %c0_7 = arith.constant 0 : index
    %c0_8 = arith.constant 0 : index
    %20 = vector.load %arg3[%c0_7, %c0_8] : memref<32x32xf32, #tpu.memory_space<vmem>>, vector<32x32xf32>
    %c0_9 = arith.constant 0 : index
    %c0_10 = arith.constant 0 : index
    %21 = vector.load %arg4[%c0_9, %c0_10] : memref<32x64xf32, #tpu.memory_space<vmem>>, vector<32x64xf32>
    %c0_11 = arith.constant 0 : index
    %c0_12 = arith.constant 0 : index
    %22 = vector.load %arg5[%c0_11, %c0_12] : memref<32x32xf32, #tpu.memory_space<vmem>>, vector<32x32xf32>
    %cst = arith.constant dense<0.000000e+00> : vector<8x32xf32>
    %23 = tpu.matmul %1, %20, %cst {dimension_numbers = #tpu.dot_dimension_numbers<[1], [0], [0], [1], [0, 0, 1, 1], [], []>, precision = #tpu.contract_precision<fp32>} : vector<8x32xf32>, vector<32x32xf32>, vector<8x32xf32> -> vector<8x32xf32>
    %24 = vector.broadcast %5 : vector<1x32xf32> to vector<8x32xf32>
    %25 = arith.addf %23, %24 : vector<8x32xf32>
    %cst_13 = arith.constant dense<0.000000e+00> : vector<8x64xf32>
    %26 = tpu.matmul %1, %21, %cst_13 {dimension_numbers = #tpu.dot_dimension_numbers<[1], [0], [0], [1], [0, 0, 1, 1], [], []>, precision = #tpu.contract_precision<fp32>} : vector<8x32xf32>, vector<32x64xf32>, vector<8x64xf32> -> vector<8x64xf32>
    %27 = vector.extract_strided_slice %26 {offsets = [0, 0], sizes = [8, 32], strides = [1, 1]} : vector<8x64xf32> to vector<8x32xf32>
    %28 = vector.broadcast %6 : vector<1x32xf32> to vector<8x32xf32>
    %29 = arith.addf %27, %28 : vector<8x32xf32>
    %30 = vector.extract_strided_slice %26 {offsets = [0, 32], sizes = [8, 32], strides = [1, 1]} : vector<8x64xf32> to vector<8x32xf32>
    %31 = vector.broadcast %7 : vector<1x32xf32> to vector<8x32xf32>
    %32 = arith.addf %30, %31 : vector<8x32xf32>
    %33 = vector.extract_strided_slice %25 {offsets = [0, 0], sizes = [8, 8], strides = [1, 1]} : vector<8x32xf32> to vector<8x8xf32>
    %34 = vector.extract_strided_slice %29 {offsets = [0, 0], sizes = [8, 8], strides = [1, 1]} : vector<8x32xf32> to vector<8x8xf32>
    %35 = vector.extract_strided_slice %32 {offsets = [0, 0], sizes = [8, 8], strides = [1, 1]} : vector<8x32xf32> to vector<8x8xf32>
    "tpu.trace_start"() <{level = 10 : i32, message = "qd,kd->qk"}> : () -> ()
    %cst_14 = arith.constant dense<0.000000e+00> : vector<8x8xf32>
    %36 = tpu.matmul %33, %34, %cst_14 {dimension_numbers = #tpu.dot_dimension_numbers<[1], [1], [0], [0], [0, 0, 1, 0], [], []>, precision = #tpu.contract_precision<fp32>} : vector<8x8xf32>, vector<8x8xf32>, vector<8x8xf32> -> vector<8x8xf32>
    "tpu.trace_stop"() : () -> ()
    %cst_15 = arith.constant 0.353553385 : f32
    %37 = vector.broadcast %cst_15 : f32 to vector<8x8xf32>
    %38 = arith.mulf %36, %37 : vector<8x8xf32>
    %cst_16 = arith.constant dense<0xFF800000> : vector<8xf32>
    %39 = vector.multi_reduction <maximumf>, %38, %cst_16 [1] : vector<8x8xf32> to vector<8xf32>
    %40 = vector.shape_cast %39 : vector<8xf32> to vector<8x1xf32>
    %41 = vector.broadcast %40 : vector<8x1xf32> to vector<8x8xf32>
    %42 = arith.subf %38, %41 : vector<8x8xf32>
    %43 = math.exp %42 : vector<8x8xf32>
    %cst_17 = arith.constant dense<0.000000e+00> : vector<8xf32>
    %44 = vector.multi_reduction <add>, %43, %cst_17 [1] : vector<8x8xf32> to vector<8xf32>
    %45 = vector.shape_cast %44 : vector<8xf32> to vector<8x1xf32>
    %46 = vector.broadcast %45 : vector<8x1xf32> to vector<8x8xf32>
    %47 = arith.divf %43, %46 : vector<8x8xf32>
    %cst_18 = arith.constant dense<0.000000e+00> : vector<8x8xf32>
    %48 = tpu.matmul %47, %35, %cst_18 {dimension_numbers = #tpu.dot_dimension_numbers<[1], [0], [0], [1], [0, 0, 1, 1], [], []>, precision = #tpu.contract_precision<fp32>} : vector<8x8xf32>, vector<8x8xf32>, vector<8x8xf32> -> vector<8x8xf32>
    %49 = vector.extract_strided_slice %25 {offsets = [0, 8], sizes = [8, 8], strides = [1, 1]} : vector<8x32xf32> to vector<8x8xf32>
    %50 = vector.extract_strided_slice %29 {offsets = [0, 8], sizes = [8, 8], strides = [1, 1]} : vector<8x32xf32> to vector<8x8xf32>
    %51 = vector.extract_strided_slice %32 {offsets = [0, 8], sizes = [8, 8], strides = [1, 1]} : vector<8x32xf32> to vector<8x8xf32>
    "tpu.trace_start"() <{level = 10 : i32, message = "qd,kd->qk"}> : () -> ()
    %cst_19 = arith.constant dense<0.000000e+00> : vector<8x8xf32>
    %52 = tpu.matmul %49, %50, %cst_19 {dimension_numbers = #tpu.dot_dimension_numbers<[1], [1], [0], [0], [0, 0, 1, 0], [], []>, precision = #tpu.contract_precision<fp32>} : vector<8x8xf32>, vector<8x8xf32>, vector<8x8xf32> -> vector<8x8xf32>
    "tpu.trace_stop"() : () -> ()
    %cst_20 = arith.constant 0.353553385 : f32
    %53 = vector.broadcast %cst_20 : f32 to vector<8x8xf32>
    %54 = arith.mulf %52, %53 : vector<8x8xf32>
    %cst_21 = arith.constant dense<0xFF800000> : vector<8xf32>
    %55 = vector.multi_reduction <maximumf>, %54, %cst_21 [1] : vector<8x8xf32> to vector<8xf32>
    %56 = vector.shape_cast %55 : vector<8xf32> to vector<8x1xf32>
    %57 = vector.broadcast %56 : vector<8x1xf32> to vector<8x8xf32>
    %58 = arith.subf %54, %57 : vector<8x8xf32>
    %59 = math.exp %58 : vector<8x8xf32>
    %cst_22 = arith.constant dense<0.000000e+00> : vector<8xf32>
    %60 = vector.multi_reduction <add>, %59, %cst_22 [1] : vector<8x8xf32> to vector<8xf32>
    %61 = vector.shape_cast %60 : vector<8xf32> to vector<8x1xf32>
    %62 = vector.broadcast %61 : vector<8x1xf32> to vector<8x8xf32>
    %63 = arith.divf %59, %62 : vector<8x8xf32>
    %cst_23 = arith.constant dense<0.000000e+00> : vector<8x8xf32>
    %64 = tpu.matmul %63, %51, %cst_23 {dimension_numbers = #tpu.dot_dimension_numbers<[1], [0], [0], [1], [0, 0, 1, 1], [], []>, precision = #tpu.contract_precision<fp32>} : vector<8x8xf32>, vector<8x8xf32>, vector<8x8xf32> -> vector<8x8xf32>
    %65 = vector.extract_strided_slice %25 {offsets = [0, 16], sizes = [8, 8], strides = [1, 1]} : vector<8x32xf32> to vector<8x8xf32>
    %66 = vector.extract_strided_slice %29 {offsets = [0, 16], sizes = [8, 8], strides = [1, 1]} : vector<8x32xf32> to vector<8x8xf32>
    %67 = vector.extract_strided_slice %32 {offsets = [0, 16], sizes = [8, 8], strides = [1, 1]} : vector<8x32xf32> to vector<8x8xf32>
    "tpu.trace_start"() <{level = 10 : i32, message = "qd,kd->qk"}> : () -> ()
    %cst_24 = arith.constant dense<0.000000e+00> : vector<8x8xf32>
    %68 = tpu.matmul %65, %66, %cst_24 {dimension_numbers = #tpu.dot_dimension_numbers<[1], [1], [0], [0], [0, 0, 1, 0], [], []>, precision = #tpu.contract_precision<fp32>} : vector<8x8xf32>, vector<8x8xf32>, vector<8x8xf32> -> vector<8x8xf32>
    "tpu.trace_stop"() : () -> ()
    %cst_25 = arith.constant 0.353553385 : f32
    %69 = vector.broadcast %cst_25 : f32 to vector<8x8xf32>
    %70 = arith.mulf %68, %69 : vector<8x8xf32>
    %cst_26 = arith.constant dense<0xFF800000> : vector<8xf32>
    %71 = vector.multi_reduction <maximumf>, %70, %cst_26 [1] : vector<8x8xf32> to vector<8xf32>
    %72 = vector.shape_cast %71 : vector<8xf32> to vector<8x1xf32>
    %73 = vector.broadcast %72 : vector<8x1xf32> to vector<8x8xf32>
    %74 = arith.subf %70, %73 : vector<8x8xf32>
    %75 = math.exp %74 : vector<8x8xf32>
    %cst_27 = arith.constant dense<0.000000e+00> : vector<8xf32>
    %76 = vector.multi_reduction <add>, %75, %cst_27 [1] : vector<8x8xf32> to vector<8xf32>
    %77 = vector.shape_cast %76 : vector<8xf32> to vector<8x1xf32>
    %78 = vector.broadcast %77 : vector<8x1xf32> to vector<8x8xf32>
    %79 = arith.divf %75, %78 : vector<8x8xf32>
    %cst_28 = arith.constant dense<0.000000e+00> : vector<8x8xf32>
    %80 = tpu.matmul %79, %67, %cst_28 {dimension_numbers = #tpu.dot_dimension_numbers<[1], [0], [0], [1], [0, 0, 1, 1], [], []>, precision = #tpu.contract_precision<fp32>} : vector<8x8xf32>, vector<8x8xf32>, vector<8x8xf32> -> vector<8x8xf32>
    %81 = vector.extract_strided_slice %25 {offsets = [0, 24], sizes = [8, 8], strides = [1, 1]} : vector<8x32xf32> to vector<8x8xf32>
    %82 = vector.extract_strided_slice %29 {offsets = [0, 24], sizes = [8, 8], strides = [1, 1]} : vector<8x32xf32> to vector<8x8xf32>
    %83 = vector.extract_strided_slice %32 {offsets = [0, 24], sizes = [8, 8], strides = [1, 1]} : vector<8x32xf32> to vector<8x8xf32>
    "tpu.trace_start"() <{level = 10 : i32, message = "qd,kd->qk"}> : () -> ()
    %cst_29 = arith.constant dense<0.000000e+00> : vector<8x8xf32>
    %84 = tpu.matmul %81, %82, %cst_29 {dimension_numbers = #tpu.dot_dimension_numbers<[1], [1], [0], [0], [0, 0, 1, 0], [], []>, precision = #tpu.contract_precision<fp32>} : vector<8x8xf32>, vector<8x8xf32>, vector<8x8xf32> -> vector<8x8xf32>
    "tpu.trace_stop"() : () -> ()
    %cst_30 = arith.constant 0.353553385 : f32
    %85 = vector.broadcast %cst_30 : f32 to vector<8x8xf32>
    %86 = arith.mulf %84, %85 : vector<8x8xf32>
    %cst_31 = arith.constant dense<0xFF800000> : vector<8xf32>
    %87 = vector.multi_reduction <maximumf>, %86, %cst_31 [1] : vector<8x8xf32> to vector<8xf32>
    %88 = vector.shape_cast %87 : vector<8xf32> to vector<8x1xf32>
    %89 = vector.broadcast %88 : vector<8x1xf32> to vector<8x8xf32>
    %90 = arith.subf %86, %89 : vector<8x8xf32>
    %91 = math.exp %90 : vector<8x8xf32>
    %cst_32 = arith.constant dense<0.000000e+00> : vector<8xf32>
    %92 = vector.multi_reduction <add>, %91, %cst_32 [1] : vector<8x8xf32> to vector<8xf32>
    %93 = vector.shape_cast %92 : vector<8xf32> to vector<8x1xf32>
    %94 = vector.broadcast %93 : vector<8x1xf32> to vector<8x8xf32>
    %95 = arith.divf %91, %94 : vector<8x8xf32>
    %cst_33 = arith.constant dense<0.000000e+00> : vector<8x8xf32>
    %96 = tpu.matmul %95, %83, %cst_33 {dimension_numbers = #tpu.dot_dimension_numbers<[1], [0], [0], [1], [0, 0, 1, 1], [], []>, precision = #tpu.contract_precision<fp32>} : vector<8x8xf32>, vector<8x8xf32>, vector<8x8xf32> -> vector<8x8xf32>
    %97 = tpu.concatenate %48, %64, %80, %96 in 1 : vector<8x8xf32>, vector<8x8xf32>, vector<8x8xf32>, vector<8x8xf32> -> vector<8x32xf32>
    %cst_34 = arith.constant dense<0.000000e+00> : vector<8x32xf32>
    %98 = tpu.matmul %97, %22, %cst_34 {dimension_numbers = #tpu.dot_dimension_numbers<[1], [0], [0], [1], [0, 0, 1, 1], [], []>, precision = #tpu.contract_precision<fp32>} : vector<8x32xf32>, vector<32x32xf32>, vector<8x32xf32> -> vector<8x32xf32>
    %99 = vector.broadcast %8 : vector<1x32xf32> to vector<8x32xf32>
    %100 = arith.addf %98, %99 : vector<8x32xf32>
    %101 = arith.addf %100, %1 : vector<8x32xf32>
    %cst_35 = arith.constant dense<0.000000e+00> : vector<8xf32>
    %102 = vector.multi_reduction <add>, %101, %cst_35 [1] : vector<8x32xf32> to vector<8xf32>
    %103 = vector.shape_cast %102 : vector<8xf32> to vector<8x1xf32>
    %cst_36 = arith.constant 3.200000e+01 : f32
    %104 = vector.broadcast %cst_36 : f32 to vector<8x1xf32>
    %105 = arith.divf %103, %104 : vector<8x1xf32>
    %106 = vector.broadcast %105 : vector<8x1xf32> to vector<8x32xf32>
    %107 = arith.subf %101, %106 : vector<8x32xf32>
    %108 = arith.mulf %107, %107 : vector<8x32xf32>
    %cst_37 = arith.constant dense<0.000000e+00> : vector<8xf32>
    %109 = vector.multi_reduction <add>, %108, %cst_37 [1] : vector<8x32xf32> to vector<8xf32>
    %110 = vector.shape_cast %109 : vector<8xf32> to vector<8x1xf32>
    %cst_38 = arith.constant 3.200000e+01 : f32
    %111 = vector.broadcast %cst_38 : f32 to vector<8x1xf32>
    %112 = arith.divf %110, %111 : vector<8x1xf32>
    %113 = math.sqrt %112 : vector<8x1xf32>
    %114 = vector.broadcast %113 : vector<8x1xf32> to vector<8x32xf32>
    %115 = arith.divf %107, %114 : vector<8x32xf32>
    %116 = vector.broadcast %14 : vector<1x32xf32> to vector<8x32xf32>
    %117 = arith.mulf %116, %115 : vector<8x32xf32>
    %118 = vector.broadcast %15 : vector<1x32xf32> to vector<8x32xf32>
    %119 = arith.addf %117, %118 : vector<8x32xf32>
    %c0_39 = arith.constant 0 : index
    %c0_40 = arith.constant 0 : index
    %120 = vector.load %arg6[%c0_39, %c0_40] : memref<32x32xf32, #tpu.memory_space<vmem>>, vector<32x32xf32>
    %c0_41 = arith.constant 0 : index
    %c0_42 = arith.constant 0 : index
    %121 = vector.load %arg7[%c0_41, %c0_42] : memref<32x64xf32, #tpu.memory_space<vmem>>, vector<32x64xf32>
    %c0_43 = arith.constant 0 : index
    %c0_44 = arith.constant 0 : index
    %122 = vector.load %arg8[%c0_43, %c0_44] : memref<32x32xf32, #tpu.memory_space<vmem>>, vector<32x32xf32>
    %cst_45 = arith.constant dense<0.000000e+00> : vector<8x32xf32>
    %123 = tpu.matmul %119, %120, %cst_45 {dimension_numbers = #tpu.dot_dimension_numbers<[1], [0], [0], [1], [0, 0, 1, 1], [], []>, precision = #tpu.contract_precision<fp32>} : vector<8x32xf32>, vector<32x32xf32>, vector<8x32xf32> -> vector<8x32xf32>
    %124 = vector.broadcast %9 : vector<1x32xf32> to vector<8x32xf32>
    %125 = arith.addf %123, %124 : vector<8x32xf32>
    %cst_46 = arith.constant dense<0.000000e+00> : vector<8x64xf32>
    %126 = tpu.matmul %3, %121, %cst_46 {dimension_numbers = #tpu.dot_dimension_numbers<[1], [0], [0], [1], [0, 0, 1, 1], [], []>, precision = #tpu.contract_precision<fp32>} : vector<8x32xf32>, vector<32x64xf32>, vector<8x64xf32> -> vector<8x64xf32>
    %127 = vector.extract_strided_slice %126 {offsets = [0, 0], sizes = [8, 32], strides = [1, 1]} : vector<8x64xf32> to vector<8x32xf32>
    %128 = vector.broadcast %10 : vector<1x32xf32> to vector<8x32xf32>
    %129 = arith.addf %127, %128 : vector<8x32xf32>
    %130 = vector.extract_strided_slice %126 {offsets = [0, 32], sizes = [8, 32], strides = [1, 1]} : vector<8x64xf32> to vector<8x32xf32>
    %131 = vector.broadcast %11 : vector<1x32xf32> to vector<8x32xf32>
    %132 = arith.addf %130, %131 : vector<8x32xf32>
    %133 = vector.extract_strided_slice %125 {offsets = [0, 0], sizes = [8, 8], strides = [1, 1]} : vector<8x32xf32> to vector<8x8xf32>
    %134 = vector.extract_strided_slice %129 {offsets = [0, 0], sizes = [8, 8], strides = [1, 1]} : vector<8x32xf32> to vector<8x8xf32>
    %135 = vector.extract_strided_slice %132 {offsets = [0, 0], sizes = [8, 8], strides = [1, 1]} : vector<8x32xf32> to vector<8x8xf32>
    "tpu.trace_start"() <{level = 10 : i32, message = "qd,kd->qk"}> : () -> ()
    %cst_47 = arith.constant dense<0.000000e+00> : vector<8x8xf32>
    %136 = tpu.matmul %133, %134, %cst_47 {dimension_numbers = #tpu.dot_dimension_numbers<[1], [1], [0], [0], [0, 0, 1, 0], [], []>, precision = #tpu.contract_precision<fp32>} : vector<8x8xf32>, vector<8x8xf32>, vector<8x8xf32> -> vector<8x8xf32>
    "tpu.trace_stop"() : () -> ()
    %cst_48 = arith.constant 0.353553385 : f32
    %137 = vector.broadcast %cst_48 : f32 to vector<8x8xf32>
    %138 = arith.mulf %136, %137 : vector<8x8xf32>
    %cst_49 = arith.constant dense<0xFF800000> : vector<8xf32>
    %139 = vector.multi_reduction <maximumf>, %138, %cst_49 [1] : vector<8x8xf32> to vector<8xf32>
    %140 = vector.shape_cast %139 : vector<8xf32> to vector<8x1xf32>
    %141 = vector.broadcast %140 : vector<8x1xf32> to vector<8x8xf32>
    %142 = arith.subf %138, %141 : vector<8x8xf32>
    %143 = math.exp %142 : vector<8x8xf32>
    %cst_50 = arith.constant dense<0.000000e+00> : vector<8xf32>
    %144 = vector.multi_reduction <add>, %143, %cst_50 [1] : vector<8x8xf32> to vector<8xf32>
    %145 = vector.shape_cast %144 : vector<8xf32> to vector<8x1xf32>
    %146 = vector.broadcast %145 : vector<8x1xf32> to vector<8x8xf32>
    %147 = arith.divf %143, %146 : vector<8x8xf32>
    %cst_51 = arith.constant dense<0.000000e+00> : vector<8x8xf32>
    %148 = tpu.matmul %147, %135, %cst_51 {dimension_numbers = #tpu.dot_dimension_numbers<[1], [0], [0], [1], [0, 0, 1, 1], [], []>, precision = #tpu.contract_precision<fp32>} : vector<8x8xf32>, vector<8x8xf32>, vector<8x8xf32> -> vector<8x8xf32>
    %149 = vector.extract_strided_slice %125 {offsets = [0, 8], sizes = [8, 8], strides = [1, 1]} : vector<8x32xf32> to vector<8x8xf32>
    %150 = vector.extract_strided_slice %129 {offsets = [0, 8], sizes = [8, 8], strides = [1, 1]} : vector<8x32xf32> to vector<8x8xf32>
    %151 = vector.extract_strided_slice %132 {offsets = [0, 8], sizes = [8, 8], strides = [1, 1]} : vector<8x32xf32> to vector<8x8xf32>
    "tpu.trace_start"() <{level = 10 : i32, message = "qd,kd->qk"}> : () -> ()
    %cst_52 = arith.constant dense<0.000000e+00> : vector<8x8xf32>
    %152 = tpu.matmul %149, %150, %cst_52 {dimension_numbers = #tpu.dot_dimension_numbers<[1], [1], [0], [0], [0, 0, 1, 0], [], []>, precision = #tpu.contract_precision<fp32>} : vector<8x8xf32>, vector<8x8xf32>, vector<8x8xf32> -> vector<8x8xf32>
    "tpu.trace_stop"() : () -> ()
    %cst_53 = arith.constant 0.353553385 : f32
    %153 = vector.broadcast %cst_53 : f32 to vector<8x8xf32>
    %154 = arith.mulf %152, %153 : vector<8x8xf32>
    %cst_54 = arith.constant dense<0xFF800000> : vector<8xf32>
    %155 = vector.multi_reduction <maximumf>, %154, %cst_54 [1] : vector<8x8xf32> to vector<8xf32>
    %156 = vector.shape_cast %155 : vector<8xf32> to vector<8x1xf32>
    %157 = vector.broadcast %156 : vector<8x1xf32> to vector<8x8xf32>
    %158 = arith.subf %154, %157 : vector<8x8xf32>
    %159 = math.exp %158 : vector<8x8xf32>
    %cst_55 = arith.constant dense<0.000000e+00> : vector<8xf32>
    %160 = vector.multi_reduction <add>, %159, %cst_55 [1] : vector<8x8xf32> to vector<8xf32>
    %161 = vector.shape_cast %160 : vector<8xf32> to vector<8x1xf32>
    %162 = vector.broadcast %161 : vector<8x1xf32> to vector<8x8xf32>
    %163 = arith.divf %159, %162 : vector<8x8xf32>
    %cst_56 = arith.constant dense<0.000000e+00> : vector<8x8xf32>
    %164 = tpu.matmul %163, %151, %cst_56 {dimension_numbers = #tpu.dot_dimension_numbers<[1], [0], [0], [1], [0, 0, 1, 1], [], []>, precision = #tpu.contract_precision<fp32>} : vector<8x8xf32>, vector<8x8xf32>, vector<8x8xf32> -> vector<8x8xf32>
    %165 = vector.extract_strided_slice %125 {offsets = [0, 16], sizes = [8, 8], strides = [1, 1]} : vector<8x32xf32> to vector<8x8xf32>
    %166 = vector.extract_strided_slice %129 {offsets = [0, 16], sizes = [8, 8], strides = [1, 1]} : vector<8x32xf32> to vector<8x8xf32>
    %167 = vector.extract_strided_slice %132 {offsets = [0, 16], sizes = [8, 8], strides = [1, 1]} : vector<8x32xf32> to vector<8x8xf32>
    "tpu.trace_start"() <{level = 10 : i32, message = "qd,kd->qk"}> : () -> ()
    %cst_57 = arith.constant dense<0.000000e+00> : vector<8x8xf32>
    %168 = tpu.matmul %165, %166, %cst_57 {dimension_numbers = #tpu.dot_dimension_numbers<[1], [1], [0], [0], [0, 0, 1, 0], [], []>, precision = #tpu.contract_precision<fp32>} : vector<8x8xf32>, vector<8x8xf32>, vector<8x8xf32> -> vector<8x8xf32>
    "tpu.trace_stop"() : () -> ()
    %cst_58 = arith.constant 0.353553385 : f32
    %169 = vector.broadcast %cst_58 : f32 to vector<8x8xf32>
    %170 = arith.mulf %168, %169 : vector<8x8xf32>
    %cst_59 = arith.constant dense<0xFF800000> : vector<8xf32>
    %171 = vector.multi_reduction <maximumf>, %170, %cst_59 [1] : vector<8x8xf32> to vector<8xf32>
    %172 = vector.shape_cast %171 : vector<8xf32> to vector<8x1xf32>
    %173 = vector.broadcast %172 : vector<8x1xf32> to vector<8x8xf32>
    %174 = arith.subf %170, %173 : vector<8x8xf32>
    %175 = math.exp %174 : vector<8x8xf32>
    %cst_60 = arith.constant dense<0.000000e+00> : vector<8xf32>
    %176 = vector.multi_reduction <add>, %175, %cst_60 [1] : vector<8x8xf32> to vector<8xf32>
    %177 = vector.shape_cast %176 : vector<8xf32> to vector<8x1xf32>
    %178 = vector.broadcast %177 : vector<8x1xf32> to vector<8x8xf32>
    %179 = arith.divf %175, %178 : vector<8x8xf32>
    %cst_61 = arith.constant dense<0.000000e+00> : vector<8x8xf32>
    %180 = tpu.matmul %179, %167, %cst_61 {dimension_numbers = #tpu.dot_dimension_numbers<[1], [0], [0], [1], [0, 0, 1, 1], [], []>, precision = #tpu.contract_precision<fp32>} : vector<8x8xf32>, vector<8x8xf32>, vector<8x8xf32> -> vector<8x8xf32>
    %181 = vector.extract_strided_slice %125 {offsets = [0, 24], sizes = [8, 8], strides = [1, 1]} : vector<8x32xf32> to vector<8x8xf32>
    %182 = vector.extract_strided_slice %129 {offsets = [0, 24], sizes = [8, 8], strides = [1, 1]} : vector<8x32xf32> to vector<8x8xf32>
    %183 = vector.extract_strided_slice %132 {offsets = [0, 24], sizes = [8, 8], strides = [1, 1]} : vector<8x32xf32> to vector<8x8xf32>
    "tpu.trace_start"() <{level = 10 : i32, message = "qd,kd->qk"}> : () -> ()
    %cst_62 = arith.constant dense<0.000000e+00> : vector<8x8xf32>
    %184 = tpu.matmul %181, %182, %cst_62 {dimension_numbers = #tpu.dot_dimension_numbers<[1], [1], [0], [0], [0, 0, 1, 0], [], []>, precision = #tpu.contract_precision<fp32>} : vector<8x8xf32>, vector<8x8xf32>, vector<8x8xf32> -> vector<8x8xf32>
    "tpu.trace_stop"() : () -> ()
    %cst_63 = arith.constant 0.353553385 : f32
    %185 = vector.broadcast %cst_63 : f32 to vector<8x8xf32>
    %186 = arith.mulf %184, %185 : vector<8x8xf32>
    %cst_64 = arith.constant dense<0xFF800000> : vector<8xf32>
    %187 = vector.multi_reduction <maximumf>, %186, %cst_64 [1] : vector<8x8xf32> to vector<8xf32>
    %188 = vector.shape_cast %187 : vector<8xf32> to vector<8x1xf32>
    %189 = vector.broadcast %188 : vector<8x1xf32> to vector<8x8xf32>
    %190 = arith.subf %186, %189 : vector<8x8xf32>
    %191 = math.exp %190 : vector<8x8xf32>
    %cst_65 = arith.constant dense<0.000000e+00> : vector<8xf32>
    %192 = vector.multi_reduction <add>, %191, %cst_65 [1] : vector<8x8xf32> to vector<8xf32>
    %193 = vector.shape_cast %192 : vector<8xf32> to vector<8x1xf32>
    %194 = vector.broadcast %193 : vector<8x1xf32> to vector<8x8xf32>
    %195 = arith.divf %191, %194 : vector<8x8xf32>
    %cst_66 = arith.constant dense<0.000000e+00> : vector<8x8xf32>
    %196 = tpu.matmul %195, %183, %cst_66 {dimension_numbers = #tpu.dot_dimension_numbers<[1], [0], [0], [1], [0, 0, 1, 1], [], []>, precision = #tpu.contract_precision<fp32>} : vector<8x8xf32>, vector<8x8xf32>, vector<8x8xf32> -> vector<8x8xf32>
    %197 = tpu.concatenate %148, %164, %180, %196 in 1 : vector<8x8xf32>, vector<8x8xf32>, vector<8x8xf32>, vector<8x8xf32> -> vector<8x32xf32>
    %cst_67 = arith.constant dense<0.000000e+00> : vector<8x32xf32>
    %198 = tpu.matmul %197, %122, %cst_67 {dimension_numbers = #tpu.dot_dimension_numbers<[1], [0], [0], [1], [0, 0, 1, 1], [], []>, precision = #tpu.contract_precision<fp32>} : vector<8x32xf32>, vector<32x32xf32>, vector<8x32xf32> -> vector<8x32xf32>
    %199 = vector.broadcast %12 : vector<1x32xf32> to vector<8x32xf32>
    %200 = arith.addf %198, %199 : vector<8x32xf32>
    %201 = arith.addf %200, %119 : vector<8x32xf32>
    %cst_68 = arith.constant dense<0.000000e+00> : vector<8xf32>
    %202 = vector.multi_reduction <add>, %201, %cst_68 [1] : vector<8x32xf32> to vector<8xf32>
    %203 = vector.shape_cast %202 : vector<8xf32> to vector<8x1xf32>
    %cst_69 = arith.constant 3.200000e+01 : f32
    %204 = vector.broadcast %cst_69 : f32 to vector<8x1xf32>
    %205 = arith.divf %203, %204 : vector<8x1xf32>
    %206 = vector.broadcast %205 : vector<8x1xf32> to vector<8x32xf32>
    %207 = arith.subf %201, %206 : vector<8x32xf32>
    %208 = arith.mulf %207, %207 : vector<8x32xf32>
    %cst_70 = arith.constant dense<0.000000e+00> : vector<8xf32>
    %209 = vector.multi_reduction <add>, %208, %cst_70 [1] : vector<8x32xf32> to vector<8xf32>
    %210 = vector.shape_cast %209 : vector<8xf32> to vector<8x1xf32>
    %cst_71 = arith.constant 3.200000e+01 : f32
    %211 = vector.broadcast %cst_71 : f32 to vector<8x1xf32>
    %212 = arith.divf %210, %211 : vector<8x1xf32>
    %213 = math.sqrt %212 : vector<8x1xf32>
    %214 = vector.broadcast %213 : vector<8x1xf32> to vector<8x32xf32>
    %215 = arith.divf %207, %214 : vector<8x32xf32>
    %216 = vector.broadcast %16 : vector<1x32xf32> to vector<8x32xf32>
    %217 = arith.mulf %216, %215 : vector<8x32xf32>
    %218 = vector.broadcast %17 : vector<1x32xf32> to vector<8x32xf32>
    %219 = arith.addf %217, %218 : vector<8x32xf32>
    %c0_72 = arith.constant 0 : index
    %c0_73 = arith.constant 0 : index
    %220 = vector.load %arg9[%c0_72, %c0_73] : memref<32x32xf32, #tpu.memory_space<vmem>>, vector<32x32xf32>
    %cst_74 = arith.constant dense<0.000000e+00> : vector<8x32xf32>
    %221 = tpu.matmul %219, %220, %cst_74 {dimension_numbers = #tpu.dot_dimension_numbers<[1], [0], [0], [1], [0, 0, 1, 1], [], []>, precision = #tpu.contract_precision<fp32>} : vector<8x32xf32>, vector<32x32xf32>, vector<8x32xf32> -> vector<8x32xf32>
    %c0_75 = arith.constant 0 : index
    %c0_76 = arith.constant 0 : index
    %222 = vector.load %arg10[%c0_75, %c0_76] : memref<1x32xf32, #tpu.memory_space<vmem>>, vector<1x32xf32>
    %223 = vector.broadcast %222 : vector<1x32xf32> to vector<8x32xf32>
    %224 = arith.addf %221, %223 : vector<8x32xf32>
    %cst_77 = arith.constant 0.000000e+00 : f32
    %225 = vector.broadcast %cst_77 : f32 to vector<8x32xf32>
    %226 = arith.maximumf %224, %225 : vector<8x32xf32>
    %c0_78 = arith.constant 0 : index
    %c0_79 = arith.constant 0 : index
    %227 = vector.load %arg11[%c0_78, %c0_79] : memref<32x32xf32, #tpu.memory_space<vmem>>, vector<32x32xf32>
    %cst_80 = arith.constant dense<0.000000e+00> : vector<8x32xf32>
    %228 = tpu.matmul %226, %227, %cst_80 {dimension_numbers = #tpu.dot_dimension_numbers<[1], [0], [0], [1], [0, 0, 1, 1], [], []>, precision = #tpu.contract_precision<fp32>} : vector<8x32xf32>, vector<32x32xf32>, vector<8x32xf32> -> vector<8x32xf32>
    %229 = vector.broadcast %13 : vector<1x32xf32> to vector<8x32xf32>
    %230 = arith.addf %228, %229 : vector<8x32xf32>
    %cst_81 = arith.constant dense<0.000000e+00> : vector<8xf32>
    %231 = vector.multi_reduction <add>, %230, %cst_81 [1] : vector<8x32xf32> to vector<8xf32>
    %232 = vector.shape_cast %231 : vector<8xf32> to vector<8x1xf32>
    %cst_82 = arith.constant 3.200000e+01 : f32
    %233 = vector.broadcast %cst_82 : f32 to vector<8x1xf32>
    %234 = arith.divf %232, %233 : vector<8x1xf32>
    %235 = vector.broadcast %234 : vector<8x1xf32> to vector<8x32xf32>
    %236 = arith.subf %230, %235 : vector<8x32xf32>
    %237 = arith.mulf %236, %236 : vector<8x32xf32>
    %cst_83 = arith.constant dense<0.000000e+00> : vector<8xf32>
    %238 = vector.multi_reduction <add>, %237, %cst_83 [1] : vector<8x32xf32> to vector<8xf32>
    %239 = vector.shape_cast %238 : vector<8xf32> to vector<8x1xf32>
    %cst_84 = arith.constant 3.200000e+01 : f32
    %240 = vector.broadcast %cst_84 : f32 to vector<8x1xf32>
    %241 = arith.divf %239, %240 : vector<8x1xf32>
    %242 = math.sqrt %241 : vector<8x1xf32>
    %243 = vector.broadcast %242 : vector<8x1xf32> to vector<8x32xf32>
    %244 = arith.divf %236, %243 : vector<8x32xf32>
    %245 = vector.broadcast %18 : vector<1x32xf32> to vector<8x32xf32>
    %246 = arith.mulf %245, %244 : vector<8x32xf32>
    %247 = vector.broadcast %19 : vector<1x32xf32> to vector<8x32xf32>
    %248 = arith.addf %246, %247 : vector<8x32xf32>
    %c0_85 = arith.constant 0 : index
    %c0_86 = arith.constant 0 : index
    %c0_87 = arith.constant 0 : index
    %249 = vector.load %arg13[%c0_85, %c0_86, %c0_87] : memref<1x8x32xf32, #tpu.memory_space<vmem>>, vector<1x8x32xf32>
    %250 = vector.shape_cast %249 : vector<1x8x32xf32> to vector<8x32xf32>
    %251 = vector.shape_cast %248 : vector<8x32xf32> to vector<1x8x32xf32>
    tpu.vector_store %arg13[%c0_85, %c0_86, %c0_87], %251 {strides = array<i32>} : memref<1x8x32xf32, #tpu.memory_space<vmem>>, vector<1x8x32xf32>,
    return
  }
  func.func @transform_0(%arg0: i32) -> (i32, i32, i32) {
    %c0_i32 = arith.constant 0 : i32
    %c0_i32_0 = arith.constant 0 : i32
    %c0_i32_1 = arith.constant 0 : i32
    return %arg0, %c0_i32, %c0_i32_0 : i32, i32, i32
  }
  func.func @transform_1(%arg0: i32) -> (i32, i32, i32) {
    %c0_i32 = arith.constant 0 : i32
    %c0_i32_0 = arith.constant 0 : i32
    %c0_i32_1 = arith.constant 0 : i32
    return %arg0, %c0_i32, %c0_i32_0 : i32, i32, i32
  }
  func.func @transform_2(%arg0: i32) -> (i32, i32) {
    %c0_i32 = arith.constant 0 : i32
    %c0_i32_0 = arith.constant 0 : i32
    %c0_i32_1 = arith.constant 0 : i32
    return %c0_i32, %c0_i32_0 : i32, i32
  }
  func.func @transform_3(%arg0: i32) -> (i32, i32) {
    %c0_i32 = arith.constant 0 : i32
    %c0_i32_0 = arith.constant 0 : i32
    %c0_i32_1 = arith.constant 0 : i32
    return %c0_i32, %c0_i32_0 : i32, i32
  }
  func.func @transform_4(%arg0: i32) -> (i32, i32) {
    %c0_i32 = arith.constant 0 : i32
    %c0_i32_0 = arith.constant 0 : i32
    %c0_i32_1 = arith.constant 0 : i32
    return %c0_i32, %c0_i32_0 : i32, i32
  }
  func.func @transform_5(%arg0: i32) -> (i32, i32) {
    %c0_i32 = arith.constant 0 : i32
    %c0_i32_0 = arith.constant 0 : i32
    %c0_i32_1 = arith.constant 0 : i32
    return %c0_i32, %c0_i32_0 : i32, i32
  }
  func.func @transform_6(%arg0: i32) -> (i32, i32) {
    %c0_i32 = arith.constant 0 : i32
    %c0_i32_0 = arith.constant 0 : i32
    %c0_i32_1 = arith.constant 0 : i32
    return %c0_i32, %c0_i32_0 : i32, i32
  }
  func.func @transform_7(%arg0: i32) -> (i32, i32) {
    %c0_i32 = arith.constant 0 : i32
    %c0_i32_0 = arith.constant 0 : i32
    %c0_i32_1 = arith.constant 0 : i32
    return %c0_i32, %c0_i32_0 : i32, i32
  }
  func.func @transform_8(%arg0: i32) -> (i32, i32) {
    %c0_i32 = arith.constant 0 : i32
    %c0_i32_0 = arith.constant 0 : i32
    %c0_i32_1 = arith.constant 0 : i32
    return %c0_i32, %c0_i32_0 : i32, i32
  }
  func.func @transform_9(%arg0: i32) -> (i32, i32) {
    %c0_i32 = arith.constant 0 : i32
    %c0_i32_0 = arith.constant 0 : i32
    %c0_i32_1 = arith.constant 0 : i32
    return %c0_i32, %c0_i32_0 : i32, i32
  }
  func.func @transform_10(%arg0: i32) -> (i32, i32) {
    %c0_i32 = arith.constant 0 : i32
    %c0_i32_0 = arith.constant 0 : i32
    %c0_i32_1 = arith.constant 0 : i32
    return %c0_i32, %c0_i32_0 : i32, i32
  }
  func.func @transform_11(%arg0: i32) -> (i32, i32) {
    %c0_i32 = arith.constant 0 : i32
    %c0_i32_0 = arith.constant 0 : i32
    %c0_i32_1 = arith.constant 0 : i32
    return %c0_i32, %c0_i32_0 : i32, i32
  }
  func.func @transform_12(%arg0: i32) -> (i32, i32, i32) {
    %c0_i32 = arith.constant 0 : i32
    %c0_i32_0 = arith.constant 0 : i32
    %c0_i32_1 = arith.constant 0 : i32
    return %arg0, %c0_i32, %c0_i32_0 : i32, i32, i32
  }
}

</mosaic_0001>

<bundles_post_ra>
// kernel: tpu_custom_call.1
= control target key start
LH: loop header
LB: loop body
LE: loop exit
PB: predicated region body
PF: predicated region fallthrough
CT: control target
= control target key end

     0   :  { %s15934_s0 = inlined_call_operand.hbm [shape: f32[2,8,32], index: 0, kind: input, shape index: {}]   ;;  %s15935_s1 = inlined_call_operand.hbm [shape: f32[2,8,32], index: 1, kind: input, shape index: {}]   ;;  %s15936_s2 = inlined_call_operand.hbm [shape: f32[32,32], index: 2, kind: input, shape index: {}]   ;;  %s15937_s3 = inlined_call_operand.hbm [shape: f32[32,64], index: 3, kind: input, shape index: {}]   ;;  %s15938_s4 = inlined_call_operand.hbm [shape: f32[32,32], index: 4, kind: input, shape index: {}]   ;;  %s15939_s5 = inlined_call_operand.hbm [shape: f32[32,32], index: 5, kind: input, shape index: {}]   ;;  %s15940_s6 = inlined_call_operand.hbm [shape: f32[32,64], index: 6, kind: input, shape index: {}]   ;;  %s15941_s7 = inlined_call_operand.hbm [shape: f32[32,32], index: 7, kind: input, shape index: {}]   ;;  %s15942_s8 = inlined_call_operand.hbm [shape: f32[32,32], index: 8, kind: input, shape index: {}]   ;;  %s15943_s9 = inlined_call_operand.vmem [shape: f32[1,32], index: 9, kind: input, shape index: {}]   ;;  %s15944_s10 = inlined_call_operand.hbm [shape: f32[32,32], index: 10, kind: input, shape index: {}]   ;;  %s15945_s11 = inlined_call_operand.vmem [shape: f32[15,32], index: 11, kind: input, shape index: {}]   ;;  %s15946_s12 = inlined_call_operand.hbm [shape: f32[2,8,32], index: 12, kind: output, shape index: {}]  }
   0x1   :  { %15951 = sst [smem:[#allocation29_spill]] %s15936_s2 }
   0x2   :  { %15952 = sst [smem:[#allocation30_spill]] %s15937_s3 }
   0x3   :  { %15953 = sst [smem:[#allocation31_spill]] %s15938_s4 }
   0x4   :  { %15954 = sst [smem:[#allocation32_spill]] %s15939_s5 }
   0x5   :  { %15955 = sst [smem:[#allocation33_spill]] %s15940_s6 }
   0x6   :  { %15956 = sst [smem:[#allocation34_spill]] %s15941_s7 }
   0x7   :  { %15957 = sst [smem:[#allocation35_spill]] %s15942_s8 }
   0x8   :  { %15958 = sst [smem:[#allocation36_spill]] %s15944_s10 }
   0x9   :  { %17 = vsyncpa [#allocation3], 0 }
   0xa   :  { %19 = vsyncpa [#allocation3 + $0x1], 0 }
   0xb   :  { %20 = vsyncpa [#allocation6], 0 }
   0xc   :  { %22 = vsyncpa [#allocation6 + $0x1], 0 }
   0xd   :  { %23 = vsyncpa [#allocation9], 0 }
   0xe   :  { %24 = vsyncpa [#allocation12], 0 }
   0xf   :  { %25 = vsyncpa [#allocation15], 0 }
  0x10   :  { %26 = vsyncpa [#allocation18], 0 }
  0x11   :  { %27 = vsyncpa [#allocation4], 0 }
  0x12   :  { %29 = vsyncpa [#allocation4 + $0x1], 0  ;;  %s14337_s21 = smov 0   ;;  %s14339_s22 = smov 0  }
  0x13   :  { %s14341_s23 = smov 0   ;;  %s14343_s24 = smov 0  }
  0x14 LB: > { %s14246_s25 = smov [#allocation7]   ;;  %s14358_s27 = sadd.s32 4294967295, %s14244_s24   ;;  %s14244_s24 = sphi %s14343_s24, %s15995_s24   ;;  %s14240_s23 = sphi %s14341_s23, %s15994_s23   ;;  %s14236_s22 = sphi %s14339_s22, %s15993_s22   ;;  %s14232_s21 = sphi %s14337_s21, %s15992_s21  }
  0x15   : > { %s340_s26 = sshll.u32 %s14246_s25, 4  ;;  %p12226_p0 = scmp.ge.s32.totalorder %s14244_s24, 1  ;;  %s341_s26 = int_to_ptr.vmem [resolvable:$true] %s340_s26 }
  0x16   : > { %p15947_p1 = scmp.eq.s32.totalorder %s14358_s27, 0  ;;  %p328_p2 = scmp.lt.s32.totalorder %s14244_s24, 3 }
  0x17   : > { %s14247_s29 = smov [#allocation8]   ;;  %s14248_s14 = smov [#allocation11]  }
  0x18   : > { %p14363_p3 = pnand %p12226_p0, %p328_p2  ;;  %s353_s30 = sshll.u32 %s14247_s29, 4  ;;  %s14376_s30 = int_to_ptr.vmem [resolvable:$true] %s353_s30 }
  0x19   : > { %s379_s15 = sshll.u32 %s14248_s14, 4  ;;  %s13903_s17 = scalar_lea.vmem %s341_s26, 512  ;;  %s14378_s15 = int_to_ptr.vmem [resolvable:$true] %s379_s15 }
  0x1a   : > { %s15959_s28 = scalar_select %p14363_p3, 1, 0 }
  0x1b   : > { %p13735_p5 = pneg %p14363_p3  ;;  %p13904_p8 = scmp.ne.s32.totalorder %s341_s26, %s13903_s17 }
  0x1c   : > { %p13911_p11 = scmp.lt.s32.totalorder %s341_s26, %s341_s26  ;;  %p13912_p12 = scmp.lt.s32.totalorder %s13903_s17, %s13903_s17 }
  0x1d   : > { %p14372_p6 = pnand %p13735_p5, %p15947_p1 }
  0x1e   : > { %p13913_p13 = por %p13912_p12, %p13911_p11 }
  0x1f   : > { %p14382_p7 = pneg %p14372_p6 }
  0x21   : > { %p13906_p9 = pnand %p13904_p8, %p14382_p7 }
  0x23   : > { %p13907_p10 = pneg %p13906_p9 }
  0x25   : > { %p13914_p0 = pnand %p13913_p13, %p13907_p10 }
  0x27   : > { %13917 = shalt.err (!%p13914_p0)
}
  0x28   : > { %s14249_s18 = smov 128   ;;  %s14250_s19 = smov 8  }
  0x29   : > { %s15962_s2 = sld [smem:[#allocation29_spill]]  ;;  %s13929_s29 = scalar_lea.vmem %s14376_s30, 512 }
  0x2a   : > { %p13930_p2 = scmp.ne.s32.totalorder %s14376_s30, %s13929_s29  ;;  %p13937_p9 = scmp.lt.s32.totalorder %s14376_s30, %s14376_s30 }
  0x2b   : > { %p13938_p10 = scmp.lt.s32.totalorder %s13929_s29, %s13929_s29 }
  0x2c   : > { %p13932_p5 = pnand %p13930_p2, %p14382_p7 }
  0x2d   : > { %p13939_p11 = por %p13938_p10, %p13937_p9 }
  0x2e   : > { %p13933_p8 = pneg %p13932_p5 }
  0x2f   : > { %13738 = dma.hbm_to_vmem [thread:$0]  (!%p14372_p6), %s15962_s2, 512, %s341_s26, [#allocation6], %s14249_s18, %s14249_s18, %s14250_s19  }
  0x30   : > { %p13940_p12 = pnand %p13939_p11, %p13933_p8 }
  0x32   : > { %13943 = shalt.err (!%p13940_p12)
}
  0x33   : > { %s15963_s3 = sld [smem:[#allocation30_spill]]  ;;  %s13955_s26 = scalar_lea.vmem %s14378_s15, 512 }
  0x34   : > { %p13956_p13 = scmp.ne.s32.totalorder %s14378_s15, %s13955_s26  ;;  %p13963_p5 = scmp.lt.s32.totalorder %s14378_s15, %s14378_s15 }
  0x35   : > { %p13964_p8 = scmp.lt.s32.totalorder %s13955_s26, %s13955_s26 }
  0x36   : > { %p13958_p0 = pnand %p13956_p13, %p14382_p7 }
  0x37   : > { %p13965_p9 = por %p13964_p8, %p13963_p5 }
  0x38   : > { %p13959_p2 = pneg %p13958_p0 }
  0x39   : > { %13741 = dma.hbm_to_vmem [thread:$0]  (!%p14372_p6), %s15963_s3, 512, %s14376_s30, [#allocation9], %s14249_s18, %s14249_s18, %s14250_s19  }
  0x3a   : > { %p13966_p10 = pnand %p13965_p9, %p13959_p2 }
  0x3c   : > { %13969 = shalt.err (!%p13966_p10)
}
  0x3d   : > { %s15964_s5 = sld [smem:[#allocation32_spill]]  ;;  %s14251_s30 = smov [#allocation14]  }
  0x3e   : > { %s405_s29 = sshll.u32 %s14251_s30, 4  ;;  %s14252_s14 = smov [#allocation10]   ;;  %s406_s29 = int_to_ptr.vmem [resolvable:$true] %s405_s29 }
  0x3f   : > { %s366_s17 = sshll.u32 %s14252_s14, 4  ;;  %s13981_s26 = scalar_lea.vmem %s406_s29, 512  ;;  %s367_s17 = int_to_ptr.vmem [resolvable:$true] %s366_s17 }
  0x40   : > { %p13982_p11 = scmp.ne.s32.totalorder %s406_s29, %s13981_s26  ;;  %p13989_p0 = scmp.lt.s32.totalorder %s406_s29, %s406_s29 }
  0x41   : > { %p13990_p2 = scmp.lt.s32.totalorder %s13981_s26, %s13981_s26 }
  0x42   : > { %p13984_p12 = pnand %p13982_p11, %p14382_p7 }
  0x43   : > { %13747 = dma.hbm_to_vmem [thread:$0]  (!%p14372_p6), %s15964_s5, 512, %s14378_s15, [#allocation12], %s14249_s18, %s14249_s18, %s14250_s19  }
  0x44   : > { %p13985_p13 = pneg %p13984_p12  ;;  %p13991_p5 = por %p13990_p2, %p13989_p0 }
  0x46   : > { %p13992_p8 = pnand %p13991_p5, %p13985_p13 }
  0x48   : > { %13995 = shalt.err (!%p13992_p8)
}
  0x49   : > { %s15965_s7 = sld [smem:[#allocation34_spill]]  ;;  %s14007_s25 = scalar_lea.vmem %s367_s17, 512 }
  0x4a   : > { %p14008_p9 = scmp.ne.s32.totalorder %s367_s17, %s14007_s25  ;;  %p14015_p12 = scmp.lt.s32.totalorder %s367_s17, %s367_s17 }
  0x4b   : > { %p14016_p0 = scmp.lt.s32.totalorder %s14007_s25, %s14007_s25 }
  0x4c   : > { %p14010_p10 = pnand %p14008_p9, %p14382_p7 }
  0x4d   : > { %p14017_p13 = por %p14016_p0, %p14015_p12 }
  0x4e   : > { %p14011_p11 = pneg %p14010_p10 }
  0x4f   : > { %13753 = dma.hbm_to_vmem [thread:$0]  (!%p14372_p6), %s15965_s7, 512, %s406_s29, [#allocation15], %s14249_s18, %s14249_s18, %s14250_s19  }
  0x50   : > { %p14018_p2 = pnand %p14017_p13, %p14011_p11 }
  0x52   : > { %14021 = shalt.err (!%p14018_p2)
}
  0x53   : > { %s15966_s4 = sld [smem:[#allocation31_spill]]  ;;  %s14253_s29 = smov [#allocation13]  }
  0x54   : > { %s392_s26 = sshll.u32 %s14253_s29, 4  ;;  %s14254_s15 = smov [#allocation16]   ;;  %s393_s26 = int_to_ptr.vmem [resolvable:$true] %s392_s26 }
  0x55   : > { %s418_s20 = sshll.u32 %s14254_s15, 4  ;;  %s14033_s2 = scalar_lea.vmem %s393_s26, 512  ;;  %s419_s20 = int_to_ptr.vmem [resolvable:$true] %s418_s20 }
  0x56   : > { %p14034_p5 = scmp.ne.s32.totalorder %s393_s26, %s14033_s2  ;;  %p14041_p10 = scmp.lt.s32.totalorder %s393_s26, %s393_s26 }
  0x57   : > { %p14042_p11 = scmp.lt.s32.totalorder %s14033_s2, %s14033_s2 }
  0x58   : > { %p14036_p8 = pnand %p14034_p5, %p14382_p7 }
  0x59   : > { %13744 = dma.hbm_to_vmem [thread:$0]  (!%p14372_p6), %s15966_s4, 512, %s367_s17, [#allocation9], %s14249_s18, %s14249_s18, %s14250_s19  }
  0x5a   : > { %p14037_p9 = pneg %p14036_p8  ;;  %p14043_p12 = por %p14042_p11, %p14041_p10 }
  0x5c   : > { %p14044_p0 = pnand %p14043_p12, %p14037_p9 }
  0x5e   : > { %14047 = shalt.err (!%p14044_p0)
}
  0x5f   : > { %s15967_s6 = sld [smem:[#allocation33_spill]]  ;;  %s14059_s30 = scalar_lea.vmem %s419_s20, 512 }
  0x60   : > { %p14060_p13 = scmp.ne.s32.totalorder %s419_s20, %s14059_s30  ;;  %p14067_p8 = scmp.lt.s32.totalorder %s419_s20, %s419_s20 }
  0x61   : > { %p14068_p10 = scmp.lt.s32.totalorder %s14059_s30, %s14059_s30 }
  0x62   : > { %p14062_p2 = pnand %p14060_p13, %p14382_p7 }
  0x63   : > { %p14069_p9 = por %p14068_p10, %p14067_p8 }
  0x64   : > { %p14063_p5 = pneg %p14062_p2 }
  0x65   : > { %13750 = dma.hbm_to_vmem [thread:$0]  (!%p14372_p6), %s15967_s6, 512, %s393_s26, [#allocation12], %s14249_s18, %s14249_s18, %s14250_s19  }
  0x66   : > { %p14070_p11 = pnand %p14069_p9, %p14063_p5 }
  0x68   : > { %14073 = shalt.err (!%p14070_p11)
}
  0x69   : > { %s15968_s8 = sld [smem:[#allocation35_spill]]  ;;  %s14255_s29 = smov [#allocation17]  }
  0x6a   : > { %s434_s26 = sshll.u32 %s14255_s29, 4  ;;  %s435_s26 = int_to_ptr.vmem [resolvable:$true] %s434_s26 }
  0x6b   : > { %s14085_s15 = scalar_lea.vmem %s435_s26, 512  ;;  %p14093_p2 = scmp.lt.s32.totalorder %s435_s26, %s435_s26 }
  0x6c   : > { %p14086_p12 = scmp.ne.s32.totalorder %s435_s26, %s14085_s15  ;;  %p14094_p5 = scmp.lt.s32.totalorder %s14085_s15, %s14085_s15 }
  0x6e   : > { %p14088_p0 = pnand %p14086_p12, %p14382_p7  ;;  %p14095_p8 = por %p14094_p5, %p14093_p2 }
  0x6f   : > { %13756 = dma.hbm_to_vmem [thread:$0]  (!%p14372_p6), %s15968_s8, 512, %s419_s20, [#allocation15], %s14249_s18, %s14249_s18, %s14250_s19  }
  0x70   : > { %p14089_p13 = pneg %p14088_p0 }
  0x72   : > { %p14096_p10 = pnand %p14095_p8, %p14089_p13 }
  0x74   : > { %14099 = shalt.err (!%p14096_p10)
}
  0x75   : > { %s15969_s10 = sld [smem:[#allocation36_spill]]  ;;  %s12225_s13 = sadd.s32 4294967294, %s14244_s24  }
  0x76   : > { %s14478_s16 = sadd.s32 1, %s14244_s24   ;;  %s42_s30 = sadd.s32 1, %s14240_s23 }
  0x77   : > { %s39_s25 = ssub.s32 %s14244_s24, %s14478_s16  ;;  %p49_p9 = scmp.ne.s32.totalorder %s14240_s23, %s14236_s22 }
  0x78   : > { %p40_p7 = scmp.eq.s32.totalorder %s39_s25, 0  ;;  %p50_p11 = scmp.eq.s32.totalorder %s14244_s24, 0 }
  0x79   : > { %p55_p12 = scmp.ne.s32.totalorder %s14236_s22, %s14232_s21  ;;  %p315_p13 = scmp.eq.s32.totalorder %s14358_s27, 1 }
  0x7a   : > { %s14489_s2 = scalar_select %p40_p7, %s14240_s23, %s42_s30  }
  0x7b   : > { %13759 = dma.hbm_to_vmem [thread:$0]  (!%p14372_p6), %s15969_s10, 512, %s435_s26, [#allocation18], %s14249_s18, %s14249_s18, %s14250_s19  }
  0x7c   : > { %15970 = sst [smem:[#allocation28_spill]] %s14489_s2  ;;  %p14491_p0 = por %p50_p11, %p49_p9 }
  0x7d   : > { %p14497_p6 = por %p15947_p1, %p55_p12  ;;  %p321_p2 = scmp.eq.s32.totalorder %s12225_s13, 1 }
  0x7e   : > { %p13779_p5 = scmp.lt.s32.totalorder %s14244_s24, 2  ;;  %s451_s19 = sand.u32 1, %s14240_s23  }
  0x7f   : > { %s15972_s18 = scalar_select %p14497_p6, 1, 0 }
  0x80   : > { %p14504_p8 = por %p315_p13, %p49_p9  ;;  %p14508_p10 = por %p321_p2, %p55_p12 }
  0x81   : > { %s14512_s15 = sshll.u32 %s451_s19, 3  ;;  %s12237_s17 = sshll.u32 %s14244_s24, 7 }
  0x82   : > { %s15973_s29 = scalar_select %p14504_p8, 1, 0 }
  0x83   : > { %s15974_s26 = scalar_select %p14508_p10, 1, 0 }
  0x84   : > { %s14518_s30 = scalar_lea.hbm %s15934_s0, %s12237_s17  ;;  %s455_s13 = scalar_lea.vmem [#allocation2], %s14512_s15 }
  0x85   : > { %s462_s3 = sshll.u32 %s455_s13, 4  ;;  %p14525_p7 = pnand %p13779_p5, %p14491_p0  ;;  %s14521_s3 = int_to_ptr.vmem [resolvable:$true] %s462_s3 }
  0x86   : > { %s14532_s20 = scalar_lea.hbm %s15935_s1, %s12237_s17  ;;  %s469_s25 = sand.u32 1, %s14244_s24  }
  0x87   : > { %s452_s7 = scalar_lea.sflag [#allocation3], %s451_s19  ;;  %s14100_s8 = scalar_lea.hbm %s14518_s30, 128 }
  0x88   : > { %p14101_p9 = scmp.ne.s32.totalorder %s14518_s30, %s14100_s8  ;;  %p14102_p11 = pneg %p14525_p7 }
  0x89   : > { %s14105_s10 = scalar_lea.hbm %s15934_s0, 256  ;;  %p14106_p13 = scmp.lt.s32.totalorder %s14518_s30, %s15934_s0 }
  0x8a   : > { %p14103_p12 = pnand %p14102_p11, %p14101_p9  ;;  %p14107_p2 = scmp.lt.s32.totalorder %s14105_s10, %s14100_s8 }
  0x8c   : > { %p14104_p0 = pneg %p14103_p12  ;;  %p14108_p5 = por %p14107_p2, %p14106_p13 }
  0x8e   : > { %p14109_p4 = pnand %p14108_p5, %p14104_p0 }
  0x90   : > { %14112 = shalt.err (!%p14109_p4)
}
  0x91   : > { %s14113_s6 = scalar_lea.vmem %s14521_s3, 128  ;;  %s14256_s19 = smov [#allocation2]  }
  0x92   : > { %p14114_p1 = scmp.ne.s32.totalorder %s14521_s3, %s14113_s6  ;;  %s14118_s17 = sshll.u32 %s14256_s19, 4  ;;  %s14119_s17 = int_to_ptr.vmem [resolvable:$false] %s14118_s17 }
  0x93   : > { %s14120_s14 = scalar_lea.vmem %s14119_s17, 256  ;;  %p14121_p10 = scmp.lt.s32.totalorder %s14521_s3, %s14119_s17 }
  0x94   : > { %p14116_p9 = pnand %p14114_p1, %p14102_p11  ;;  %p14122_p8 = scmp.lt.s32.totalorder %s14120_s14, %s14113_s6 }
  0x96   : > { %p14117_p12 = pneg %p14116_p9  ;;  %p14123_p6 = por %p14122_p8, %p14121_p10 }
  0x98   : > { %p14124_p13 = pnand %p14123_p6, %p14117_p12 }
  0x9a   : > { %14127 = shalt.err (!%p14124_p13)
}
  0x9b   : > { %13763 = dma.hbm_to_vmem [thread:$0]  (!%p14525_p7), %s14518_s30, 128, %s14521_s3, %s452_s7  }
  0x9c   : > { %s473_s8 = scalar_lea.vmem [#allocation5], %s14512_s15  ;;  %s470_s2 = scalar_lea.sflag [#allocation6], %s469_s25 }
  0x9d   : > { %s480_s10 = sshll.u32 %s473_s8, 4  ;;  %s14128_s13 = scalar_lea.hbm %s14532_s20, 128  ;;  %s481_s10 = int_to_ptr.vmem [resolvable:$true] %s480_s10 }
  0x9e   : > { %p14129_p1 = scmp.ne.s32.totalorder %s14532_s20, %s14128_s13  ;;  %s14133_s19 = scalar_lea.hbm %s15935_s1, 256 }
  0x9f   : > { %p14134_p8 = scmp.lt.s32.totalorder %s14532_s20, %s15935_s1  ;;  %p14135_p10 = scmp.lt.s32.totalorder %s14133_s19, %s14128_s13 }
  0xa0   : > { %p14131_p4 = pnand %p14129_p1, %p14102_p11 }
  0xa1   : > { %p14136_p0 = por %p14135_p10, %p14134_p8 }
  0xa2   : > { %p14132_p6 = pneg %p14131_p4 }
  0xa4   : > { %p14137_p2 = pnand %p14136_p0, %p14132_p6 }
  0xa6   : > { %14140 = shalt.err (!%p14137_p2)
}
  0xa7   : > { %s14141_s3 = scalar_lea.vmem %s481_s10, 128  ;;  %s14257_s7 = smov [#allocation5]  }
  0xa8   : > { %p14142_p5 = scmp.ne.s32.totalorder %s481_s10, %s14141_s3  ;;  %s14146_s15 = sshll.u32 %s14257_s7, 4  ;;  %s14147_s15 = int_to_ptr.vmem [resolvable:$false] %s14146_s15 }
  0xa9   : > { %s14148_s30 = scalar_lea.vmem %s14147_s15, 256  ;;  %p14149_p13 = scmp.lt.s32.totalorder %s481_s10, %s14147_s15 }
  0xaa   : > { %p14144_p9 = pnand %p14142_p5, %p14102_p11  ;;  %p14150_p1 = scmp.lt.s32.totalorder %s14148_s30, %s14141_s3 }
  0xac   : > { %p14145_p12 = pneg %p14144_p9  ;;  %p14151_p4 = por %p14150_p1, %p14149_p13 }
  0xae   : > { %p14152_p3 = pnand %p14151_p4, %p14145_p12 }
  0xb0   : > { %14155 = shalt.err (!%p14152_p3)
}
  0xb1   : > { %13766 = dma.hbm_to_vmem [thread:$0]  (!%p14525_p7), %s14532_s20, 128, %s481_s10, %s470_s2  }
  0xb2   : > { %p15976_p6 = scmp.ne.s32.totalorder %s15959_s28, 0 }
  0xb3   : > { %s14583_s25 = sand.u32 (!%p15976_p6), 1, %s14236_s22   ;;  %p15977_p11 = scmp.ne.s32.totalorder (!%p15976_p6), %s15972_s18, 0 }
  0xb4   : > { %489 = sbr.rel (%p15976_p6) target bundleno = 7619 (0x1dc3), region = 68  ;;  %s14586_s8 = sshll.u32 (!%p15976_p6), %s14583_s25, 3 }
  0xb5   : > { %s492_s13 = scalar_lea.sflag (!%p15976_p6), [#allocation3], %s14583_s25  ;;  %s495_s5 = scalar_lea.vmem (!%p15976_p6), [#allocation2], %s14586_s8 }
  0xb9   : > { %14199 = dma.done.wait (%p15977_p11), %s492_s13, 128  }
  0xba   : > { %14201 = vsyncadd (%p15977_p11), %s492_s13, 4294967168  ;;  %s500_s4 = sand.u32 1, %s14358_s27   ;;  %s504_s20 = scalar_lea.vmem [#allocation5], %s14586_s8 }
  0xbb   : > { %s501_s28 = scalar_lea.sflag [#allocation6], %s500_s4 }
  0xbc   : > { %14203 = dma.done.wait (%p15977_p11), %s501_s28, 128  }
  0xbd   : > { %14205 = vsyncadd (%p15977_p11), %s501_s28, 4294967168  ;;  %p15978_p3 = scmp.eq.s32.totalorder %s14358_s27, 0 }
  0xbf   : > { %14207 = dma.done.wait (%p15978_p3), [#allocation6], 512   ;;  %p15979_p7 = pmov %p15978_p3 }
  0xc0   : > { %p15980_p8 = pmov %p15978_p3 }
  0xc1   : > { %14209 = vsyncadd (%p15979_p7), [#allocation6], 4294966784 }
  0xc2   : > { %14211 = dma.done.wait (%p15980_p8), [#allocation9], 1024   ;;  %p15981_p10 = pmov %p15978_p3 }
  0xc3   : > { %p15982_p0 = pmov %p15978_p3 }
  0xc4   : > { %14213 = vsyncadd (%p15981_p10), [#allocation9], 4294966272 }
  0xc5   : > { %14215 = dma.done.wait (%p15982_p0), [#allocation12], 1024   ;;  %p15983_p2 = pmov %p15982_p0 }
  0xc6   : > { %p15984_p5 = pmov %p15982_p0 }
  0xc7   : > { %14217 = vsyncadd (%p15983_p2), [#allocation12], 4294966272 }
  0xc8   : > { %14219 = dma.done.wait (%p15984_p5), [#allocation15], 1024   ;;  %p15985_p9 = pmov %p15982_p0 }
  0xc9   : > { %p15986_p12 = pmov %p15982_p0 }
  0xca   : > { %14221 = vsyncadd (%p15985_p9), [#allocation15], 4294966272 }
  0xcb   : > { %14223 = dma.done.wait (%p15986_p12), [#allocation18], 512   ;;  %p15987_p13 = pmov %p15982_p0 }
  0xcc   : > { %v14258_v0 = vmov 0.0   ;;  %vm14259_vm0 = vmmov 0   ;;  %vm602_vm1 = vcmask 261120   ;;  %v589_v1 = vld [vmem:[#allocation7 + $0x18] sm:$0xff]  ;;  %v588_v2 = vld [vmem:[#allocation7 + $0x10] sm:$0xff]  ;;  %v587_v3 = vld [vmem:[#allocation7 + $0x8] sm:$0xff]  ;;  %v598_v60 = vlaneseq }
  0xcd   : > { %14225 = vsyncadd (%p15987_p13), [#allocation18], 4294966784  ;;  %12689 = vmatprep.subr.mxu0 %v14258_v0  ;;  %12700 = vmatprep.subr.mxu1 %v14258_v0  ;;  %v14626_v4 = vand.u32 4294901760, %v589_v1  ;;  %v14628_v5 = vand.u32 4294901760, %v588_v2  ;;  %v14630_v6 = vand.u32 4294901760, %v587_v3  ;;  %v586_v7 = vld [vmem:[#allocation7] sm:$0xff] }
  0xce   : > { %12697 = vmatprep.mubr.msk.f32.mxu0 %vm14259_vm0, %v14258_v0  ;;  %12708 = vmatprep.mubr.msk.f32.mxu1 %vm14259_vm0, %v14258_v0  ;;  %v582_v8 = vld [vmem:[%s495_s5] sm:$0xff]  ;;  %v14634_v9 = vand.u32 4294901760, %v586_v7  ;;  %v593_v32 = vld [vmem:[#allocation8 + $0x18] sm:$0xff]  ;;  %v592_v34 = vld [vmem:[#allocation8 + $0x10] sm:$0xff]  ;;  %v14807_v63 = vshrl.u32 %v598_v60, 7  ;;  %vm1590_vm2 = vcmask 64512  }
  0xcf   : > { %v604_v10 = vsel %vm602_vm1, %v582_v8, 0  ;;  %12690 = vmatpush3.msra.mxu0 %v14626_v4  ;;  %v711_v11 = vsub.f32 %v589_v1, %v14626_v4  ;;  %v718_v13 = vsub.f32 %v588_v2, %v14628_v5  ;;  %v14643_v14 = vsub.f32 %v587_v3, %v14630_v6  ;;  %v591_v35 = vld [vmem:[#allocation8 + $0x8] sm:$0xff]  ;;  %v590_v38 = vld [vmem:[#allocation8] sm:$0xff]  ;;  %s14260_s2 = smov 32   ;;  %s14261_s6 = smov 96  }
  0xd0   : > { %v14639_v12 = vand.u32 4294901760, %v604_v10  ;;  %12691 = vmatprep.subr.mxu0 %v14258_v0  ;;  %v14647_v15 = vsub.f32 %v586_v7, %v14634_v9  ;;  %v14683_v33 = vand.u32 4294901760, %v593_v32  ;;  %v14691_v36 = vand.u32 4294901760, %v592_v34  ;;  %s14262_s19 = smov 120   ;;  %s14263_s17 = smov 88  }
  0xd1   : > { %12692 = vmatpush3.msra.mxu0 %v14628_v5  ;;  %v712_v16 = vand.u32 4294901760, %v711_v11  ;;  %v719_v18 = vand.u32 4294901760, %v718_v13  ;;  %v726_v19 = vand.u32 4294901760, %v14643_v14  ;;  %v14699_v39 = vand.u32 4294901760, %v591_v35  ;;  %s14264_s14 = smov 112   ;;  %s14265_s3 = smov 104  }
  0xd2   : > { %v14651_v17 = vsub.f32 %v604_v10, %v14639_v12  ;;  %12693 = vmatprep.subr.mxu0 %v14258_v0  ;;  %v733_v20 = vand.u32 4294901760, %v14647_v15  ;;  %v14696_v37 = vsub.f32 %v593_v32, %v14683_v33  ;;  %v14707_v40 = vsub.f32 %v592_v34, %v14691_v36  ;;  %s14266_s7 = smov 80   ;;  %s14267_s15 = smov 72  }
  0xd3   : > { %12694 = vmatpush3.msra.mxu0 %v14630_v6  ;;  %v713_v21 = vsub.f32 %v711_v11, %v712_v16  ;;  %v720_v23 = vsub.f32 %v718_v13, %v719_v18  ;;  %v727_v24 = vsub.f32 %v14643_v14, %v726_v19  ;;  %v14709_v41 = vand.u32 4294901760, %v590_v38  ;;  %s14268_s30 = smov 16   ;;  %s14269_s13 = smov 8  }
  0xd4   : > { %v14658_v22 = vand.u32 4294901760, %v14651_v17  ;;  %12695 = vmatprep.subr.mxu0 %v14258_v0  ;;  %v734_v28 = vsub.f32 %v14647_v15, %v733_v20  ;;  %v1197_v42 = vand.u32 4294901760, %v14696_v37  ;;  %v14716_v43 = vsub.f32 %v591_v35, %v14699_v39  ;;  %s14270_s4 = smov 24   ;;  %s12043_s28 = scalar_lea.sflag [#allocation4], %s14583_s25 }
  0xd5   : > { %12696 = vmatpush3.msra.mxu0 %v14634_v9  ;;  %v714_v25 = vand.u32 4294901760, %v713_v21  ;;  %v721_v27 = vand.u32 4294901760, %v720_v23  ;;  %v728_v30 = vand.u32 4294901760, %v727_v24  ;;  %v14725_v44 = vsub.f32 %v590_v38, %v14709_v41  ;;  %p15988_p4 = scmp.ne.s32.totalorder %s15973_s29, 0 }
  0xd6   : > { %v678_v26 = vsub.f32 %v14651_v17, %v14658_v22  ;;  %12711 = vmatprep.subr.mxu0 %v14258_v0  ;;  %v735_v31 = vand.u32 4294901760, %v734_v28  ;;  %v1204_v45 = vand.u32 4294901760, %v14707_v40  ;;  %v1198_v46 = vsub.f32 %v14696_v37, %v1197_v42 }
  0xd7   : > { %12701 = vmatpush3.msra.mxu1 %v714_v25  ;;  %v1211_v47 = vand.u32 4294901760, %v14716_v43  ;;  %v1218_v49 = vand.u32 4294901760, %v14725_v44  ;;  %v600_v2 = vsub.s32 0, %v14807_v63  ;;  %vm5275_vm3 = vcmask 130048  }
  0xd8   : > { %v14669_v29 = vand.u32 4294901760, %v678_v26  ;;  %12702 = vmatprep.subr.mxu1 %v14258_v0  ;;  %v1205_v48 = vsub.f32 %v14707_v40, %v1204_v45  ;;  %v1199_v50 = vand.u32 4294901760, %v1198_v46  ;;  %vm5277_vm4 = vcmask 195584  }
  0xd9   : > { %12703 = vmatpush3.msra.mxu1 %v721_v27  ;;  %v1212_v51 = vsub.f32 %v14716_v43, %v1211_v47  ;;  %v1219_v53 = vsub.f32 %v14725_v44, %v1218_v49 }
  0xda   : > { %12698 = vmatmul.mubr.f32.vlgmr.msra.gmra.mxu0 %v14669_v29  ;;  %12704 = vmatprep.subr.mxu1 %v14258_v0  ;;  %v1206_v52 = vand.u32 4294901760, %v1205_v48 }
  0xdb   : > { %12712 = vmatpush3.msra.mxu0 %v711_v11  ;;  %12705 = vmatpush3.msra.mxu1 %v728_v30  ;;  %v1213_v54 = vand.u32 4294901760, %v1212_v51  ;;  %v1220_v55 = vand.u32 4294901760, %v1219_v53 }
  0xdc   : > { %12713 = vmatprep.subr.mxu0 %v14258_v0  ;;  %12706 = vmatprep.subr.mxu1 %v14258_v0 }
  0xdd   : > { %12714 = vmatpush3.msra.mxu0 %v718_v13  ;;  %12707 = vmatpush3.msra.mxu1 %v735_v31  ;;  %v1578_v31 = vsub.s32 1, %v14807_v63 }
  0xde   : > { %12715 = vmatprep.subr.mxu0 %v14258_v0  ;;  %12709 = vmatmul.mubr.f32.vlgmr.msra.gmra.mxu1 %v14639_v12 }
  0xdf   : > { %12716 = vmatpush3.msra.mxu0 %v14643_v14  ;;  %12722 = vmatprep.subr.mxu1 %v14258_v0 }
  0xe0   : > { %12717 = vmatprep.subr.mxu0 %v14258_v0  ;;  %12723 = vmatpush3.msra.mxu1 %v14626_v4 }
  0xe1   : > { %12718 = vmatpush3.msra.mxu0 %v14647_v15  ;;  %12719 = vmatprep.mubr.msk.f32.mxu0 %vm14259_vm0, %v14258_v0 }
  0xe2   : > { %12724 = vmatprep.subr.mxu1 %v14258_v0  ;;  %12733 = vmatprep.subr.mxu0 %v14258_v0 }
  0xe3   : > { %12720 = vmatmul.mubr.f32.vlgmr.msra.gmra.mxu0 %v14651_v17  ;;  %12725 = vmatpush3.msra.mxu1 %v14628_v5 }
  0xe4   : > { %12734 = vmatpush3.msra.mxu0 %v712_v16  ;;  %12726 = vmatprep.subr.mxu1 %v14258_v0 }
  0xe5   : > { %12735 = vmatprep.subr.mxu0 %v14258_v0  ;;  %12727 = vmatpush3.msra.mxu1 %v14630_v6 }
  0xe6   : > { %12736 = vmatpush3.msra.mxu0 %v719_v18  ;;  %12728 = vmatprep.subr.mxu1 %v14258_v0 }
  0xe7   : > { %12737 = vmatprep.subr.mxu0 %v14258_v0  ;;  %12729 = vmatpush3.msra.mxu1 %v14634_v9 }
  0xe8   : > { %12730 = vmatprep.mubr.msk.f32.mxu1 %vm14259_vm0, %v14258_v0  ;;  %12738 = vmatpush3.msra.mxu0 %v726_v19 }
  0xe9   : > { %12731 = vmatmul.mubr.f32.vlgmr.msra.gmra.mxu1 %v14658_v22  ;;  %12739 = vmatprep.subr.mxu0 %v14258_v0 }
  0xea   : > { %12744 = vmatprep.subr.mxu1 %v14258_v0  ;;  %12740 = vmatpush3.msra.mxu0 %v733_v20 }
  0xeb   : > { %12741 = vmatprep.mubr.msk.f32.mxu0 %vm14259_vm0, %v14258_v0  ;;  %12745 = vmatpush3.msra.mxu1 %v14626_v4  ;;  %v14813_v4 = vld [vmem:[%s15945_s11] sm:$0xff] }
  0xec   : > { %12742 = vmatmul.mubr.f32.vlgmr.msra.gmra.mxu0 %v14639_v12  ;;  %12746 = vmatprep.subr.mxu1 %v14258_v0  ;;  %v601_v7 = vrot.slane %v14813_v4, %v600_v2  ;;  %v1579_v34 = vrot.slane %v14813_v4, %v1578_v31 }
  0xed   : > { %12755 = vmatprep.subr.mxu0 %v14258_v0  ;;  %12747 = vmatpush3.msra.mxu1 %v14628_v5 }
  0xee   : > { %12756 = vmatpush3.msra.mxu0 %v14683_v33  ;;  %12748 = vmatprep.subr.mxu1 %v14258_v0 }
  0xef   : > { %12757 = vmatprep.subr.mxu0 %v14258_v0  ;;  %12749 = vmatpush3.msra.mxu1 %v14630_v6 }
  0xf0   : > { %12758 = vmatpush3.msra.mxu0 %v14691_v36  ;;  %12750 = vmatprep.subr.mxu1 %v14258_v0 }
  0xf1   : > { %12759 = vmatprep.subr.mxu0 %v14258_v0  ;;  %12751 = vmatpush3.msra.mxu1 %v14634_v9 }
  0xf2   : > { %12752 = vmatprep.mubr.msk.f32.mxu1 %vm14259_vm0, %v14258_v0  ;;  %12760 = vmatpush3.msra.mxu0 %v14699_v39 }
  0xf3   : > { %12753 = vmatmul.mubr.f32.vlgmr.msra.gmra.mxu1 %v14639_v12  ;;  %12761 = vmatprep.subr.mxu0 %v14258_v0 }
  0xf4   : > { %12766 = vmatprep.subr.mxu1 %v14258_v0  ;;  %12762 = vmatpush3.msra.mxu0 %v14709_v41 }
  0xf5   : > { %12767 = vmatpush3.msra.mxu1 %v1199_v50  ;;  %12763 = vmatprep.mubr.msk.f32.mxu0 %vm14259_vm0, %v14258_v0 }
  0xf6   : > { %12768 = vmatprep.subr.mxu1 %v14258_v0  ;;  %12777 = vmatprep.subr.mxu0 %v14258_v0 }
  0xf7   : > { %12764 = vmatmul.mubr.f32.vlgmr.msra.gmra.mxu0 %v14669_v29  ;;  %12769 = vmatpush3.msra.mxu1 %v1206_v52 }
  0xf8   : > { %12778 = vmatpush3.msra.mxu0 %v14696_v37  ;;  %12770 = vmatprep.subr.mxu1 %v14258_v0 }
  0xf9   : > { %12779 = vmatprep.subr.mxu0 %v14258_v0  ;;  %12771 = vmatpush3.msra.mxu1 %v1213_v54 }
  0xfa   : > { %12780 = vmatpush3.msra.mxu0 %v14707_v40  ;;  %12772 = vmatprep.subr.mxu1 %v14258_v0 }
  0xfb   : > { %12781 = vmatprep.subr.mxu0 %v14258_v0  ;;  %12773 = vmatpush3.msra.mxu1 %v1220_v55 }
  0xfc   : > { %12774 = vmatprep.mubr.msk.f32.mxu1 %vm14259_vm0, %v14258_v0  ;;  %12782 = vmatpush3.msra.mxu0 %v14716_v43 }
  0xfd   : > { %12775 = vmatmul.mubr.f32.vlgmr.msra.gmra.mxu1 %v14639_v12  ;;  %12783 = vmatprep.subr.mxu0 %v14258_v0 }
  0xfe   : > { %12788 = vmatprep.subr.mxu1 %v14258_v0  ;;  %12784 = vmatpush3.msra.mxu0 %v14725_v44 }
  0xff   : > { %12785 = vmatprep.mubr.msk.f32.mxu0 %vm14259_vm0, %v14258_v0  ;;  %12789 = vmatpush3.msra.mxu1 %v14683_v33 }
 0x100   : > { %12786 = vmatmul.mubr.f32.vlgmr.msra.gmra.mxu0 %v14651_v17  ;;  %12790 = vmatprep.subr.mxu1 %v14258_v0 }
 0x101   : > { %12799 = vmatprep.subr.mxu0 %v14258_v0  ;;  %12791 = vmatpush3.msra.mxu1 %v14691_v36 }
 0x102   : > { %12800 = vmatpush3.msra.mxu0 %v1197_v42  ;;  %12792 = vmatprep.subr.mxu1 %v14258_v0 }
 0x103   : > { %12801 = vmatprep.subr.mxu0 %v14258_v0  ;;  %12793 = vmatpush3.msra.mxu1 %v14699_v39 }
 0x104   : > { %12802 = vmatpush3.msra.mxu0 %v1204_v45  ;;  %12794 = vmatprep.subr.mxu1 %v14258_v0 }
 0x105   : > { %12803 = vmatprep.subr.mxu0 %v14258_v0  ;;  %12795 = vmatpush3.msra.mxu1 %v14709_v41 }
 0x106   : > { %12796 = vmatprep.mubr.msk.f32.mxu1 %vm14259_vm0, %v14258_v0  ;;  %12804 = vmatpush3.msra.mxu0 %v1211_v47 }
 0x107   : > { %12797 = vmatmul.mubr.f32.vlgmr.msra.gmra.mxu1 %v14658_v22  ;;  %12805 = vmatprep.subr.mxu0 %v14258_v0 }
 0x108   : > { %12810 = vmatprep.subr.mxu1 %v14258_v0  ;;  %12806 = vmatpush3.msra.mxu0 %v1218_v49 }
 0x109   : > { %12807 = vmatprep.mubr.msk.f32.mxu0 %vm14259_vm0, %v14258_v0  ;;  %12811 = vmatpush3.msra.mxu1 %v14683_v33 }
 0x10a   : > { %12808 = vmatmul.mubr.f32.vlgmr.msra.gmra.mxu0 %v14639_v12  ;;  %12812 = vmatprep.subr.mxu1 %v14258_v0 }
 0x10b   : > { %12818 = vmatprep.mubr.msk.f32.mxu1 %vm14259_vm0, %v14258_v0  ;;  %12813 = vmatpush3.msra.mxu1 %v14691_v36 }
 0x10c   : > { %12821 = vmatprep.subr.mxu0 %v14258_v0  ;;  %12814 = vmatprep.subr.mxu1 %v14258_v0 }
 0x10d   : > { %12823 = vmatprep.mubr.msk.f32.mxu0 %vm14259_vm0, %v14258_v0  ;;  %12815 = vmatpush3.msra.mxu1 %v14699_v39 }
 0x10e   : > { %12816 = vmatprep.subr.mxu1 %v14258_v0 }
 0x10f   : > { %12817 = vmatpush3.msra.mxu1 %v14709_v41 }
 0x110   : > { %12819 = vmatmul.mubr.f32.vlgmr.msra.gmra.mxu1 %v14639_v12  ;;  %12826 = vmatprep.subr.mxu1 %v14258_v0 }
 0x111   : > { %12828 = vmatprep.mubr.msk.f32.mxu1 %vm14259_vm0, %v14258_v0 }
 0x19a   : > { %v681_v56 = vpop.f32.mrf.mxu0 }
 0x19b   : > { %v682_v8 = vadd.f32 %v681_v56, %v601_v7  ;;  %v1583_v7 = vsub.s32 2, %v14807_v63 }
 0x19c   : > { %v12699_v57 = vpop.f32.mrf.mxu0 }
 0x19e   : > { %v772_v58 = vpop.f32.mrf.mxu1 }
 0x19f   : > { %v773_v11 = vadd.f32 %v772_v58, %v682_v8  ;;  %v1584_v8 = vrot.slane %v14813_v4, %v1583_v7 }
 0x1a0   : > { %v12710_v59 = vpop.f32.mrf.mxu1 }
 0x1a3   : > { %v852_v61 = vpop.f32.mrf.mxu0 }
 0x1a4   : > { %v853_v14 = vadd.f32 %v852_v61, %v773_v11 }
 0x1a5   : > { %v12721_v62 = vpop.f32.mrf.mxu0 }
 0x1a9   : > { %v929_v1 = vpop.f32.mrf.mxu1 }
 0x1aa   : > { %v930_v15 = vadd.f32 %v929_v1, %v853_v14 }
 0x1ab   : > { %v12732_v3 = vpop.f32.mrf.mxu1 }
 0x1ac   : > { %v1012_v5 = vpop.f32.mrf.mxu0 }
 0x1ad   : > { %v1013_v19 = vadd.f32 %v1012_v5, %v930_v15 }
 0x1ae   : > { %v12743_v6 = vpop.f32.mrf.mxu0 }
 0x1b3   : > { %v1087_v9 = vpop.f32.mrf.mxu1 }
 0x1b4   : > { %v14818_v21 = vadd.f32 %v1087_v9, %v1013_v19 }
 0x1b5   : > { %v12754_v10 = vpop.f32.mrf.mxu1 }
 0x1b6   : > { %v1592_v23 = vsel %vm1590_vm2, %v14818_v21, 0 }
 0x1b7   : > { %v1166_v12 = vpop.f32.mrf.mxu0  ;;  %v1663_v26 = vand.u32 4294901760, %v1592_v23 }
 0x1b9   : > { %v12765_v13 = vpop.f32.mrf.mxu0  ;;  %v1664_v32 = vsub.f32 %v1592_v23, %v1663_v26 }
 0x1bb   : > { %v1665_v37 = vand.u32 4294901760, %v1664_v32 }
 0x1bd   : > { %v1257_v16 = vpop.f32.mrf.mxu1  ;;  %v1666_v41 = vsub.f32 %v1664_v32, %v1665_v37 }
 0x1be   : > { %v1258_v22 = vadd.f32 %v1257_v16, %v1166_v12 }
 0x1bf   : > { %v12776_v17 = vpop.f32.mrf.mxu1  ;;  %v1667_v44 = vand.u32 4294901760, %v1666_v41 }
 0x1c0   : > { %v1337_v18 = vpop.f32.mrf.mxu0 }
 0x1c1   : > { %v1338_v27 = vadd.f32 %v1337_v18, %v1258_v22 }
 0x1c2   : > { %v12787_v20 = vpop.f32.mrf.mxu0 }
 0x1c7   : > { %v1414_v24 = vpop.f32.mrf.mxu1 }
 0x1c8   : > { %v1415_v29 = vadd.f32 %v1414_v24, %v1338_v27 }
 0x1c9   : > { %v12798_v25 = vpop.f32.mrf.mxu1 }
 0x1ca   : > { %v1497_v28 = vpop.f32.mrf.mxu0 }
 0x1cb   : > { %v1498_v33 = vadd.f32 %v1497_v28, %v1415_v29 }
 0x1cc   : > { %v12809_v30 = vpop.f32.mrf.mxu0 }
 0x1d0   : > { %v1572_v35 = vpop.f32.mrf.mxu1 }
 0x1d1   : > { %v1573_v36 = vadd.f32 %v1572_v35, %v1498_v33 }
 0x1d2   : > { %v12820_v38 = vpop.f32.mrf.mxu1 }
 0x1d3   : > { %v14826_v39 = vadd.f32 %v1579_v34, %v1573_v36 }
 0x1d5   : > { %v1595_v40 = vsel %vm1590_vm2, %v14826_v39, 0 }
 0x1d6   : > { %v1628_v42 = vand.u32 4294901760, %v1595_v40 }
 0x1d8   : > { %12822 = vmatpush3.xpose.msra.mxu0 %v1628_v42  ;;  %v1705_v43 = vsub.f32 %v1595_v40, %v1628_v42 }
 0x1d9   : > { %12831 = vmatprep.subr.mxu0 %v14258_v0 }
 0x1da   : > { %v1706_v45 = vand.u32 4294901760, %v1705_v43 }
 0x1db   : > { %12824 = vmatmul.mubr.f32.vlgmr.msra.gmra.mxu0 %v1667_v44 }
 0x1dc   : > { %12832 = vmatpush3.xpose.msra.mxu0 %v1705_v43  ;;  %12833 = vmatprep.mubr.msk.f32.mxu0 %vm14259_vm0, %v14258_v0  ;;  %v1707_v46 = vsub.f32 %v1705_v43, %v1706_v45 }
 0x1dd   : > { %12841 = vmatprep.subr.mxu0 %v14258_v0 }
 0x1de   : > { %v1708_v47 = vand.u32 4294901760, %v1707_v46 }
 0x1df   : > { %12834 = vmatmul.mubr.f32.vlgmr.msra.gmra.mxu0 %v1664_v32 }
 0x1e0   : > { %12827 = vmatpush3.xpose.msra.mxu1 %v1708_v47  ;;  %12842 = vmatpush3.xpose.msra.mxu0 %v1706_v45 }
 0x1e1   : > { %12843 = vmatprep.mubr.msk.f32.mxu0 %vm14259_vm0, %v14258_v0  ;;  %12836 = vmatprep.subr.mxu1 %v14258_v0 }
 0x1e2   : > { %12851 = vmatprep.subr.mxu0 %v14258_v0 }
 0x1e3   : > { %12829 = vmatmul.mubr.f32.vlgmr.msra.gmra.mxu1 %v1663_v26  ;;  %12844 = vmatmul.mubr.f32.vlgmr.msra.gmra.mxu0 %v1663_v26 }
 0x1e4   : > { %12837 = vmatpush3.xpose.msra.mxu1 %v1628_v42  ;;  %12838 = vmatprep.mubr.msk.f32.mxu1 %vm14259_vm0, %v14258_v0 }
 0x1e5   : > { %12846 = vmatprep.subr.mxu1 %v14258_v0  ;;  %12853 = vmatprep.mubr.msk.f32.mxu0 %vm14259_vm0, %v14258_v0 }
 0x1e7   : > { %12839 = vmatmul.mubr.f32.vlgmr.msra.gmra.mxu1 %v1665_v37 }
 0x1e8   : > { %12847 = vmatpush3.xpose.msra.mxu1 %v1628_v42  ;;  %12848 = vmatprep.mubr.msk.f32.mxu1 %vm14259_vm0, %v14258_v0 }
 0x1e9   : > { %12856 = vmatprep.subr.mxu1 %v14258_v0 }
 0x1eb   : > { %12849 = vmatmul.mubr.f32.vlgmr.msra.gmra.mxu1 %v1663_v26 }
 0x1ec   : > { %12858 = vmatprep.mubr.msk.f32.mxu1 %vm14259_vm0, %v14258_v0 }
 0x29b   : > { %v1669_v48 = vpop.f32.mrf.mxu0 }
 0x29d   : > { %v12825_v49 = vpop.f32.mrf.mxu0 }
 0x29f   : > { %v1819_v50 = vpop.f32.mrf.mxu0 }
 0x2a1   : > { %v12835_v51 = vpop.f32.mrf.mxu0 }
 0x2a3   : > { %v1745_v52 = vpop.f32.mrf.mxu1  ;;  %v1967_v53 = vpop.f32.mrf.mxu0 }
 0x2a4   : > { %v1746_v54 = vadd.f32 %v1745_v52, %v1669_v48 }
 0x2a5   : > { %v12830_v55 = vpop.f32.mrf.mxu1  ;;  %v12845_v56 = vpop.f32.mrf.mxu0 }
 0x2a6   : > { %v1820_v57 = vadd.f32 %v1819_v50, %v1746_v54 }
 0x2a7   : > { %v1893_v58 = vpop.f32.mrf.mxu1 }
 0x2a8   : > { %v1894_v59 = vadd.f32 %v1893_v58, %v1820_v57 }
 0x2a9   : > { %v12840_v60 = vpop.f32.mrf.mxu1 }
 0x2aa   : > { %v1968_v61 = vadd.f32 %v1967_v53, %v1894_v59 }
 0x2ab   : > { %v2039_v62 = vpop.f32.mrf.mxu1 }
 0x2ac   : > { %v2040_v1 = vadd.f32 %v2039_v62, %v1968_v61 }
 0x2ad   : > { %v12850_v3 = vpop.f32.mrf.mxu1 }
 0x2ae   : > { %v2043_v5 = vmul.f32 0.35355338, %v2040_v1 }
 0x2b0   : > { %v2044_v6 = vsel %vm1590_vm2, %v2043_v5, -inf }
 0x2b1   : > { %2045 = vmax.xlane.f32.xlu0 %v2044_v6 }
 0x2c7   : > { %1586 = vrot.lane.b32.xlu0 %v1584_v8, %s14260_s2 }
 0x33a   : > { %v2046_v9 = vpop.xlane.xlu0 %2045 }
 0x33b   : > { %v2047_v12 = vsub.f32 %v2043_v5, %v2046_v9 }
 0x33d   : > { %v2048_v13 = vmul.f32 1.442695, %v2047_v12 }
 0x33e   : > { %v1587_v10 = vpop.permute.xlu0 %1586 }
 0x33f   : > { %v14854_v11 = vadd.f32 %v1587_v10, %v1573_v36  ;;  %13844 = vpow2.f32 %v2048_v13 }
 0x341   : > { %2056 = vrot.lane.b32.xlu1 %v14854_v11, %s14261_s6 }
 0x34c   : > { %v13845_v14 = vpop.eup %13844 }
 0x34d   : > { %v2050_v15 = vsel %vm1590_vm2, %v13845_v14, 0.0 }
 0x365   : > { %2051 = vadd.xlane.f32.xlu1 %v2050_v15 }
 0x376   : > { %2510 = vrot.lane.b32.xlu1 %v14826_v39, %s14262_s19 }
 0x37a   : > { %2508 = vrot.lane.b32.xlu1 %v14818_v21, %s14262_s19 }
 0x3b3   : > { %v2057_v4 = vpop.permute.xlu1 %2056 }
 0x3b4   : > { %v2093_v16 = vand.u32 4294901760, %v2057_v4 }
 0x3b6   : > { %v2170_v17 = vsub.f32 %v2057_v4, %v2093_v16  ;;  %12852 = vmatpush3.msra.mxu0 %v2093_v16 }
 0x3b7   : > { %12861 = vmatprep.subr.mxu0 %v14258_v0 }
 0x3b8   : > { %v2171_v18 = vand.u32 4294901760, %v2170_v17 }
 0x3ba   : > { %v2172_v19 = vsub.f32 %v2170_v17, %v2171_v18 }
 0x3bc   : > { %v2173_v20 = vand.u32 4294901760, %v2172_v19 }
 0x3be   : > { %12857 = vmatpush3.msra.mxu1 %v2173_v20 }
 0x3bf   : > { %12866 = vmatprep.subr.mxu1 %v14258_v0 }
 0x3ee   : > { %v2052_v22 = vpop.xlane.xlu1 %2051 }
 0x3ef   : > { %13846 = vrcp.f32 %v2052_v22 }
 0x3f2   : > { %v2511_v23 = vpop.permute.xlu1 %2510 }
 0x3f3   : > { %v2514_v24 = vsel %vm1590_vm2, %v2511_v23, 0 }
 0x3f4   : > { %v2547_v25 = vand.u32 4294901760, %v2514_v24 }
 0x3f6   : > { %v2624_v27 = vsub.f32 %v2514_v24, %v2547_v25  ;;  %v2509_v29 = vpop.permute.xlu1 %2508 }
 0x3f7   : > { %v2512_v34 = vsel %vm1590_vm2, %v2509_v29, 0 }
 0x3f8   : > { %v2625_v33 = vand.u32 4294901760, %v2624_v27  ;;  %v2582_v36 = vand.u32 4294901760, %v2512_v34 }
 0x3fa   : > { %v2626_v38 = vsub.f32 %v2624_v27, %v2625_v33  ;;  %v2583_v41 = vsub.f32 %v2512_v34, %v2582_v36 }
 0x3fc   : > { %v13847_v26 = vpop.eup %13846  ;;  %v2627_v43 = vand.u32 4294901760, %v2626_v38  ;;  %v2584_v44 = vand.u32 4294901760, %v2583_v41 }
 0x3fd   : > { %v2054_v28 = vmul.f32 %v13847_v26, %v13845_v14 }
 0x3fe   : > { %v2585_v45 = vsub.f32 %v2583_v41, %v2584_v44 }
 0x3ff   : > { %v2060_v30 = vsel %vm1590_vm2, %v2054_v28, 0 }
 0x400   : > { %v2128_v32 = vand.u32 4294901760, %v2060_v30  ;;  %v2586_v46 = vand.u32 4294901760, %v2585_v45 }
 0x402   : > { %v2129_v35 = vsub.f32 %v2060_v30, %v2128_v32  ;;  %12859 = vmatmul.mubr.f32.vlgmr.msra.gmra.mxu1 %v2128_v32 }
 0x403   : > { %12867 = vmatpush3.msra.mxu1 %v2093_v16  ;;  %12868 = vmatprep.mubr.msk.f32.mxu1 %vm14259_vm0, %v14258_v0 }
 0x404   : > { %12876 = vmatprep.subr.mxu1 %v14258_v0  ;;  %v2130_v37 = vand.u32 4294901760, %v2129_v35 }
 0x406   : > { %12869 = vmatmul.mubr.f32.vlgmr.msra.gmra.mxu1 %v2130_v37  ;;  %v2131_v40 = vsub.f32 %v2129_v35, %v2130_v37 }
 0x407   : > { %12877 = vmatpush3.msra.mxu1 %v2093_v16  ;;  %12878 = vmatprep.mubr.msk.f32.mxu1 %vm14259_vm0, %v14258_v0 }
 0x408   : > { %12886 = vmatprep.subr.mxu1 %v14258_v0  ;;  %v2132_v42 = vand.u32 4294901760, %v2131_v40 }
 0x40a   : > { %12854 = vmatmul.mubr.f32.vlgmr.msra.gmra.mxu0 %v2132_v42  ;;  %12879 = vmatmul.mubr.f32.vlgmr.msra.gmra.mxu1 %v2128_v32 }
 0x40b   : > { %12862 = vmatpush3.msra.mxu0 %v2170_v17  ;;  %12887 = vmatpush3.xpose.msra.mxu1 %v2627_v43 }
 0x40c   : > { %12863 = vmatprep.mubr.msk.f32.mxu0 %vm14259_vm0, %v14258_v0  ;;  %12871 = vmatprep.subr.mxu0 %v14258_v0 }
 0x40d   : > { %12888 = vmatprep.mubr.msk.f32.mxu1 %vm14259_vm0, %v14258_v0  ;;  %12896 = vmatprep.subr.mxu1 %v14258_v0 }
 0x40e   : > { %12864 = vmatmul.mubr.f32.vlgmr.msra.gmra.mxu0 %v2129_v35  ;;  %12889 = vmatmul.mubr.f32.vlgmr.msra.gmra.mxu1 %v2582_v36 }
 0x40f   : > { %12872 = vmatpush3.msra.mxu0 %v2171_v18  ;;  %12897 = vmatpush3.xpose.msra.mxu1 %v2547_v25 }
 0x410   : > { %12873 = vmatprep.mubr.msk.f32.mxu0 %vm14259_vm0, %v14258_v0  ;;  %12881 = vmatprep.subr.mxu0 %v14258_v0 }
 0x411   : > { %12898 = vmatprep.mubr.msk.f32.mxu1 %vm14259_vm0, %v14258_v0  ;;  %12906 = vmatprep.subr.mxu1 %v14258_v0 }
 0x412   : > { %12874 = vmatmul.mubr.f32.vlgmr.msra.gmra.mxu0 %v2128_v32  ;;  %12899 = vmatmul.mubr.f32.vlgmr.msra.gmra.mxu1 %v2584_v44 }
 0x413   : > { %12882 = vmatpush3.xpose.msra.mxu0 %v2547_v25  ;;  %12907 = vmatpush3.xpose.msra.mxu1 %v2547_v25 }
 0x414   : > { %12883 = vmatprep.mubr.msk.f32.mxu0 %vm14259_vm0, %v14258_v0  ;;  %12891 = vmatprep.subr.mxu0 %v14258_v0 }
 0x415   : > { %12908 = vmatprep.mubr.msk.f32.mxu1 %vm14259_vm0, %v14258_v0  ;;  %12916 = vmatprep.subr.mxu1 %v14258_v0 }
 0x416   : > { %12884 = vmatmul.mubr.f32.vlgmr.msra.gmra.mxu0 %v2586_v46  ;;  %12909 = vmatmul.mubr.f32.vlgmr.msra.gmra.mxu1 %v2582_v36 }
 0x417   : > { %12892 = vmatpush3.xpose.msra.mxu0 %v2624_v27  ;;  %12893 = vmatprep.mubr.msk.f32.mxu0 %vm14259_vm0, %v14258_v0 }
 0x418   : > { %12901 = vmatprep.subr.mxu0 %v14258_v0  ;;  %12918 = vmatprep.mubr.msk.f32.mxu1 %vm14259_vm0, %v14258_v0 }
 0x41a   : > { %12894 = vmatmul.mubr.f32.vlgmr.msra.gmra.mxu0 %v2583_v41 }
 0x41b   : > { %12902 = vmatpush3.xpose.msra.mxu0 %v2625_v33  ;;  %12903 = vmatprep.mubr.msk.f32.mxu0 %vm14259_vm0, %v14258_v0 }
 0x41c   : > { %12911 = vmatprep.subr.mxu0 %v14258_v0 }
 0x41e   : > { %12904 = vmatmul.mubr.f32.vlgmr.msra.gmra.mxu0 %v2582_v36 }
 0x41f   : > { %12913 = vmatprep.mubr.msk.f32.mxu0 %vm14259_vm0, %v14258_v0 }
 0x4c2   : > { %v2210_v47 = vpop.f32.mrf.mxu1 }
 0x4c4   : > { %v12860_v48 = vpop.f32.mrf.mxu1 }
 0x4c6   : > { %v2358_v49 = vpop.f32.mrf.mxu1 }
 0x4c8   : > { %v12870_v50 = vpop.f32.mrf.mxu1 }
 0x4ca   : > { %v2134_v51 = vpop.f32.mrf.mxu0  ;;  %v2504_v52 = vpop.f32.mrf.mxu1 }
 0x4cb   : > { %v2211_v53 = vadd.f32 %v2210_v47, %v2134_v51 }
 0x4cc   : > { %v12855_v54 = vpop.f32.mrf.mxu0  ;;  %v12880_v55 = vpop.f32.mrf.mxu1 }
 0x4ce   : > { %v2284_v56 = vpop.f32.mrf.mxu0  ;;  %v2664_v57 = vpop.f32.mrf.mxu1 }
 0x4cf   : > { %v2285_v58 = vadd.f32 %v2284_v56, %v2211_v53 }
 0x4d0   : > { %v12865_v59 = vpop.f32.mrf.mxu0  ;;  %v12890_v60 = vpop.f32.mrf.mxu1 }
 0x4d1   : > { %v2359_v61 = vadd.f32 %v2358_v49, %v2285_v58 }
 0x4d2   : > { %v2432_v62 = vpop.f32.mrf.mxu0  ;;  %v2812_v1 = vpop.f32.mrf.mxu1 }
 0x4d3   : > { %v2433_v3 = vadd.f32 %v2432_v62, %v2359_v61 }
 0x4d4   : > { %v12875_v5 = vpop.f32.mrf.mxu0  ;;  %v12900_v6 = vpop.f32.mrf.mxu1 }
 0x4d5   : > { %v14902_v8 = vadd.f32 %v2504_v52, %v2433_v3 }
 0x4d6   : > { %v2588_v9 = vpop.f32.mrf.mxu0  ;;  %v2958_v10 = vpop.f32.mrf.mxu1 }
 0x4d7   : > { %v2665_v14 = vadd.f32 %v2664_v57, %v2588_v9 }
 0x4d8   : > { %v12885_v12 = vpop.f32.mrf.mxu0  ;;  %v12910_v13 = vpop.f32.mrf.mxu1 }
 0x4da   : > { %v2738_v15 = vpop.f32.mrf.mxu0 }
 0x4db   : > { %v2739_v4 = vadd.f32 %v2738_v15, %v2665_v14 }
 0x4dc   : > { %v12895_v16 = vpop.f32.mrf.mxu0 }
 0x4dd   : > { %v2813_v17 = vadd.f32 %v2812_v1, %v2739_v4 }
 0x4de   : > { %v2886_v18 = vpop.f32.mrf.mxu0 }
 0x4df   : > { %v2887_v19 = vadd.f32 %v2886_v18, %v2813_v17 }
 0x4e0   : > { %v12905_v20 = vpop.f32.mrf.mxu0 }
 0x4e1   : > { %v2959_v22 = vadd.f32 %v2958_v10, %v2887_v19 }
 0x4e3   : > { %v2962_v23 = vmul.f32 0.35355338, %v2959_v22 }
 0x4e5   : > { %v2963_v24 = vsel %vm1590_vm2, %v2962_v23, -inf }
 0x4e6   : > { %2964 = vmax.xlane.f32.xlu0 %v2963_v24 }
 0x4fc   : > { %2974 = vrot.lane.b32.xlu0 %v14854_v11, %s14263_s17 }
 0x500   : > { %3426 = vrot.lane.b32.xlu0 %v14818_v21, %s14264_s14 }
 0x56f   : > { %v2965_v25 = vpop.xlane.xlu0 %2964 }
 0x570   : > { %v2966_v26 = vsub.f32 %v2962_v23, %v2965_v25 }
 0x572   : > { %v2967_v27 = vmul.f32 1.442695, %v2966_v26 }
 0x573   : > { %v2975_v28 = vpop.permute.xlu0 %2974 }
 0x574   : > { %13848 = vpow2.f32 %v2967_v27  ;;  %v3011_v29 = vand.u32 4294901760, %v2975_v28 }
 0x576   : > { %v3088_v30 = vsub.f32 %v2975_v28, %v3011_v29  ;;  %12912 = vmatpush3.msra.mxu0 %v3011_v29 }
 0x577   : > { %12921 = vmatprep.subr.mxu0 %v14258_v0  ;;  %v3427_v45 = vpop.permute.xlu0 %3426 }
 0x578   : > { %v3089_v32 = vand.u32 4294901760, %v3088_v30  ;;  %v3430_v48 = vsel %vm1590_vm2, %v3427_v45, 0 }
 0x579   : > { %v3500_v51 = vand.u32 4294901760, %v3430_v48 }
 0x57a   : > { %v3090_v33 = vsub.f32 %v3088_v30, %v3089_v32 }
 0x57b   : > { %v3501_v55 = vsub.f32 %v3430_v48, %v3500_v51 }
 0x57c   : > { %v3091_v34 = vand.u32 4294901760, %v3090_v33 }
 0x57d   : > { %v3502_v58 = vand.u32 4294901760, %v3501_v55 }
 0x57e   : > { %12917 = vmatpush3.msra.mxu1 %v3091_v34 }
 0x57f   : > { %12926 = vmatprep.subr.mxu1 %v14258_v0  ;;  %v3503_v59 = vsub.f32 %v3501_v55, %v3502_v58 }
 0x581   : > { %v13849_v35 = vpop.eup %13848  ;;  %v3504_v60 = vand.u32 4294901760, %v3503_v59 }
 0x582   : > { %v2969_v36 = vsel %vm1590_vm2, %v13849_v35, 0.0 }
 0x583   : > { %2970 = vadd.xlane.f32.xlu1 %v2969_v36 }
 0x594   : > { %3428 = vrot.lane.b32.xlu1 %v14826_v39, %s14264_s14 }
 0x60c   : > { %v2971_v37 = vpop.xlane.xlu1 %2970 }
 0x60d   : > { %13850 = vrcp.f32 %v2971_v37 }
 0x610   : > { %v3429_v38 = vpop.permute.xlu1 %3428 }
 0x611   : > { %v3432_v40 = vsel %vm1590_vm2, %v3429_v38, 0 }
 0x612   : > { %v3465_v41 = vand.u32 4294901760, %v3432_v40 }
 0x614   : > { %v3542_v43 = vsub.f32 %v3432_v40, %v3465_v41 }
 0x616   : > { %v3543_v49 = vand.u32 4294901760, %v3542_v43 }
 0x618   : > { %v3544_v53 = vsub.f32 %v3542_v43, %v3543_v49 }
 0x61a   : > { %v13851_v42 = vpop.eup %13850  ;;  %v3545_v57 = vand.u32 4294901760, %v3544_v53 }
 0x61b   : > { %v2973_v44 = vmul.f32 %v13851_v42, %v13849_v35 }
 0x61d   : > { %v2978_v46 = vsel %vm1590_vm2, %v2973_v44, 0 }
 0x61e   : > { %v3046_v47 = vand.u32 4294901760, %v2978_v46 }
 0x620   : > { %v3047_v50 = vsub.f32 %v2978_v46, %v3046_v47  ;;  %12919 = vmatmul.mubr.f32.vlgmr.msra.gmra.mxu1 %v3046_v47 }
 0x621   : > { %12927 = vmatpush3.msra.mxu1 %v3011_v29  ;;  %12928 = vmatprep.mubr.msk.f32.mxu1 %vm14259_vm0, %v14258_v0 }
 0x622   : > { %12936 = vmatprep.subr.mxu1 %v14258_v0  ;;  %v3048_v52 = vand.u32 4294901760, %v3047_v50 }
 0x624   : > { %12929 = vmatmul.mubr.f32.vlgmr.msra.gmra.mxu1 %v3048_v52  ;;  %v3049_v54 = vsub.f32 %v3047_v50, %v3048_v52 }
 0x625   : > { %12937 = vmatpush3.msra.mxu1 %v3011_v29  ;;  %12938 = vmatprep.mubr.msk.f32.mxu1 %vm14259_vm0, %v14258_v0 }
 0x626   : > { %12946 = vmatprep.subr.mxu1 %v14258_v0  ;;  %v3050_v56 = vand.u32 4294901760, %v3049_v54 }
 0x628   : > { %12914 = vmatmul.mubr.f32.vlgmr.msra.gmra.mxu0 %v3050_v56  ;;  %12939 = vmatmul.mubr.f32.vlgmr.msra.gmra.mxu1 %v3046_v47 }
 0x629   : > { %12922 = vmatpush3.msra.mxu0 %v3088_v30  ;;  %12947 = vmatpush3.xpose.msra.mxu1 %v3545_v57 }
 0x62a   : > { %12923 = vmatprep.mubr.msk.f32.mxu0 %vm14259_vm0, %v14258_v0  ;;  %12931 = vmatprep.subr.mxu0 %v14258_v0 }
 0x62b   : > { %12948 = vmatprep.mubr.msk.f32.mxu1 %vm14259_vm0, %v14258_v0  ;;  %12956 = vmatprep.subr.mxu1 %v14258_v0 }
 0x62c   : > { %12924 = vmatmul.mubr.f32.vlgmr.msra.gmra.mxu0 %v3047_v50  ;;  %12949 = vmatmul.mubr.f32.vlgmr.msra.gmra.mxu1 %v3500_v51 }
 0x62d   : > { %12932 = vmatpush3.msra.mxu0 %v3089_v32  ;;  %12957 = vmatpush3.xpose.msra.mxu1 %v3465_v41 }
 0x62e   : > { %12933 = vmatprep.mubr.msk.f32.mxu0 %vm14259_vm0, %v14258_v0  ;;  %12941 = vmatprep.subr.mxu0 %v14258_v0 }
 0x62f   : > { %12958 = vmatprep.mubr.msk.f32.mxu1 %vm14259_vm0, %v14258_v0  ;;  %12966 = vmatprep.subr.mxu1 %v14258_v0 }
 0x630   : > { %12934 = vmatmul.mubr.f32.vlgmr.msra.gmra.mxu0 %v3046_v47  ;;  %12959 = vmatmul.mubr.f32.vlgmr.msra.gmra.mxu1 %v3502_v58 }
 0x631   : > { %12942 = vmatpush3.xpose.msra.mxu0 %v3465_v41  ;;  %12967 = vmatpush3.xpose.msra.mxu1 %v3465_v41 }
 0x632   : > { %12943 = vmatprep.mubr.msk.f32.mxu0 %vm14259_vm0, %v14258_v0  ;;  %12951 = vmatprep.subr.mxu0 %v14258_v0 }
 0x633   : > { %12968 = vmatprep.mubr.msk.f32.mxu1 %vm14259_vm0, %v14258_v0  ;;  %12976 = vmatprep.subr.mxu1 %v14258_v0 }
 0x634   : > { %12944 = vmatmul.mubr.f32.vlgmr.msra.gmra.mxu0 %v3504_v60  ;;  %12969 = vmatmul.mubr.f32.vlgmr.msra.gmra.mxu1 %v3500_v51 }
 0x635   : > { %12952 = vmatpush3.xpose.msra.mxu0 %v3542_v43  ;;  %12953 = vmatprep.mubr.msk.f32.mxu0 %vm14259_vm0, %v14258_v0 }
 0x636   : > { %12961 = vmatprep.subr.mxu0 %v14258_v0  ;;  %12978 = vmatprep.mubr.msk.f32.mxu1 %vm14259_vm0, %v14258_v0 }
 0x638   : > { %12954 = vmatmul.mubr.f32.vlgmr.msra.gmra.mxu0 %v3501_v55 }
 0x639   : > { %12962 = vmatpush3.xpose.msra.mxu0 %v3543_v49  ;;  %12963 = vmatprep.mubr.msk.f32.mxu0 %vm14259_vm0, %v14258_v0 }
 0x63a   : > { %12971 = vmatprep.subr.mxu0 %v14258_v0 }
 0x63c   : > { %12964 = vmatmul.mubr.f32.vlgmr.msra.gmra.mxu0 %v3500_v51 }
 0x63d   : > { %12973 = vmatprep.mubr.msk.f32.mxu0 %vm14259_vm0, %v14258_v0 }
 0x6e0   : > { %v3128_v61 = vpop.f32.mrf.mxu1 }
 0x6e2   : > { %v12920_v62 = vpop.f32.mrf.mxu1 }
 0x6e4   : > { %v3276_v1 = vpop.f32.mrf.mxu1 }
 0x6e6   : > { %v12930_v3 = vpop.f32.mrf.mxu1 }
 0x6e8   : > { %v3052_v5 = vpop.f32.mrf.mxu0  ;;  %v3422_v6 = vpop.f32.mrf.mxu1 }
 0x6e9   : > { %v3129_v9 = vadd.f32 %v3128_v61, %v3052_v5 }
 0x6ea   : > { %v12915_v10 = vpop.f32.mrf.mxu0  ;;  %v12940_v12 = vpop.f32.mrf.mxu1 }
 0x6ec   : > { %v3202_v13 = vpop.f32.mrf.mxu0  ;;  %v3582_v14 = vpop.f32.mrf.mxu1 }
 0x6ed   : > { %v3203_v15 = vadd.f32 %v3202_v13, %v3129_v9 }
 0x6ee   : > { %v12925_v4 = vpop.f32.mrf.mxu0  ;;  %v12950_v16 = vpop.f32.mrf.mxu1 }
 0x6ef   : > { %v3277_v17 = vadd.f32 %v3276_v1, %v3203_v15 }
 0x6f0   : > { %v3350_v18 = vpop.f32.mrf.mxu0  ;;  %v3730_v19 = vpop.f32.mrf.mxu1 }
 0x6f1   : > { %v3351_v20 = vadd.f32 %v3350_v18, %v3277_v17 }
 0x6f2   : > { %v12935_v22 = vpop.f32.mrf.mxu0  ;;  %v12960_v23 = vpop.f32.mrf.mxu1 }
 0x6f3   : > { %v14951_v24 = vadd.f32 %v3422_v6, %v3351_v20 }
 0x6f4   : > { %v3506_v25 = vpop.f32.mrf.mxu0  ;;  %v3876_v26 = vpop.f32.mrf.mxu1 }
 0x6f5   : > { %v3583_v29 = vadd.f32 %v3582_v14, %v3506_v25 }
 0x6f6   : > { %v12945_v27 = vpop.f32.mrf.mxu0  ;;  %v12970_v28 = vpop.f32.mrf.mxu1 }
 0x6f8   : > { %v3656_v30 = vpop.f32.mrf.mxu0 }
 0x6f9   : > { %v3657_v32 = vadd.f32 %v3656_v30, %v3583_v29 }
 0x6fa   : > { %v12955_v33 = vpop.f32.mrf.mxu0 }
 0x6fb   : > { %v3731_v34 = vadd.f32 %v3730_v19, %v3657_v32 }
 0x6fc   : > { %v3804_v35 = vpop.f32.mrf.mxu0 }
 0x6fd   : > { %v3805_v36 = vadd.f32 %v3804_v35, %v3731_v34 }
 0x6fe   : > { %v12965_v37 = vpop.f32.mrf.mxu0 }
 0x6ff   : > { %v3877_v38 = vadd.f32 %v3876_v26, %v3805_v36 }
 0x701   : > { %v3880_v40 = vmul.f32 0.35355338, %v3877_v38 }
 0x703   : > { %v3881_v41 = vsel %vm1590_vm2, %v3880_v40, -inf }
 0x704   : > { %3882 = vmax.xlane.f32.xlu1 %v3881_v41 }
 0x715   : > { %4346 = vrot.lane.b32.xlu1 %v14826_v39, %s14265_s3 }
 0x719   : > { %4344 = vrot.lane.b32.xlu1 %v14818_v21, %s14265_s3 }
 0x78d   : > { %v3883_v42 = vpop.xlane.xlu1 %3882 }
 0x78e   : > { %v3884_v43 = vsub.f32 %v3880_v40, %v3883_v42 }
 0x790   : > { %v3885_v44 = vmul.f32 1.442695, %v3884_v43 }
 0x791   : > { %v4347_v49 = vpop.permute.xlu1 %4346 }
 0x792   : > { %13852 = vpow2.f32 %v3885_v44  ;;  %v4350_v21 = vsel %vm1590_vm2, %v4347_v49, 0 }
 0x793   : > { %v4383_v52 = vand.u32 4294901760, %v4350_v21 }
 0x795   : > { %v4460_v56 = vsub.f32 %v4350_v21, %v4383_v52  ;;  %v4345_v58 = vpop.permute.xlu1 %4344 }
 0x796   : > { %v4348_v62 = vsel %vm1590_vm2, %v4345_v58, 0 }
 0x797   : > { %v4461_v61 = vand.u32 4294901760, %v4460_v56  ;;  %v4418_v3 = vand.u32 4294901760, %v4348_v62 }
 0x799   : > { %v4462_v6 = vsub.f32 %v4460_v56, %v4461_v61  ;;  %v4419_v10 = vsub.f32 %v4348_v62, %v4418_v3 }
 0x79b   : > { %v4463_v13 = vand.u32 4294901760, %v4462_v6  ;;  %v4420_v14 = vand.u32 4294901760, %v4419_v10 }
 0x79d   : > { %v4421_v15 = vsub.f32 %v4419_v10, %v4420_v14 }
 0x79f   : > { %v13853_v45 = vpop.eup %13852  ;;  %v4422_v4 = vand.u32 4294901760, %v4421_v15  ;;  %v597_v15 = vld [vmem:[#allocation10 + $0x18] sm:$0xff] }
 0x7a0   : > { %v3887_v46 = vsel %vm1590_vm2, %v13853_v45, 0.0 }
 0x7a1   : > { %3888 = vadd.xlane.f32.xlu0 %v3887_v46 }
 0x7b7   : > { %3892 = vrot.lane.b32.xlu0 %v14854_v11, %s14266_s7 }
 0x82a   : > { %v3889_v47 = vpop.xlane.xlu0 %3888 }
 0x82b   : > { %13854 = vrcp.f32 %v3889_v47 }
 0x82e   : > { %v3893_v48 = vpop.permute.xlu0 %3892 }
 0x82f   : > { %v3929_v39 = vand.u32 4294901760, %v3893_v48 }
 0x831   : > { %v4006_v50 = vsub.f32 %v3893_v48, %v3929_v39  ;;  %12972 = vmatpush3.msra.mxu0 %v3929_v39 }
 0x832   : > { %12981 = vmatprep.subr.mxu0 %v14258_v0 }
 0x833   : > { %v4007_v51 = vand.u32 4294901760, %v4006_v50 }
 0x835   : > { %v4008_v53 = vsub.f32 %v4006_v50, %v4007_v51 }
 0x837   : > { %v4009_v54 = vand.u32 4294901760, %v4008_v53 }
 0x838   : > { %v13855_v55 = vpop.eup %13854 }
 0x839   : > { %12977 = vmatpush3.msra.mxu1 %v4009_v54  ;;  %v3891_v57 = vmul.f32 %v13855_v55, %v13853_v45 }
 0x83a   : > { %12986 = vmatprep.subr.mxu1 %v14258_v0 }
 0x83b   : > { %v3896_v59 = vsel %vm1590_vm2, %v3891_v57, 0 }
 0x83c   : > { %v3964_v60 = vand.u32 4294901760, %v3896_v59 }
 0x83e   : > { %v3965_v1 = vsub.f32 %v3896_v59, %v3964_v60  ;;  %12979 = vmatmul.mubr.f32.vlgmr.msra.gmra.mxu1 %v3964_v60 }
 0x83f   : > { %12987 = vmatpush3.msra.mxu1 %v3929_v39  ;;  %12988 = vmatprep.mubr.msk.f32.mxu1 %vm14259_vm0, %v14258_v0 }
 0x840   : > { %12996 = vmatprep.subr.mxu1 %v14258_v0  ;;  %v3966_v5 = vand.u32 4294901760, %v3965_v1 }
 0x842   : > { %12989 = vmatmul.mubr.f32.vlgmr.msra.gmra.mxu1 %v3966_v5  ;;  %v3967_v9 = vsub.f32 %v3965_v1, %v3966_v5 }
 0x843   : > { %12997 = vmatpush3.msra.mxu1 %v3929_v39  ;;  %12998 = vmatprep.mubr.msk.f32.mxu1 %vm14259_vm0, %v14258_v0 }
 0x844   : > { %13006 = vmatprep.subr.mxu1 %v14258_v0  ;;  %v3968_v12 = vand.u32 4294901760, %v3967_v9 }
 0x846   : > { %12974 = vmatmul.mubr.f32.vlgmr.msra.gmra.mxu0 %v3968_v12  ;;  %12999 = vmatmul.mubr.f32.vlgmr.msra.gmra.mxu1 %v3964_v60 }
 0x847   : > { %12982 = vmatpush3.msra.mxu0 %v4006_v50  ;;  %13007 = vmatpush3.xpose.msra.mxu1 %v4463_v13 }
 0x848   : > { %12983 = vmatprep.mubr.msk.f32.mxu0 %vm14259_vm0, %v14258_v0  ;;  %12991 = vmatprep.subr.mxu0 %v14258_v0 }
 0x849   : > { %13008 = vmatprep.mubr.msk.f32.mxu1 %vm14259_vm0, %v14258_v0  ;;  %13016 = vmatprep.subr.mxu1 %v14258_v0 }
 0x84a   : > { %12984 = vmatmul.mubr.f32.vlgmr.msra.gmra.mxu0 %v3965_v1  ;;  %13009 = vmatmul.mubr.f32.vlgmr.msra.gmra.mxu1 %v4418_v3 }
 0x84b   : > { %12992 = vmatpush3.msra.mxu0 %v4007_v51  ;;  %13017 = vmatpush3.xpose.msra.mxu1 %v4383_v52 }
 0x84c   : > { %12993 = vmatprep.mubr.msk.f32.mxu0 %vm14259_vm0, %v14258_v0  ;;  %13001 = vmatprep.subr.mxu0 %v14258_v0 }
 0x84d   : > { %13018 = vmatprep.mubr.msk.f32.mxu1 %vm14259_vm0, %v14258_v0  ;;  %13026 = vmatprep.subr.mxu1 %v14258_v0 }
 0x84e   : > { %12994 = vmatmul.mubr.f32.vlgmr.msra.gmra.mxu0 %v3964_v60  ;;  %13019 = vmatmul.mubr.f32.vlgmr.msra.gmra.mxu1 %v4420_v14 }
 0x84f   : > { %13002 = vmatpush3.xpose.msra.mxu0 %v4383_v52  ;;  %13027 = vmatpush3.xpose.msra.mxu1 %v4383_v52 }
 0x850   : > { %13003 = vmatprep.mubr.msk.f32.mxu0 %vm14259_vm0, %v14258_v0  ;;  %13011 = vmatprep.subr.mxu0 %v14258_v0 }
 0x851   : > { %13028 = vmatprep.mubr.msk.f32.mxu1 %vm14259_vm0, %v14258_v0  ;;  %13036 = vmatprep.subr.mxu1 %v14258_v0 }
 0x852   : > { %13004 = vmatmul.mubr.f32.vlgmr.msra.gmra.mxu0 %v4422_v4  ;;  %13029 = vmatmul.mubr.f32.vlgmr.msra.gmra.mxu1 %v4418_v3  ;;  %v596_v4 = vld [vmem:[#allocation10 + $0x10] sm:$0xff] }
 0x853   : > { %13012 = vmatpush3.xpose.msra.mxu0 %v4460_v56  ;;  %13013 = vmatprep.mubr.msk.f32.mxu0 %vm14259_vm0, %v14258_v0 }
 0x854   : > { %13021 = vmatprep.subr.mxu0 %v14258_v0  ;;  %13038 = vmatprep.mubr.msk.f32.mxu1 %vm14259_vm0, %v14258_v0 }
 0x856   : > { %13014 = vmatmul.mubr.f32.vlgmr.msra.gmra.mxu0 %v4419_v10 }
 0x857   : > { %13022 = vmatpush3.xpose.msra.mxu0 %v4461_v61  ;;  %13023 = vmatprep.mubr.msk.f32.mxu0 %vm14259_vm0, %v14258_v0 }
 0x858   : > { %13031 = vmatprep.subr.mxu0 %v14258_v0 }
 0x85a   : > { %13024 = vmatmul.mubr.f32.vlgmr.msra.gmra.mxu0 %v4418_v3 }
 0x85b   : > { %13033 = vmatprep.mubr.msk.f32.mxu0 %vm14259_vm0, %v14258_v0 }
 0x8fe   : > { %v4046_v16 = vpop.f32.mrf.mxu1 }
 0x900   : > { %v12980_v17 = vpop.f32.mrf.mxu1 }
 0x901   : > { %v15028_v17 = vand.u32 4294901760, %v596_v4 }
 0x902   : > { %v4194_v18 = vpop.f32.mrf.mxu1 }
 0x904   : > { %v12990_v19 = vpop.f32.mrf.mxu1 }
 0x905   : > { %v15034_v19 = vsub.f32 %v596_v4, %v15028_v17 }
 0x906   : > { %v3970_v20 = vpop.f32.mrf.mxu0  ;;  %v4340_v22 = vpop.f32.mrf.mxu1 }
 0x907   : > { %v4047_v50 = vadd.f32 %v4046_v16, %v3970_v20  ;;  %v15026_v16 = vand.u32 4294901760, %v597_v15 }
 0x908   : > { %v12975_v23 = vpop.f32.mrf.mxu0  ;;  %v13000_v25 = vpop.f32.mrf.mxu1 }
 0x90a   : > { %v4120_v26 = vpop.f32.mrf.mxu0  ;;  %v4500_v27 = vpop.f32.mrf.mxu1 }
 0x90b   : > { %v4121_v21 = vadd.f32 %v4120_v26, %v4047_v50 }
 0x90c   : > { %v12985_v28 = vpop.f32.mrf.mxu0  ;;  %v13010_v29 = vpop.f32.mrf.mxu1 }
 0x90d   : > { %v4195_v51 = vadd.f32 %v4194_v18, %v4121_v21  ;;  %v15031_v18 = vsub.f32 %v597_v15, %v15026_v16  ;;  %v595_v28 = vld [vmem:[#allocation10 + $0x8] sm:$0xff]  ;;  %v15132_v15 = vld [vmem:[%s15945_s11] sm:$0xff] }
 0x90e   : > { %v4268_v30 = vpop.f32.mrf.mxu0  ;;  %v4648_v32 = vpop.f32.mrf.mxu1  ;;  %v15050_v29 = vand.u32 4294901760, %v595_v28 }
 0x90f   : > { %v4269_v52 = vadd.f32 %v4268_v30, %v4195_v51  ;;  %v5392_v20 = vand.u32 4294901760, %v15031_v18 }
 0x910   : > { %v12995_v33 = vpop.f32.mrf.mxu0  ;;  %v13020_v34 = vpop.f32.mrf.mxu1 }
 0x911   : > { %v4341_v53 = vadd.f32 %v4340_v22, %v4269_v52  ;;  %v5399_v22 = vand.u32 4294901760, %v15034_v19  ;;  %v5393_v23 = vsub.f32 %v15031_v18, %v5392_v20  ;;  %v15053_v33 = vsub.f32 %v595_v28, %v15050_v29 }
 0x912   : > { %v4424_v35 = vpop.f32.mrf.mxu0  ;;  %v4794_v36 = vpop.f32.mrf.mxu1 }
 0x913   : > { %v4501_v40 = vadd.f32 %v4500_v27, %v4424_v35  ;;  %v5400_v25 = vsub.f32 %v15034_v19, %v5399_v22  ;;  %v5394_v26 = vand.u32 4294901760, %v5393_v23 }
 0x914   : > { %v13005_v37 = vpop.f32.mrf.mxu0  ;;  %v13030_v38 = vpop.f32.mrf.mxu1 }
 0x915   : > { %v5401_v27 = vand.u32 4294901760, %v5400_v25 }
 0x916   : > { %v4574_v41 = vpop.f32.mrf.mxu0 }
 0x917   : > { %v4575_v42 = vadd.f32 %v4574_v41, %v4501_v40 }
 0x918   : > { %v13015_v43 = vpop.f32.mrf.mxu0 }
 0x919   : > { %v4649_v44 = vadd.f32 %v4648_v32, %v4575_v42  ;;  %v594_v32 = vld [vmem:[#allocation10] sm:$0xff] }
 0x91a   : > { %v4722_v45 = vpop.f32.mrf.mxu0  ;;  %v15055_v34 = vand.u32 4294901760, %v594_v32 }
 0x91b   : > { %v4723_v46 = vadd.f32 %v4722_v45, %v4649_v44 }
 0x91c   : > { %v13025_v47 = vpop.f32.mrf.mxu0  ;;  %v15061_v37 = vsub.f32 %v594_v32, %v15055_v34  ;;  %v13889_v32 = vld [vmem:[%s495_s5] sm:$0xff]  ;;  %s14271_s5 = smov [#allocation19]  }
 0x91d   : > { %v4795_v48 = vadd.f32 %v4794_v36, %v4723_v46  ;;  %v5406_v36 = vand.u32 4294901760, %v15053_v33  ;;  %s14160_s10 = sshll.u32 %s14271_s5, 4  ;;  %s14161_s10 = int_to_ptr.vmem [resolvable:$false] %s14160_s10 }
 0x91e   : > { %v5413_v41 = vand.u32 4294901760, %v15061_v37 }
 0x91f   : > { %v4798_v49 = vmul.f32 0.35355338, %v4795_v48  ;;  %v5407_v40 = vsub.f32 %v15053_v33, %v5406_v36 }
 0x920   : > { %v5414_v44 = vsub.f32 %v15061_v37, %v5413_v41 }
 0x921   : > { %v4799_v39 = vsel %vm1590_vm2, %v4798_v49, -inf  ;;  %v5408_v43 = vand.u32 4294901760, %v5407_v40 }
 0x922   : > { %4800 = vmax.xlane.f32.xlu0 %v4799_v39  ;;  %v5415_v47 = vand.u32 4294901760, %v5414_v44 }
 0x938   : > { %4810 = vrot.lane.b32.xlu0 %v14854_v11, %s14267_s15 }
 0x93c   : > { %5267 = vrot.lane.b32.xlu0 %v4341_v53, %s14268_s30 }
 0x9ab   : > { %v4801_v54 = vpop.xlane.xlu0 %4800 }
 0x9ac   : > { %v4802_v55 = vsub.f32 %v4798_v49, %v4801_v54 }
 0x9ae   : > { %v4803_v56 = vmul.f32 1.442695, %v4802_v55 }
 0x9af   : > { %v4811_v57 = vpop.permute.xlu0 %4810 }
 0x9b0   : > { %13856 = vpow2.f32 %v4803_v56  ;;  %v4847_v58 = vand.u32 4294901760, %v4811_v57 }
 0x9b2   : > { %v4924_v59 = vsub.f32 %v4811_v57, %v4847_v58  ;;  %13032 = vmatpush3.msra.mxu0 %v4847_v58 }
 0x9b3   : > { %13041 = vmatprep.subr.mxu0 %v14258_v0 }
 0x9b4   : > { %v4925_v60 = vand.u32 4294901760, %v4924_v59 }
 0x9b6   : > { %v4926_v61 = vsub.f32 %v4924_v59, %v4925_v60 }
 0x9b8   : > { %v4927_v62 = vand.u32 4294901760, %v4926_v61 }
 0x9ba   : > { %13037 = vmatpush3.msra.mxu1 %v4927_v62 }
 0x9bb   : > { %13046 = vmatprep.subr.mxu1 %v14258_v0 }
 0x9bd   : > { %v13857_v11 = vpop.eup %13856 }
 0x9be   : > { %v4805_v1 = vsel %vm1590_vm2, %v13857_v11, 0.0 }
 0x9bf   : > { %4806 = vadd.xlane.f32.xlu1 %v4805_v1 }
 0x9d0   : > { %5263 = vrot.lane.b32.xlu1 %v14951_v24, %s14269_s13 }
 0xa48   : > { %v4807_v3 = vpop.xlane.xlu1 %4806 }
 0xa49   : > { %13858 = vrcp.f32 %v4807_v3 }
 0xa4c   : > { %v5264_v57 = vpop.permute.xlu1 %5263 }
 0xa56   : > { %v13859_v5 = vpop.eup %13858 }
 0xa57   : > { %v4809_v6 = vmul.f32 %v13859_v5, %v13857_v11 }
 0xa59   : > { %v4814_v9 = vsel %vm1590_vm2, %v4809_v6, 0 }
 0xa5a   : > { %v4882_v10 = vand.u32 4294901760, %v4814_v9 }
 0xa5c   : > { %v4883_v12 = vsub.f32 %v4814_v9, %v4882_v10  ;;  %13039 = vmatmul.mubr.f32.vlgmr.msra.gmra.mxu1 %v4882_v10 }
 0xa5d   : > { %13047 = vmatpush3.msra.mxu1 %v4847_v58  ;;  %13048 = vmatprep.mubr.msk.f32.mxu1 %vm14259_vm0, %v14258_v0 }
 0xa5e   : > { %13056 = vmatprep.subr.mxu1 %v14258_v0  ;;  %v4884_v13 = vand.u32 4294901760, %v4883_v12 }
 0xa60   : > { %13049 = vmatmul.mubr.f32.vlgmr.msra.gmra.mxu1 %v4884_v13  ;;  %v4885_v14 = vsub.f32 %v4883_v12, %v4884_v13 }
 0xa61   : > { %13057 = vmatpush3.msra.mxu1 %v4847_v58  ;;  %13058 = vmatprep.mubr.msk.f32.mxu1 %vm14259_vm0, %v14258_v0  ;;  %v5274_v58 = vsel %vm1590_vm2, %v14902_v8, %v5264_v57 }
 0xa62   : > { %v4886_v24 = vand.u32 4294901760, %v4885_v14  ;;  %13072 = vmatprep.subr.mxu1 %v14258_v0 }
 0xa64   : > { %13034 = vmatmul.mubr.f32.vlgmr.msra.gmra.mxu0 %v4886_v24  ;;  %13059 = vmatmul.mubr.f32.vlgmr.msra.gmra.mxu1 %v4882_v10 }
 0xa65   : > { %13042 = vmatpush3.msra.mxu0 %v4924_v59  ;;  %13043 = vmatprep.mubr.msk.f32.mxu0 %vm14259_vm0, %v14258_v0  ;;  %v5268_v59 = vpop.permute.xlu0 %5267 }
 0xa66   : > { %13051 = vmatprep.subr.mxu0 %v14258_v0  ;;  %13080 = vmatprep.mubr.msk.f32.mxu1 %vm14259_vm0, %v14258_v0 }
 0xa67   : > { %13073 = vmatpush3.msra.mxu1 %v5394_v26 }
 0xa68   : > { %13044 = vmatmul.mubr.f32.vlgmr.msra.gmra.mxu0 %v4883_v12  ;;  %13074 = vmatprep.subr.mxu1 %v14258_v0  ;;  %v5281_v12 = vsub.s32 3, %v14807_v63 }
 0xa69   : > { %13052 = vmatpush3.msra.mxu0 %v4925_v60  ;;  %13053 = vmatprep.mubr.msk.f32.mxu0 %vm14259_vm0, %v14258_v0  ;;  %v5276_v60 = vsel %vm5275_vm3, %v5274_v58, %v5268_v59 }
 0xa6a   : > { %13061 = vmatprep.subr.mxu0 %v14258_v0  ;;  %13075 = vmatpush3.msra.mxu1 %v5401_v27  ;;  %v5282_v4 = vrot.slane %v15132_v15, %v5281_v12 }
 0xa6b   : > { %13076 = vmatprep.subr.mxu1 %v14258_v0 }
 0xa6c   : > { %13054 = vmatmul.mubr.f32.vlgmr.msra.gmra.mxu0 %v4882_v10  ;;  %13077 = vmatpush3.msra.mxu1 %v5408_v43  ;;  %v5803_v43 = vld [vmem:[#allocation11 + $0x8] sm:$0xff] }
 0xa6d   : > { %13069 = vmatprep.mubr.msk.f32.mxu0 %vm14259_vm0, %v14258_v0  ;;  %13062 = vmatpush3.msra.mxu0 %v15026_v16 }
 0xa6e   : > { %13063 = vmatprep.subr.mxu0 %v14258_v0  ;;  %13078 = vmatprep.subr.mxu1 %v14258_v0 }
 0xa6f   : > { %13064 = vmatpush3.msra.mxu0 %v15028_v17  ;;  %13079 = vmatpush3.msra.mxu1 %v5415_v47  ;;  %v5802_v47 = vld [vmem:[#allocation11] sm:$0xff] }
 0xa70   : > { %13065 = vmatprep.subr.mxu0 %v14258_v0  ;;  %13094 = vmatprep.subr.mxu1 %v14258_v0 }
 0xa71   : > { %13066 = vmatpush3.msra.mxu0 %v15050_v29 }
 0xa72   : > { %13067 = vmatprep.subr.mxu0 %v14258_v0 }
 0xa73   : > { %13068 = vmatpush3.msra.mxu0 %v15055_v34 }
 0xa74   : > { %13083 = vmatprep.subr.mxu0 %v14258_v0 }
 0xb1c   : > { %v4964_v30 = vpop.f32.mrf.mxu1 }
 0xb1e   : > { %v13040_v35 = vpop.f32.mrf.mxu1 }
 0xb20   : > { %v5112_v38 = vpop.f32.mrf.mxu1 }
 0xb22   : > { %v13050_v42 = vpop.f32.mrf.mxu1 }
 0xb23   : > { %v5804_v42 = vld [vmem:[#allocation11 + $0x10] sm:$0xff] }
 0xb24   : > { %v4888_v45 = vpop.f32.mrf.mxu0  ;;  %v5258_v46 = vpop.f32.mrf.mxu1 }
 0xb25   : > { %v4965_v39 = vadd.f32 %v4964_v30, %v4888_v45  ;;  %v15143_v45 = vand.u32 4294901760, %v5804_v42 }
 0xb26   : > { %v13035_v48 = vpop.f32.mrf.mxu0  ;;  %v13060_v49 = vpop.f32.mrf.mxu1 }
 0xb27   : > { %v15147_v48 = vand.u32 4294901760, %v5802_v47 }
 0xb28   : > { %v5038_v50 = vpop.f32.mrf.mxu0 }
 0xb29   : > { %v5039_v21 = vadd.f32 %v5038_v50, %v4965_v39  ;;  %v15153_v39 = vsub.f32 %v5804_v42, %v15143_v45 }
 0xb2a   : > { %v13045_v51 = vpop.f32.mrf.mxu0 }
 0xb2b   : > { %v5113_v52 = vadd.f32 %v5112_v38, %v5039_v21  ;;  %v15160_v21 = vsub.f32 %v5802_v47, %v15147_v48 }
 0xb2c   : > { %v5186_v53 = vpop.f32.mrf.mxu0 }
 0xb2d   : > { %v5187_v54 = vadd.f32 %v5186_v53, %v5113_v52  ;;  %v5934_v52 = vand.u32 4294901760, %v15153_v39 }
 0xb2e   : > { %v13055_v55 = vpop.f32.mrf.mxu0 }
 0xb2f   : > { %v5259_v56 = vadd.f32 %v5258_v46, %v5187_v54  ;;  %v15145_v46 = vand.u32 4294901760, %v5803_v43  ;;  %v5948_v54 = vand.u32 4294901760, %v15160_v21 }
 0xb31   : > { %5271 = vrot.lane.b32.xlu1 %v5259_v56, %s14270_s4  ;;  %v15156_v50 = vsub.f32 %v5803_v43, %v15145_v46  ;;  %v5935_v56 = vsub.f32 %v15153_v39, %v5934_v52 }
 0xb33   : > { %v5941_v53 = vand.u32 4294901760, %v15156_v50  ;;  %v5936_v59 = vand.u32 4294901760, %v5935_v56 }
 0xb35   : > { %v5942_v57 = vsub.f32 %v15156_v50, %v5941_v53 }
 0xba3   : > { %v5272_v61 = vpop.permute.xlu1 %5271 }
 0xba4   : > { %v5278_v62 = vsel %vm5277_vm4, %v5276_v60, %v5272_v61  ;;  %v5949_v60 = vsub.f32 %v15160_v21, %v5948_v54  ;;  %v5943_v61 = vand.u32 4294901760, %v5942_v57 }
 0xba5   : > { %v5284_v11 = vsel %vm602_vm1, %v5278_v62, 0 }
 0xba6   : > { %v5355_v1 = vand.u32 4294901760, %v5284_v11  ;;  %v5950_v62 = vand.u32 4294901760, %v5949_v60 }
 0xba8   : > { %v5356_v3 = vsub.f32 %v5284_v11, %v5355_v1  ;;  %13081 = vmatmul.mubr.f32.vlgmr.msra.gmra.mxu1 %v5355_v1 }
 0xba9   : > { %13095 = vmatpush3.msra.mxu1 %v15026_v16  ;;  %13102 = vmatprep.mubr.msk.f32.mxu1 %vm14259_vm0, %v14258_v0 }
 0xbaa   : > { %13096 = vmatprep.subr.mxu1 %v14258_v0  ;;  %v5357_v8 = vand.u32 4294901760, %v5356_v3 }
 0xbab   : > { %13097 = vmatpush3.msra.mxu1 %v15028_v17 }
 0xbac   : > { %13098 = vmatprep.subr.mxu1 %v14258_v0  ;;  %v5358_v5 = vsub.f32 %v5356_v3, %v5357_v8 }
 0xbad   : > { %13099 = vmatpush3.msra.mxu1 %v15050_v29 }
 0xbae   : > { %13100 = vmatprep.subr.mxu1 %v14258_v0  ;;  %v5359_v6 = vand.u32 4294901760, %v5358_v5 }
 0xbaf   : > { %13101 = vmatpush3.msra.mxu1 %v15055_v34 }
 0xbb0   : > { %13103 = vmatmul.mubr.f32.vlgmr.msra.gmra.mxu1 %v5357_v8  ;;  %13116 = vmatprep.subr.mxu1 %v14258_v0 }
 0xbb1   : > { %13070 = vmatmul.mubr.f32.vlgmr.msra.gmra.mxu0 %v5359_v6  ;;  %13117 = vmatpush3.msra.mxu1 %v15026_v16 }
 0xbb2   : > { %13084 = vmatpush3.msra.mxu0 %v15031_v18  ;;  %13118 = vmatprep.subr.mxu1 %v14258_v0 }
 0xbb3   : > { %13085 = vmatprep.subr.mxu0 %v14258_v0  ;;  %13119 = vmatpush3.msra.mxu1 %v15028_v17 }
 0xbb4   : > { %13086 = vmatpush3.msra.mxu0 %v15034_v19  ;;  %13120 = vmatprep.subr.mxu1 %v14258_v0 }
 0xbb5   : > { %13087 = vmatprep.subr.mxu0 %v14258_v0  ;;  %13121 = vmatpush3.msra.mxu1 %v15050_v29 }
 0xbb6   : > { %13088 = vmatpush3.msra.mxu0 %v15053_v33  ;;  %13122 = vmatprep.subr.mxu1 %v14258_v0 }
 0xbb7   : > { %13089 = vmatprep.subr.mxu0 %v14258_v0  ;;  %13091 = vmatprep.mubr.msk.f32.mxu0 %vm14259_vm0, %v14258_v0 }
 0xbb8   : > { %13090 = vmatpush3.msra.mxu0 %v15061_v37  ;;  %13123 = vmatpush3.msra.mxu1 %v15055_v34 }
 0xbb9   : > { %13124 = vmatprep.mubr.msk.f32.mxu1 %vm14259_vm0, %v14258_v0  ;;  %13092 = vmatmul.mubr.f32.vlgmr.msra.gmra.mxu0 %v5356_v3 }
 0xbba   : > { %13105 = vmatprep.subr.mxu0 %v14258_v0  ;;  %13125 = vmatmul.mubr.f32.vlgmr.msra.gmra.mxu1 %v5355_v1 }
 0xbbb   : > { %13106 = vmatpush3.msra.mxu0 %v5392_v20  ;;  %13113 = vmatprep.mubr.msk.f32.mxu0 %vm14259_vm0, %v14258_v0 }
 0xbbc   : > { %13107 = vmatprep.subr.mxu0 %v14258_v0  ;;  %13138 = vmatprep.subr.mxu1 %v14258_v0 }
 0xbbd   : > { %13108 = vmatpush3.msra.mxu0 %v5399_v22  ;;  %13146 = vmatprep.mubr.msk.f32.mxu1 %vm14259_vm0, %v14258_v0 }
 0xbbe   : > { %13109 = vmatprep.subr.mxu0 %v14258_v0 }
 0xbbf   : > { %13110 = vmatpush3.msra.mxu0 %v5406_v36 }
 0xbc0   : > { %13111 = vmatprep.subr.mxu0 %v14258_v0 }
 0xbc1   : > { %13112 = vmatpush3.msra.mxu0 %v5413_v41  ;;  %v5805_v41 = vld [vmem:[#allocation11 + $0x18] sm:$0xff] }
 0xbc2   : > { %13114 = vmatmul.mubr.f32.vlgmr.msra.gmra.mxu0 %v5355_v1  ;;  %13127 = vmatprep.subr.mxu0 %v14258_v0  ;;  %v15141_v44 = vand.u32 4294901760, %v5805_v41 }
 0xbc3   : > { %13135 = vmatprep.mubr.msk.f32.mxu0 %vm14259_vm0, %v14258_v0 }
 0xbc4   : > { %v15150_v49 = vsub.f32 %v5805_v41, %v15141_v44  ;;  %13128 = vmatpush3.msra.mxu0 %v15141_v44 }
 0xbc5   : > { %13129 = vmatprep.subr.mxu0 %v14258_v0 }
 0xbc6   : > { %v5927_v51 = vand.u32 4294901760, %v15150_v49  ;;  %13130 = vmatpush3.msra.mxu0 %v15143_v45 }
 0xbc7   : > { %13131 = vmatprep.subr.mxu0 %v14258_v0 }
 0xbc8   : > { %v5928_v55 = vsub.f32 %v15150_v49, %v5927_v51  ;;  %13132 = vmatpush3.msra.mxu0 %v15145_v46 }
 0xbc9   : > { %13133 = vmatprep.subr.mxu0 %v14258_v0 }
 0xbca   : > { %v5929_v58 = vand.u32 4294901760, %v5928_v55  ;;  %13134 = vmatpush3.msra.mxu0 %v15147_v48 }
 0xbcb   : > { %13149 = vmatprep.subr.mxu0 %v14258_v0 }
 0xbcc   : > { %13139 = vmatpush3.msra.mxu1 %v5929_v58 }
 0xbcd   : > { %13140 = vmatprep.subr.mxu1 %v14258_v0 }
 0xbce   : > { %13141 = vmatpush3.msra.mxu1 %v5936_v59 }
 0xbcf   : > { %13142 = vmatprep.subr.mxu1 %v14258_v0 }
 0xbd0   : > { %13143 = vmatpush3.msra.mxu1 %v5943_v61  ;;  %v5816_v61 = vsub.s32 4, %v14807_v63 }
 0xbd1   : > { %13144 = vmatprep.subr.mxu1 %v14258_v0 }
 0xbd2   : > { %13145 = vmatpush3.msra.mxu1 %v5950_v62 }
 0xbd3   : > { %13160 = vmatprep.subr.mxu1 %v14258_v0 }
 0xc68   : > { %v5452_v9 = vpop.f32.mrf.mxu1 }
 0xc6a   : > { %v13082_v10 = vpop.f32.mrf.mxu1 }
 0xc6b   : > { %v585_v10 = vld [vmem:[%s15945_s11 + $0x8] sm:$0x7f] }
 0xc70   : > { %v5609_v13 = vpop.f32.mrf.mxu1 }
 0xc71   : > { %v5361_v14 = vpop.f32.mrf.mxu0 }
 0xc72   : > { %v13104_v24 = vpop.f32.mrf.mxu1  ;;  %v5362_v17 = vadd.f32 %v5361_v14, %v5282_v4 }
 0xc73   : > { %v13071_v16 = vpop.f32.mrf.mxu0  ;;  %v5800_v24 = vrot.slane %v585_v10, %v1583_v7 }
 0xc74   : > { %v5453_v20 = vadd.f32 %v5452_v9, %v5362_v17 }
 0xc79   : > { %v5532_v18 = vpop.f32.mrf.mxu0 }
 0xc7a   : > { %v5767_v19 = vpop.f32.mrf.mxu1  ;;  %v5533_v25 = vadd.f32 %v5532_v18, %v5453_v20  ;;  %v5809_v20 = vld [vmem:[#allocation13 + $0x18] sm:$0xff] }
 0xc7b   : > { %v13093_v22 = vpop.f32.mrf.mxu0 }
 0xc7c   : > { %v13126_v23 = vpop.f32.mrf.mxu1  ;;  %v5610_v26 = vadd.f32 %v5609_v13, %v5533_v25  ;;  %v5795_v13 = vrot.slane %v585_v10, %v1578_v31  ;;  %v15207_v31 = vand.u32 4294901760, %v5809_v20  ;;  %v5807_v25 = vld [vmem:[#allocation13 + $0x8] sm:$0xff] }
 0xc7d   : > { %v5808_v23 = vld [vmem:[#allocation13 + $0x10] sm:$0xff] }
 0xc82   : > { %v5692_v27 = vpop.f32.mrf.mxu0 }
 0xc83   : > { %v5693_v28 = vadd.f32 %v5692_v27, %v5610_v26  ;;  %v15211_v26 = vand.u32 4294901760, %v5808_v23 }
 0xc84   : > { %v13115_v29 = vpop.f32.mrf.mxu0 }
 0xc85   : > { %v5768_v30 = vadd.f32 %v5767_v19, %v5693_v28  ;;  %v15216_v28 = vsub.f32 %v5809_v20, %v15207_v31  ;;  %v15218_v29 = vand.u32 4294901760, %v5807_v25 }
 0xc87   : > { %v5771_v33 = vadd.f32 %v13889_v32, %v5768_v30  ;;  %v5806_v32 = vld [vmem:[#allocation13] sm:$0xff] }
 0xc89   : > { %v5772_v34 = vsel %vm602_vm1, %v5771_v33, 0.0 }
 0xc8a   : > { %5773 = vadd.xlane.f32.xlu0 %v5772_v34  ;;  %v583_v34 = vld [vmem:[%s504_s20] sm:$0xff] }
 0xd13   : > { %v5774_v35 = vpop.xlane.xlu0 %5773 }
 0xd14   : > { %v5776_v36 = vmul.f32 0.03125, %v5774_v35  ;;  %v6415_v35 = vand.u32 4294901760, %v15216_v28 }
 0xd16   : > { %v5777_v37 = vsub.f32 %v5771_v33, %v5776_v36  ;;  %v15223_v33 = vsub.f32 %v5808_v23, %v15211_v26  ;;  %v15231_v36 = vsub.f32 %v5807_v25, %v15218_v29  ;;  %v6416_v41 = vsub.f32 %v15216_v28, %v6415_v35 }
 0xd18   : > { %v5778_v38 = vmul.f32 %v5777_v37, %v5777_v37  ;;  %v6429_v42 = vand.u32 4294901760, %v15231_v36 }
 0xd1a   : > { %v5779_v40 = vsel %vm602_vm1, %v5778_v38, 0.0  ;;  %v6422_v38 = vand.u32 4294901760, %v15223_v33  ;;  %v6430_v47 = vsub.f32 %v15231_v36, %v6429_v42 }
 0xd1b   : > { %5780 = vadd.xlane.f32.xlu1 %v5779_v40  ;;  %v6307_v40 = vsel %vm602_vm1, %v583_v34, 0 }
 0xd1c   : > { %v6431_v57 = vand.u32 4294901760, %v6430_v47 }
 0xda4   : > { %v5781_v11 = vpop.xlane.xlu1 %5780 }
 0xda5   : > { %v5782_v1 = vmul.f32 0.03125, %v5781_v11 }
 0xda7   : > { %13860 = vrsqrt.f32 %v5782_v1  ;;  %vm5785_vm5 = vcmp.eq.f32.partialorder %v5782_v1, inf  ;;  %v5788_v5 = vand.u32 2147483648, %v5782_v1  ;;  %vm5787_vm6 = vcmp.eq.f32.partialorder %v5782_v1, 0.0 }
 0xdb4   : > { %v13861_v3 = vpop.eup %13860 }
 0xdb5   : > { %v5784_v8 = vmul.f32 %v13861_v3, %v5782_v1  ;;  %v5817_v3 = vrot.slane %v15132_v15, %v5816_v61 }
 0xdb7   : > { %v5786_v6 = vsel %vm5785_vm5, %v5782_v1, %v5784_v8 }
 0xdb8   : > { %v5789_v9 = vsel %vm5787_vm6, %v5788_v5, %v5786_v6 }
 0xdb9   : > { %13862 = vrcp.f32 %v5789_v9 }
 0xdc6   : > { %v13863_v14 = vpop.eup %13862 }
 0xdc7   : > { %v5791_v4 = vmul.f32 %v13863_v14, %v5777_v37  ;;  %v15233_v37 = vand.u32 4294901760, %v5806_v32 }
 0xdc9   : > { %v5796_v16 = vmul.f32 %v5795_v13, %v5791_v4  ;;  %v15250_v43 = vsub.f32 %v5806_v32, %v15233_v37 }
 0xdcb   : > { %v15196_v17 = vadd.f32 %v5800_v24, %v5796_v16  ;;  %v6436_v55 = vand.u32 4294901760, %v15250_v43 }
 0xdcd   : > { %v5819_v18 = vsel %vm602_vm1, %v15196_v17, 0  ;;  %v6437_v58 = vsub.f32 %v15250_v43, %v6436_v55 }
 0xdce   : > { %v15200_v19 = vand.u32 4294901760, %v5819_v18 }
 0xdd0   : > { %v5891_v22 = vsub.f32 %v5819_v18, %v15200_v19  ;;  %13147 = vmatmul.mubr.f32.vlgmr.msra.gmra.mxu1 %v15200_v19 }
 0xdd1   : > { %13161 = vmatpush3.msra.mxu1 %v15141_v44  ;;  %13168 = vmatprep.mubr.msk.f32.mxu1 %vm14259_vm0, %v14258_v0 }
 0xdd2   : > { %13162 = vmatprep.subr.mxu1 %v14258_v0  ;;  %v5892_v7 = vand.u32 4294901760, %v5891_v22 }
 0xdd3   : > { %13163 = vmatpush3.msra.mxu1 %v15143_v45 }
 0xdd4   : > { %13164 = vmatprep.subr.mxu1 %v14258_v0  ;;  %v5893_v27 = vsub.f32 %v5891_v22, %v5892_v7 }
 0xdd5   : > { %13165 = vmatpush3.msra.mxu1 %v15145_v46 }
 0xdd6   : > { %13166 = vmatprep.subr.mxu1 %v14258_v0  ;;  %v5894_v30 = vand.u32 4294901760, %v5893_v27 }
 0xdd7   : > { %13167 = vmatpush3.msra.mxu1 %v15147_v48 }
 0xdd8   : > { %13169 = vmatmul.mubr.f32.vlgmr.msra.gmra.mxu1 %v5892_v7  ;;  %13182 = vmatprep.subr.mxu1 %v14258_v0 }
 0xdd9   : > { %13136 = vmatmul.mubr.f32.vlgmr.msra.gmra.mxu0 %v5894_v30  ;;  %13183 = vmatpush3.msra.mxu1 %v15141_v44  ;;  %v15254_v44 = vand.u32 4294901760, %v6307_v40 }
 0xdda   : > { %13150 = vmatpush3.msra.mxu0 %v15150_v49  ;;  %13184 = vmatprep.subr.mxu1 %v14258_v0 }
 0xddb   : > { %13151 = vmatprep.subr.mxu0 %v14258_v0  ;;  %13185 = vmatpush3.msra.mxu1 %v15143_v45  ;;  %v6423_v45 = vsub.f32 %v15223_v33, %v6422_v38  ;;  %v6379_v56 = vsub.f32 %v6307_v40, %v15254_v44 }
 0xddc   : > { %13152 = vmatpush3.msra.mxu0 %v15153_v39  ;;  %13186 = vmatprep.subr.mxu1 %v14258_v0  ;;  %v6438_v39 = vand.u32 4294901760, %v6437_v58 }
 0xddd   : > { %13153 = vmatprep.subr.mxu0 %v14258_v0  ;;  %13187 = vmatpush3.msra.mxu1 %v15145_v46  ;;  %v6417_v46 = vand.u32 4294901760, %v6416_v41  ;;  %v6380_v49 = vand.u32 4294901760, %v6379_v56 }
 0xdde   : > { %13154 = vmatpush3.msra.mxu0 %v15156_v50  ;;  %13188 = vmatprep.subr.mxu1 %v14258_v0 }
 0xddf   : > { %13155 = vmatprep.subr.mxu0 %v14258_v0  ;;  %13157 = vmatprep.mubr.msk.f32.mxu0 %vm14259_vm0, %v14258_v0 }
 0xde0   : > { %13156 = vmatpush3.msra.mxu0 %v15160_v21  ;;  %13189 = vmatpush3.msra.mxu1 %v15147_v48  ;;  %v6424_v48 = vand.u32 4294901760, %v6423_v45 }
 0xde1   : > { %13190 = vmatprep.mubr.msk.f32.mxu1 %vm14259_vm0, %v14258_v0  ;;  %13158 = vmatmul.mubr.f32.vlgmr.msra.gmra.mxu0 %v5891_v22 }
 0xde2   : > { %13171 = vmatprep.subr.mxu0 %v14258_v0  ;;  %13191 = vmatmul.mubr.f32.vlgmr.msra.gmra.mxu1 %v15200_v19 }
 0xde3   : > { %13172 = vmatpush3.msra.mxu0 %v5927_v51  ;;  %13179 = vmatprep.mubr.msk.f32.mxu0 %vm14259_vm0, %v14258_v0  ;;  %v6381_v51 = vsub.f32 %v6379_v56, %v6380_v49 }
 0xde4   : > { %13173 = vmatprep.subr.mxu0 %v14258_v0  ;;  %13204 = vmatprep.subr.mxu1 %v14258_v0 }
 0xde5   : > { %13174 = vmatpush3.msra.mxu0 %v5934_v52  ;;  %13205 = vmatpush3.msra.mxu1 %v6417_v46  ;;  %v6382_v50 = vand.u32 4294901760, %v6381_v51 }
 0xde6   : > { %13175 = vmatprep.subr.mxu0 %v14258_v0  ;;  %13206 = vmatprep.subr.mxu1 %v14258_v0 }
 0xde7   : > { %13176 = vmatpush3.msra.mxu0 %v5941_v53  ;;  %13207 = vmatpush3.msra.mxu1 %v6424_v48 }
 0xde8   : > { %13177 = vmatprep.subr.mxu0 %v14258_v0  ;;  %13208 = vmatprep.subr.mxu1 %v14258_v0 }
 0xde9   : > { %13178 = vmatpush3.msra.mxu0 %v5948_v54  ;;  %13209 = vmatpush3.msra.mxu1 %v6431_v57 }
 0xdea   : > { %13180 = vmatmul.mubr.f32.vlgmr.msra.gmra.mxu0 %v15200_v19  ;;  %13193 = vmatprep.subr.mxu0 %v14258_v0 }
 0xdeb   : > { %13194 = vmatpush3.msra.mxu0 %v15207_v31  ;;  %13210 = vmatprep.subr.mxu1 %v14258_v0 }
 0xdec   : > { %13195 = vmatprep.subr.mxu0 %v14258_v0  ;;  %13201 = vmatprep.mubr.msk.f32.mxu0 %vm14259_vm0, %v14258_v0 }
 0xded   : > { %13196 = vmatpush3.msra.mxu0 %v15211_v26  ;;  %13211 = vmatpush3.msra.mxu1 %v6438_v39 }
 0xdee   : > { %13197 = vmatprep.subr.mxu0 %v14258_v0  ;;  %13212 = vmatprep.mubr.msk.f32.mxu1 %vm14259_vm0, %v14258_v0 }
 0xdef   : > { %13198 = vmatpush3.msra.mxu0 %v15218_v29  ;;  %13226 = vmatprep.subr.mxu1 %v14258_v0 }
 0xdf0   : > { %13199 = vmatprep.subr.mxu0 %v14258_v0  ;;  %13213 = vmatmul.mubr.f32.vlgmr.msra.gmra.mxu1 %v15254_v44 }
 0xdf1   : > { %13200 = vmatpush3.msra.mxu0 %v15233_v37  ;;  %13227 = vmatpush3.msra.mxu1 %v15207_v31 }
 0xdf2   : > { %13202 = vmatmul.mubr.f32.vlgmr.msra.gmra.mxu0 %v6382_v50  ;;  %13215 = vmatprep.subr.mxu0 %v14258_v0 }
 0xdf3   : > { %13216 = vmatpush3.msra.mxu0 %v15216_v28  ;;  %13228 = vmatprep.subr.mxu1 %v14258_v0 }
 0xdf4   : > { %13217 = vmatprep.subr.mxu0 %v14258_v0  ;;  %13229 = vmatpush3.msra.mxu1 %v15211_v26 }
 0xdf5   : > { %13218 = vmatpush3.msra.mxu0 %v15223_v33  ;;  %13230 = vmatprep.subr.mxu1 %v14258_v0 }
 0xdf6   : > { %13219 = vmatprep.subr.mxu0 %v14258_v0  ;;  %13231 = vmatpush3.msra.mxu1 %v15218_v29 }
 0xdf7   : > { %13220 = vmatpush3.msra.mxu0 %v15231_v36  ;;  %13232 = vmatprep.subr.mxu1 %v14258_v0 }
 0xdf8   : > { %13221 = vmatprep.subr.mxu0 %v14258_v0  ;;  %13223 = vmatprep.mubr.msk.f32.mxu0 %vm14259_vm0, %v14258_v0 }
 0xdf9   : > { %13222 = vmatpush3.msra.mxu0 %v15250_v43  ;;  %13233 = vmatpush3.msra.mxu1 %v15233_v37 }
 0xdfa   : > { %13224 = vmatmul.mubr.f32.vlgmr.msra.gmra.mxu0 %v6379_v56  ;;  %13234 = vmatprep.mubr.msk.f32.mxu1 %vm14259_vm0, %v14258_v0 }
 0xdfb   : > { %13237 = vmatprep.subr.mxu0 %v14258_v0  ;;  %13248 = vmatprep.subr.mxu1 %v14258_v0 }
 0xdfc   : > { %13235 = vmatmul.mubr.f32.vlgmr.msra.gmra.mxu1 %v6380_v49  ;;  %13238 = vmatpush3.msra.mxu0 %v6415_v35 }
 0xdfd   : > { %13249 = vmatpush3.msra.mxu1 %v15207_v31  ;;  %13239 = vmatprep.subr.mxu0 %v14258_v0 }
 0xdfe   : > { %13250 = vmatprep.subr.mxu1 %v14258_v0  ;;  %13240 = vmatpush3.msra.mxu0 %v6422_v38 }
 0xdff   : > { %13251 = vmatpush3.msra.mxu1 %v15211_v26  ;;  %13241 = vmatprep.subr.mxu0 %v14258_v0 }
 0xe00   : > { %13252 = vmatprep.subr.mxu1 %v14258_v0  ;;  %13242 = vmatpush3.msra.mxu0 %v6429_v42 }
 0xe01   : > { %13253 = vmatpush3.msra.mxu1 %v15218_v29  ;;  %13243 = vmatprep.subr.mxu0 %v14258_v0  ;;  %v6796_v29 = vsub.s32 5, %v14807_v63 }
 0xe02   : > { %13254 = vmatprep.subr.mxu1 %v14258_v0  ;;  %13244 = vmatpush3.msra.mxu0 %v6436_v55 }
 0xe03   : > { %13245 = vmatprep.mubr.msk.f32.mxu0 %vm14259_vm0, %v14258_v0  ;;  %13255 = vmatpush3.msra.mxu1 %v15233_v37  ;;  %v6797_v36 = vrot.slane %v15132_v15, %v6796_v29 }
 0xe04   : > { %13256 = vmatprep.mubr.msk.f32.mxu1 %vm14259_vm0, %v14258_v0  ;;  %13246 = vmatmul.mubr.f32.vlgmr.msra.gmra.mxu0 %v15254_v44 }
 0xe05   : > { %13257 = vmatmul.mubr.f32.vlgmr.msra.gmra.mxu1 %v15254_v44  ;;  %13259 = vmatprep.subr.mxu0 %v14258_v0 }
 0xe06   : > { %13261 = vmatprep.mubr.msk.f32.mxu0 %vm14259_vm0, %v14258_v0  ;;  %13264 = vmatprep.subr.mxu1 %v14258_v0 }
 0xe07   : > { %13266 = vmatprep.mubr.msk.f32.mxu1 %vm14259_vm0, %v14258_v0 }
 0xe90   : > { %v5987_v21 = vpop.f32.mrf.mxu1 }
 0xe92   : > { %v13148_v52 = vpop.f32.mrf.mxu1 }
 0xe98   : > { %v6144_v53 = vpop.f32.mrf.mxu1 }
 0xe99   : > { %v5896_v54 = vpop.f32.mrf.mxu0 }
 0xe9a   : > { %v13170_v59 = vpop.f32.mrf.mxu1  ;;  %v5897_v5 = vadd.f32 %v5896_v54, %v5817_v3 }
 0xe9b   : > { %v13137_v60 = vpop.f32.mrf.mxu0 }
 0xe9c   : > { %v5988_v9 = vadd.f32 %v5987_v21, %v5897_v5 }
 0xea1   : > { %v6067_v62 = vpop.f32.mrf.mxu0 }
 0xea2   : > { %v6302_v11 = vpop.f32.mrf.mxu1  ;;  %v6068_v13 = vadd.f32 %v6067_v62, %v5988_v9  ;;  %v6801_v9 = vsub.s32 6, %v14807_v63 }
 0xea3   : > { %v13159_v1 = vpop.f32.mrf.mxu0 }
 0xea4   : > { %v13192_v8 = vpop.f32.mrf.mxu1  ;;  %v6145_v24 = vadd.f32 %v6144_v53, %v6068_v13 }
 0xeaa   : > { %v6227_v6 = vpop.f32.mrf.mxu0 }
 0xeab   : > { %v6228_v18 = vadd.f32 %v6227_v6, %v6145_v24 }
 0xeac   : > { %v13181_v10 = vpop.f32.mrf.mxu0 }
 0xead   : > { %v15363_v20 = vadd.f32 %v6302_v11, %v6228_v18  ;;  %v6802_v10 = vrot.slane %v15132_v15, %v6801_v9 }
 0xeaf   : > { %v6809_v23 = vsel %vm1590_vm2, %v15363_v20, 0 }
 0xeb0   : > { %v6475_v14 = vpop.f32.mrf.mxu1  ;;  %v6880_v27 = vand.u32 4294901760, %v6809_v23 }
 0xeb2   : > { %v6384_v4 = vpop.f32.mrf.mxu0  ;;  %v13214_v16 = vpop.f32.mrf.mxu1  ;;  %v6881_v30 = vsub.f32 %v6809_v23, %v6880_v27 }
 0xeb3   : > { %v6476_v25 = vadd.f32 %v6475_v14, %v6384_v4 }
 0xeb4   : > { %v13203_v19 = vpop.f32.mrf.mxu0  ;;  %v6882_v41 = vand.u32 4294901760, %v6881_v30 }
 0xeb6   : > { %v6883_v44 = vsub.f32 %v6881_v30, %v6882_v41 }
 0xeb8   : > { %v6884_v47 = vand.u32 4294901760, %v6883_v44 }
 0xeba   : > { %v6555_v22 = vpop.f32.mrf.mxu0 }
 0xebb   : > { %v6556_v28 = vadd.f32 %v6555_v22, %v6476_v25 }
 0xebc   : > { %v6632_v31 = vpop.f32.mrf.mxu1  ;;  %v13225_v7 = vpop.f32.mrf.mxu0 }
 0xebd   : > { %v6633_v32 = vadd.f32 %v6632_v31, %v6556_v28 }
 0xebe   : > { %v13236_v26 = vpop.f32.mrf.mxu1 }
 0xec4   : > { %v6715_v33 = vpop.f32.mrf.mxu0 }
 0xec5   : > { %v6716_v34 = vadd.f32 %v6715_v33, %v6633_v32  ;;  %v6790_v35 = vpop.f32.mrf.mxu1 }
 0xec6   : > { %v13247_v37 = vpop.f32.mrf.mxu0 }
 0xec7   : > { %v15371_v38 = vadd.f32 %v6790_v35, %v6716_v34  ;;  %v13258_v40 = vpop.f32.mrf.mxu1 }
 0xec9   : > { %v15374_v42 = vadd.f32 %v6797_v36, %v15371_v38 }
 0xecb   : > { %v6812_v43 = vsel %vm1590_vm2, %v15374_v42, 0 }
 0xecc   : > { %v6845_v45 = vand.u32 4294901760, %v6812_v43 }
 0xece   : > { %13260 = vmatpush3.xpose.msra.mxu0 %v6845_v45  ;;  %v6922_v46 = vsub.f32 %v6812_v43, %v6845_v45 }
 0xecf   : > { %13269 = vmatprep.subr.mxu0 %v14258_v0 }
 0xed0   : > { %v6923_v55 = vand.u32 4294901760, %v6922_v46 }
 0xed1   : > { %13262 = vmatmul.mubr.f32.vlgmr.msra.gmra.mxu0 %v6884_v47 }
 0xed2   : > { %13270 = vmatpush3.xpose.msra.mxu0 %v6922_v46  ;;  %13271 = vmatprep.mubr.msk.f32.mxu0 %vm14259_vm0, %v14258_v0  ;;  %v6924_v56 = vsub.f32 %v6922_v46, %v6923_v55 }
 0xed3   : > { %13279 = vmatprep.subr.mxu0 %v14258_v0 }
 0xed4   : > { %v6925_v48 = vand.u32 4294901760, %v6924_v56 }
 0xed5   : > { %13272 = vmatmul.mubr.f32.vlgmr.msra.gmra.mxu0 %v6881_v30 }
 0xed6   : > { %13265 = vmatpush3.xpose.msra.mxu1 %v6925_v48  ;;  %13280 = vmatpush3.xpose.msra.mxu0 %v6923_v55 }
 0xed7   : > { %13281 = vmatprep.mubr.msk.f32.mxu0 %vm14259_vm0, %v14258_v0  ;;  %13274 = vmatprep.subr.mxu1 %v14258_v0 }
 0xed8   : > { %13289 = vmatprep.subr.mxu0 %v14258_v0 }
 0xed9   : > { %13267 = vmatmul.mubr.f32.vlgmr.msra.gmra.mxu1 %v6880_v27  ;;  %13282 = vmatmul.mubr.f32.vlgmr.msra.gmra.mxu0 %v6880_v27 }
 0xeda   : > { %13275 = vmatpush3.xpose.msra.mxu1 %v6845_v45  ;;  %13276 = vmatprep.mubr.msk.f32.mxu1 %vm14259_vm0, %v14258_v0 }
 0xedb   : > { %13284 = vmatprep.subr.mxu1 %v14258_v0  ;;  %13291 = vmatprep.mubr.msk.f32.mxu0 %vm14259_vm0, %v14258_v0 }
 0xedd   : > { %13277 = vmatmul.mubr.f32.vlgmr.msra.gmra.mxu1 %v6882_v41 }
 0xede   : > { %13285 = vmatpush3.xpose.msra.mxu1 %v6845_v45  ;;  %13286 = vmatprep.mubr.msk.f32.mxu1 %vm14259_vm0, %v14258_v0 }
 0xedf   : > { %13294 = vmatprep.subr.mxu1 %v14258_v0 }
 0xee1   : > { %13287 = vmatmul.mubr.f32.vlgmr.msra.gmra.mxu1 %v6880_v27 }
 0xee2   : > { %13296 = vmatprep.mubr.msk.f32.mxu1 %vm14259_vm0, %v14258_v0 }
 0xf91   : > { %v6886_v57 = vpop.f32.mrf.mxu0 }
 0xf93   : > { %v13263_v58 = vpop.f32.mrf.mxu0 }
 0xf95   : > { %v7036_v49 = vpop.f32.mrf.mxu0 }
 0xf97   : > { %v13273_v39 = vpop.f32.mrf.mxu0 }
 0xf99   : > { %v6962_v51 = vpop.f32.mrf.mxu1  ;;  %v7184_v50 = vpop.f32.mrf.mxu0 }
 0xf9a   : > { %v6963_v21 = vadd.f32 %v6962_v51, %v6886_v57 }
 0xf9b   : > { %v13268_v52 = vpop.f32.mrf.mxu1  ;;  %v13283_v53 = vpop.f32.mrf.mxu0 }
 0xf9c   : > { %v7037_v54 = vadd.f32 %v7036_v49, %v6963_v21 }
 0xf9d   : > { %v7110_v59 = vpop.f32.mrf.mxu1 }
 0xf9e   : > { %v7111_v60 = vadd.f32 %v7110_v59, %v7037_v54 }
 0xf9f   : > { %v13278_v62 = vpop.f32.mrf.mxu1 }
 0xfa0   : > { %v7185_v11 = vadd.f32 %v7184_v50, %v7111_v60 }
 0xfa1   : > { %v7256_v1 = vpop.f32.mrf.mxu1 }
 0xfa2   : > { %v7257_v3 = vadd.f32 %v7256_v1, %v7185_v11 }
 0xfa3   : > { %v13288_v8 = vpop.f32.mrf.mxu1 }
 0xfa4   : > { %v7260_v5 = vmul.f32 0.35355338, %v7257_v3 }
 0xfa6   : > { %v7261_v6 = vsel %vm1590_vm2, %v7260_v5, -inf }
 0xfa7   : > { %7262 = vmax.xlane.f32.xlu0 %v7261_v6 }
 0xfbd   : > { %6804 = vrot.lane.b32.xlu0 %v6802_v10, %s14260_s2 }
 0xfc1   : > { %7727 = vrot.lane.b32.xlu0 %v15374_v42, %s14262_s19 }
0x1030   : > { %v7263_v13 = vpop.xlane.xlu0 %7262 }
0x1031   : > { %v7264_v14 = vsub.f32 %v7260_v5, %v7263_v13 }
0x1033   : > { %v7265_v24 = vmul.f32 1.442695, %v7264_v14 }
0x1034   : > { %v6805_v18 = vpop.permute.xlu0 %6804 }
0x1035   : > { %13864 = vpow2.f32 %v7265_v24  ;;  %v15406_v19 = vadd.f32 %v6805_v18, %v15371_v38 }
0x1038   : > { %v7728_v23 = vpop.permute.xlu0 %7727 }
0x1039   : > { %v7731_v25 = vsel %vm1590_vm2, %v7728_v23, 0 }
0x103a   : > { %v7764_v27 = vand.u32 4294901760, %v7731_v25 }
0x103c   : > { %v7841_v33 = vsub.f32 %v7731_v25, %v7764_v27 }
0x103e   : > { %v7842_v38 = vand.u32 4294901760, %v7841_v33 }
0x1040   : > { %v7843_v45 = vsub.f32 %v7841_v33, %v7842_v38 }
0x1042   : > { %v13865_v4 = vpop.eup %13864  ;;  %v7844_v56 = vand.u32 4294901760, %v7843_v45 }
0x1043   : > { %v7267_v16 = vsel %vm1590_vm2, %v13865_v4, 0.0 }
0x1044   : > { %7268 = vadd.xlane.f32.xlu1 %v7267_v16 }
0x1055   : > { %7273 = vrot.lane.b32.xlu1 %v15406_v19, %s14261_s6 }
0x1059   : > { %7725 = vrot.lane.b32.xlu1 %v15363_v20, %s14262_s19 }
0x10cd   : > { %v7269_v15 = vpop.xlane.xlu1 %7268 }
0x10ce   : > { %13866 = vrcp.f32 %v7269_v15 }
0x10d1   : > { %v7274_v22 = vpop.permute.xlu1 %7273 }
0x10d2   : > { %v7310_v31 = vand.u32 4294901760, %v7274_v22 }
0x10d4   : > { %v7387_v7 = vsub.f32 %v7274_v22, %v7310_v31  ;;  %13290 = vmatpush3.msra.mxu0 %v7310_v31 }
0x10d5   : > { %13299 = vmatprep.subr.mxu0 %v14258_v0  ;;  %v7726_v35 = vpop.permute.xlu1 %7725 }
0x10d6   : > { %v7388_v26 = vand.u32 4294901760, %v7387_v7  ;;  %v7729_v40 = vsel %vm1590_vm2, %v7726_v35, 0 }
0x10d7   : > { %v7799_v43 = vand.u32 4294901760, %v7729_v40 }
0x10d8   : > { %v7389_v28 = vsub.f32 %v7387_v7, %v7388_v26 }
0x10d9   : > { %v7800_v47 = vsub.f32 %v7729_v40, %v7799_v43 }
0x10da   : > { %v7390_v30 = vand.u32 4294901760, %v7389_v28 }
0x10db   : > { %v13867_v32 = vpop.eup %13866  ;;  %v7801_v48 = vand.u32 4294901760, %v7800_v47 }
0x10dc   : > { %13295 = vmatpush3.msra.mxu1 %v7390_v30  ;;  %v7271_v34 = vmul.f32 %v13867_v32, %v13865_v4 }
0x10dd   : > { %13304 = vmatprep.subr.mxu1 %v14258_v0  ;;  %v7802_v57 = vsub.f32 %v7800_v47, %v7801_v48 }
0x10de   : > { %v7277_v36 = vsel %vm1590_vm2, %v7271_v34, 0 }
0x10df   : > { %v7345_v37 = vand.u32 4294901760, %v7277_v36  ;;  %v7803_v58 = vand.u32 4294901760, %v7802_v57 }
0x10e1   : > { %v7346_v41 = vsub.f32 %v7277_v36, %v7345_v37  ;;  %13297 = vmatmul.mubr.f32.vlgmr.msra.gmra.mxu1 %v7345_v37 }
0x10e2   : > { %13305 = vmatpush3.msra.mxu1 %v7310_v31  ;;  %13306 = vmatprep.mubr.msk.f32.mxu1 %vm14259_vm0, %v14258_v0 }
0x10e3   : > { %13314 = vmatprep.subr.mxu1 %v14258_v0  ;;  %v7347_v44 = vand.u32 4294901760, %v7346_v41 }
0x10e5   : > { %13307 = vmatmul.mubr.f32.vlgmr.msra.gmra.mxu1 %v7347_v44  ;;  %v7348_v46 = vsub.f32 %v7346_v41, %v7347_v44 }
0x10e6   : > { %13315 = vmatpush3.msra.mxu1 %v7310_v31  ;;  %13316 = vmatprep.mubr.msk.f32.mxu1 %vm14259_vm0, %v14258_v0 }
0x10e7   : > { %13324 = vmatprep.subr.mxu1 %v14258_v0  ;;  %v7349_v55 = vand.u32 4294901760, %v7348_v46 }
0x10e9   : > { %13292 = vmatmul.mubr.f32.vlgmr.msra.gmra.mxu0 %v7349_v55  ;;  %13317 = vmatmul.mubr.f32.vlgmr.msra.gmra.mxu1 %v7345_v37 }
0x10ea   : > { %13300 = vmatpush3.msra.mxu0 %v7387_v7  ;;  %13325 = vmatpush3.xpose.msra.mxu1 %v7844_v56 }
0x10eb   : > { %13301 = vmatprep.mubr.msk.f32.mxu0 %vm14259_vm0, %v14258_v0  ;;  %13309 = vmatprep.subr.mxu0 %v14258_v0 }
0x10ec   : > { %13326 = vmatprep.mubr.msk.f32.mxu1 %vm14259_vm0, %v14258_v0  ;;  %13334 = vmatprep.subr.mxu1 %v14258_v0 }
0x10ed   : > { %13302 = vmatmul.mubr.f32.vlgmr.msra.gmra.mxu0 %v7346_v41  ;;  %13327 = vmatmul.mubr.f32.vlgmr.msra.gmra.mxu1 %v7799_v43 }
0x10ee   : > { %13310 = vmatpush3.msra.mxu0 %v7388_v26  ;;  %13335 = vmatpush3.xpose.msra.mxu1 %v7764_v27 }
0x10ef   : > { %13311 = vmatprep.mubr.msk.f32.mxu0 %vm14259_vm0, %v14258_v0  ;;  %13319 = vmatprep.subr.mxu0 %v14258_v0 }
0x10f0   : > { %13336 = vmatprep.mubr.msk.f32.mxu1 %vm14259_vm0, %v14258_v0  ;;  %13344 = vmatprep.subr.mxu1 %v14258_v0 }
0x10f1   : > { %13312 = vmatmul.mubr.f32.vlgmr.msra.gmra.mxu0 %v7345_v37  ;;  %13337 = vmatmul.mubr.f32.vlgmr.msra.gmra.mxu1 %v7801_v48 }
0x10f2   : > { %13320 = vmatpush3.xpose.msra.mxu0 %v7764_v27  ;;  %13345 = vmatpush3.xpose.msra.mxu1 %v7764_v27 }
0x10f3   : > { %13321 = vmatprep.mubr.msk.f32.mxu0 %vm14259_vm0, %v14258_v0  ;;  %13329 = vmatprep.subr.mxu0 %v14258_v0 }
0x10f4   : > { %13346 = vmatprep.mubr.msk.f32.mxu1 %vm14259_vm0, %v14258_v0  ;;  %13354 = vmatprep.subr.mxu1 %v14258_v0 }
0x10f5   : > { %13322 = vmatmul.mubr.f32.vlgmr.msra.gmra.mxu0 %v7803_v58  ;;  %13347 = vmatmul.mubr.f32.vlgmr.msra.gmra.mxu1 %v7799_v43 }
0x10f6   : > { %13330 = vmatpush3.xpose.msra.mxu0 %v7841_v33  ;;  %13331 = vmatprep.mubr.msk.f32.mxu0 %vm14259_vm0, %v14258_v0 }
0x10f7   : > { %13339 = vmatprep.subr.mxu0 %v14258_v0  ;;  %13356 = vmatprep.mubr.msk.f32.mxu1 %vm14259_vm0, %v14258_v0 }
0x10f9   : > { %13332 = vmatmul.mubr.f32.vlgmr.msra.gmra.mxu0 %v7800_v47 }
0x10fa   : > { %13340 = vmatpush3.xpose.msra.mxu0 %v7842_v38  ;;  %13341 = vmatprep.mubr.msk.f32.mxu0 %vm14259_vm0, %v14258_v0 }
0x10fb   : > { %13349 = vmatprep.subr.mxu0 %v14258_v0 }
0x10fd   : > { %13342 = vmatmul.mubr.f32.vlgmr.msra.gmra.mxu0 %v7799_v43 }
0x10fe   : > { %13351 = vmatprep.mubr.msk.f32.mxu0 %vm14259_vm0, %v14258_v0 }
0x11a1   : > { %v7427_v49 = vpop.f32.mrf.mxu1 }
0x11a3   : > { %v13298_v39 = vpop.f32.mrf.mxu1 }
0x11a5   : > { %v7575_v51 = vpop.f32.mrf.mxu1 }
0x11a7   : > { %v13308_v50 = vpop.f32.mrf.mxu1 }
0x11a9   : > { %v7351_v21 = vpop.f32.mrf.mxu0  ;;  %v7721_v52 = vpop.f32.mrf.mxu1 }
0x11aa   : > { %v7428_v53 = vadd.f32 %v7427_v49, %v7351_v21 }
0x11ab   : > { %v13293_v54 = vpop.f32.mrf.mxu0  ;;  %v13318_v59 = vpop.f32.mrf.mxu1 }
0x11ad   : > { %v7501_v60 = vpop.f32.mrf.mxu0  ;;  %v7881_v62 = vpop.f32.mrf.mxu1 }
0x11ae   : > { %v7502_v11 = vadd.f32 %v7501_v60, %v7428_v53 }
0x11af   : > { %v13303_v1 = vpop.f32.mrf.mxu0  ;;  %v13328_v3 = vpop.f32.mrf.mxu1 }
0x11b0   : > { %v7576_v8 = vadd.f32 %v7575_v51, %v7502_v11 }
0x11b1   : > { %v7649_v5 = vpop.f32.mrf.mxu0  ;;  %v8029_v6 = vpop.f32.mrf.mxu1 }
0x11b2   : > { %v7650_v10 = vadd.f32 %v7649_v5, %v7576_v8 }
0x11b3   : > { %v13313_v13 = vpop.f32.mrf.mxu0  ;;  %v13338_v14 = vpop.f32.mrf.mxu1 }
0x11b4   : > { %v15451_v24 = vadd.f32 %v7721_v52, %v7650_v10 }
0x11b5   : > { %v7805_v4 = vpop.f32.mrf.mxu0  ;;  %v8175_v16 = vpop.f32.mrf.mxu1 }
0x11b6   : > { %v7882_v22 = vadd.f32 %v7881_v62, %v7805_v4 }
0x11b7   : > { %v13323_v18 = vpop.f32.mrf.mxu0  ;;  %v13348_v15 = vpop.f32.mrf.mxu1 }
0x11b9   : > { %v7955_v23 = vpop.f32.mrf.mxu0 }
0x11ba   : > { %v7956_v31 = vadd.f32 %v7955_v23, %v7882_v22 }
0x11bb   : > { %v13333_v7 = vpop.f32.mrf.mxu0 }
0x11bc   : > { %v8030_v25 = vadd.f32 %v8029_v6, %v7956_v31 }
0x11bd   : > { %v8103_v26 = vpop.f32.mrf.mxu0 }
0x11be   : > { %v8104_v27 = vadd.f32 %v8103_v26, %v8030_v25 }
0x11bf   : > { %v13343_v28 = vpop.f32.mrf.mxu0 }
0x11c0   : > { %v8176_v30 = vadd.f32 %v8175_v16, %v8104_v27 }
0x11c2   : > { %v8179_v32 = vmul.f32 0.35355338, %v8176_v30 }
0x11c4   : > { %v8180_v33 = vsel %vm1590_vm2, %v8179_v32, -inf }
0x11c5   : > { %8181 = vmax.xlane.f32.xlu0 %v8180_v33 }
0x11db   : > { %8191 = vrot.lane.b32.xlu0 %v15406_v19, %s14263_s17 }
0x11df   : > { %8643 = vrot.lane.b32.xlu0 %v15363_v20, %s14264_s14 }
0x124e   : > { %v8182_v34 = vpop.xlane.xlu0 %8181 }
0x124f   : > { %v8183_v35 = vsub.f32 %v8179_v32, %v8182_v34 }
0x1251   : > { %v8184_v36 = vmul.f32 1.442695, %v8183_v35 }
0x1252   : > { %v8192_v37 = vpop.permute.xlu0 %8191 }
0x1253   : > { %13868 = vpow2.f32 %v8184_v36  ;;  %v8228_v38 = vand.u32 4294901760, %v8192_v37 }
0x1255   : > { %v8305_v40 = vsub.f32 %v8192_v37, %v8228_v38  ;;  %13350 = vmatpush3.msra.mxu0 %v8228_v38 }
0x1256   : > { %13359 = vmatprep.subr.mxu0 %v14258_v0  ;;  %v8644_v39 = vpop.permute.xlu0 %8643 }
0x1257   : > { %v8306_v41 = vand.u32 4294901760, %v8305_v40  ;;  %v8647_v21 = vsel %vm1590_vm2, %v8644_v39, 0 }
0x1258   : > { %v8717_v54 = vand.u32 4294901760, %v8647_v21 }
0x1259   : > { %v8307_v43 = vsub.f32 %v8305_v40, %v8306_v41 }
0x125a   : > { %v8718_v11 = vsub.f32 %v8647_v21, %v8717_v54 }
0x125b   : > { %v8308_v44 = vand.u32 4294901760, %v8307_v43 }
0x125c   : > { %v8719_v8 = vand.u32 4294901760, %v8718_v11 }
0x125d   : > { %13355 = vmatpush3.msra.mxu1 %v8308_v44 }
0x125e   : > { %13364 = vmatprep.subr.mxu1 %v14258_v0  ;;  %v8720_v5 = vsub.f32 %v8718_v11, %v8719_v8 }
0x1260   : > { %v13869_v45 = vpop.eup %13868  ;;  %v8721_v6 = vand.u32 4294901760, %v8720_v5 }
0x1261   : > { %v8186_v46 = vsel %vm1590_vm2, %v13869_v45, 0.0 }
0x1262   : > { %8187 = vadd.xlane.f32.xlu1 %v8186_v46 }
0x1273   : > { %8645 = vrot.lane.b32.xlu1 %v15374_v42, %s14264_s14 }
0x12eb   : > { %v8188_v47 = vpop.xlane.xlu1 %8187 }
0x12ec   : > { %13870 = vrcp.f32 %v8188_v47 }
0x12ef   : > { %v8646_v55 = vpop.permute.xlu1 %8645 }
0x12f0   : > { %v8649_v56 = vsel %vm1590_vm2, %v8646_v55, 0 }
0x12f1   : > { %v8682_v48 = vand.u32 4294901760, %v8649_v56 }
0x12f3   : > { %v8759_v58 = vsub.f32 %v8649_v56, %v8682_v48 }
0x12f5   : > { %v8760_v52 = vand.u32 4294901760, %v8759_v58 }
0x12f7   : > { %v8761_v60 = vsub.f32 %v8759_v58, %v8760_v52 }
0x12f9   : > { %v13871_v57 = vpop.eup %13870  ;;  %v8762_v3 = vand.u32 4294901760, %v8761_v60 }
0x12fa   : > { %v8190_v49 = vmul.f32 %v13871_v57, %v13869_v45 }
0x12fc   : > { %v8195_v51 = vsel %vm1590_vm2, %v8190_v49, 0 }
0x12fd   : > { %v8263_v50 = vand.u32 4294901760, %v8195_v51 }
0x12ff   : > { %v8264_v53 = vsub.f32 %v8195_v51, %v8263_v50  ;;  %13357 = vmatmul.mubr.f32.vlgmr.msra.gmra.mxu1 %v8263_v50 }
0x1300   : > { %13365 = vmatpush3.msra.mxu1 %v8228_v38  ;;  %13366 = vmatprep.mubr.msk.f32.mxu1 %vm14259_vm0, %v14258_v0 }
0x1301   : > { %13374 = vmatprep.subr.mxu1 %v14258_v0  ;;  %v8265_v59 = vand.u32 4294901760, %v8264_v53 }
0x1303   : > { %13367 = vmatmul.mubr.f32.vlgmr.msra.gmra.mxu1 %v8265_v59  ;;  %v8266_v62 = vsub.f32 %v8264_v53, %v8265_v59 }
0x1304   : > { %13375 = vmatpush3.msra.mxu1 %v8228_v38  ;;  %13376 = vmatprep.mubr.msk.f32.mxu1 %vm14259_vm0, %v14258_v0 }
0x1305   : > { %13384 = vmatprep.subr.mxu1 %v14258_v0  ;;  %v8267_v1 = vand.u32 4294901760, %v8266_v62 }
0x1307   : > { %13352 = vmatmul.mubr.f32.vlgmr.msra.gmra.mxu0 %v8267_v1  ;;  %13377 = vmatmul.mubr.f32.vlgmr.msra.gmra.mxu1 %v8263_v50 }
0x1308   : > { %13360 = vmatpush3.msra.mxu0 %v8305_v40  ;;  %13385 = vmatpush3.xpose.msra.mxu1 %v8762_v3 }
0x1309   : > { %13361 = vmatprep.mubr.msk.f32.mxu0 %vm14259_vm0, %v14258_v0  ;;  %13369 = vmatprep.subr.mxu0 %v14258_v0 }
0x130a   : > { %13386 = vmatprep.mubr.msk.f32.mxu1 %vm14259_vm0, %v14258_v0  ;;  %13394 = vmatprep.subr.mxu1 %v14258_v0 }
0x130b   : > { %13362 = vmatmul.mubr.f32.vlgmr.msra.gmra.mxu0 %v8264_v53  ;;  %13387 = vmatmul.mubr.f32.vlgmr.msra.gmra.mxu1 %v8717_v54 }
0x130c   : > { %13370 = vmatpush3.msra.mxu0 %v8306_v41  ;;  %13395 = vmatpush3.xpose.msra.mxu1 %v8682_v48 }
0x130d   : > { %13371 = vmatprep.mubr.msk.f32.mxu0 %vm14259_vm0, %v14258_v0  ;;  %13379 = vmatprep.subr.mxu0 %v14258_v0 }
0x130e   : > { %13396 = vmatprep.mubr.msk.f32.mxu1 %vm14259_vm0, %v14258_v0  ;;  %13404 = vmatprep.subr.mxu1 %v14258_v0 }
0x130f   : > { %13372 = vmatmul.mubr.f32.vlgmr.msra.gmra.mxu0 %v8263_v50  ;;  %13397 = vmatmul.mubr.f32.vlgmr.msra.gmra.mxu1 %v8719_v8 }
0x1310   : > { %13380 = vmatpush3.xpose.msra.mxu0 %v8682_v48  ;;  %13405 = vmatpush3.xpose.msra.mxu1 %v8682_v48 }
0x1311   : > { %13381 = vmatprep.mubr.msk.f32.mxu0 %vm14259_vm0, %v14258_v0  ;;  %13389 = vmatprep.subr.mxu0 %v14258_v0 }
0x1312   : > { %13406 = vmatprep.mubr.msk.f32.mxu1 %vm14259_vm0, %v14258_v0  ;;  %13414 = vmatprep.subr.mxu1 %v14258_v0 }
0x1313   : > { %13382 = vmatmul.mubr.f32.vlgmr.msra.gmra.mxu0 %v8721_v6  ;;  %13407 = vmatmul.mubr.f32.vlgmr.msra.gmra.mxu1 %v8717_v54 }
0x1314   : > { %13390 = vmatpush3.xpose.msra.mxu0 %v8759_v58  ;;  %13391 = vmatprep.mubr.msk.f32.mxu0 %vm14259_vm0, %v14258_v0 }
0x1315   : > { %13399 = vmatprep.subr.mxu0 %v14258_v0  ;;  %13416 = vmatprep.mubr.msk.f32.mxu1 %vm14259_vm0, %v14258_v0 }
0x1317   : > { %13392 = vmatmul.mubr.f32.vlgmr.msra.gmra.mxu0 %v8718_v11 }
0x1318   : > { %13400 = vmatpush3.xpose.msra.mxu0 %v8760_v52  ;;  %13401 = vmatprep.mubr.msk.f32.mxu0 %vm14259_vm0, %v14258_v0 }
0x1319   : > { %13409 = vmatprep.subr.mxu0 %v14258_v0 }
0x131b   : > { %13402 = vmatmul.mubr.f32.vlgmr.msra.gmra.mxu0 %v8717_v54 }
0x131c   : > { %13411 = vmatprep.mubr.msk.f32.mxu0 %vm14259_vm0, %v14258_v0 }
0x13bf   : > { %v8345_v10 = vpop.f32.mrf.mxu1 }
0x13c1   : > { %v13358_v13 = vpop.f32.mrf.mxu1 }
0x13c3   : > { %v8493_v14 = vpop.f32.mrf.mxu1 }
0x13c5   : > { %v13368_v4 = vpop.f32.mrf.mxu1 }
0x13c7   : > { %v8269_v16 = vpop.f32.mrf.mxu0  ;;  %v8639_v18 = vpop.f32.mrf.mxu1 }
0x13c8   : > { %v8346_v15 = vadd.f32 %v8345_v10, %v8269_v16 }
0x13c9   : > { %v13353_v22 = vpop.f32.mrf.mxu0  ;;  %v13378_v23 = vpop.f32.mrf.mxu1 }
0x13cb   : > { %v8419_v31 = vpop.f32.mrf.mxu0  ;;  %v8799_v7 = vpop.f32.mrf.mxu1 }
0x13cc   : > { %v8420_v25 = vadd.f32 %v8419_v31, %v8346_v15 }
0x13cd   : > { %v13363_v26 = vpop.f32.mrf.mxu0  ;;  %v13388_v27 = vpop.f32.mrf.mxu1 }
0x13ce   : > { %v8494_v28 = vadd.f32 %v8493_v14, %v8420_v25 }
0x13cf   : > { %v8567_v30 = vpop.f32.mrf.mxu0  ;;  %v8947_v32 = vpop.f32.mrf.mxu1 }
0x13d0   : > { %v8568_v33 = vadd.f32 %v8567_v30, %v8494_v28 }
0x13d1   : > { %v13373_v34 = vpop.f32.mrf.mxu0  ;;  %v13398_v35 = vpop.f32.mrf.mxu1 }
0x13d2   : > { %v15500_v36 = vadd.f32 %v8639_v18, %v8568_v33 }
0x13d3   : > { %v8723_v37 = vpop.f32.mrf.mxu0  ;;  %v9093_v38 = vpop.f32.mrf.mxu1 }
0x13d4   : > { %v8800_v43 = vadd.f32 %v8799_v7, %v8723_v37 }
0x13d5   : > { %v13383_v40 = vpop.f32.mrf.mxu0  ;;  %v13408_v41 = vpop.f32.mrf.mxu1 }
0x13d7   : > { %v8873_v44 = vpop.f32.mrf.mxu0 }
0x13d8   : > { %v8874_v45 = vadd.f32 %v8873_v44, %v8800_v43 }
0x13d9   : > { %v13393_v46 = vpop.f32.mrf.mxu0 }
0x13da   : > { %v8948_v47 = vadd.f32 %v8947_v32, %v8874_v45 }
0x13db   : > { %v9021_v55 = vpop.f32.mrf.mxu0 }
0x13dc   : > { %v9022_v56 = vadd.f32 %v9021_v55, %v8948_v47 }
0x13dd   : > { %v13403_v48 = vpop.f32.mrf.mxu0 }
0x13de   : > { %v9094_v57 = vadd.f32 %v9093_v38, %v9022_v56 }
0x13e0   : > { %v9097_v58 = vmul.f32 0.35355338, %v9094_v57 }
0x13e2   : > { %v9098_v49 = vsel %vm1590_vm2, %v9097_v58, -inf }
0x13e3   : > { %9099 = vmax.xlane.f32.xlu1 %v9098_v49 }
0x13f4   : > { %9563 = vrot.lane.b32.xlu1 %v15374_v42, %s14265_s3 }
0x13f8   : > { %9561 = vrot.lane.b32.xlu1 %v15363_v20, %s14265_s3  ;;  %s12254_s3 = sshll.u32 %s14358_s27, 7  ;;  %s14162_s27 = scalar_lea.vmem %s14161_s10, 256 }
0x146c   : > { %v9100_v39 = vpop.xlane.xlu1 %9099 }
0x146d   : > { %v9101_v51 = vsub.f32 %v9097_v58, %v9100_v39 }
0x146f   : > { %v9102_v50 = vmul.f32 1.442695, %v9101_v51 }
0x1470   : > { %v9564_v59 = vpop.permute.xlu1 %9563 }
0x1471   : > { %13872 = vpow2.f32 %v9102_v50  ;;  %v9567_v20 = vsel %vm1590_vm2, %v9564_v59, 0 }
0x1472   : > { %v9600_v11 = vand.u32 4294901760, %v9567_v20 }
0x1474   : > { %v9677_v5 = vsub.f32 %v9567_v20, %v9600_v11  ;;  %v9562_v10 = vpop.permute.xlu1 %9561 }
0x1475   : > { %v9565_v16 = vsel %vm1590_vm2, %v9562_v10, 0 }
0x1476   : > { %v9678_v4 = vand.u32 4294901760, %v9677_v5  ;;  %v9635_v15 = vand.u32 4294901760, %v9565_v16 }
0x1478   : > { %v9679_v23 = vsub.f32 %v9677_v5, %v9678_v4  ;;  %v9636_v7 = vsub.f32 %v9565_v16, %v9635_v15 }
0x147a   : > { %v9680_v26 = vand.u32 4294901760, %v9679_v23  ;;  %v9637_v27 = vand.u32 4294901760, %v9636_v7 }
0x147c   : > { %v9638_v28 = vsub.f32 %v9636_v7, %v9637_v27 }
0x147e   : > { %v13873_v21 = vpop.eup %13872  ;;  %v9639_v30 = vand.u32 4294901760, %v9638_v28 }
0x147f   : > { %v9104_v52 = vsel %vm1590_vm2, %v13873_v21, 0.0 }
0x1480   : > { %9105 = vadd.xlane.f32.xlu0 %v9104_v52 }
0x1496   : > { %9109 = vrot.lane.b32.xlu0 %v15406_v19, %s14266_s7  ;;  %s581_s7 = scalar_lea.vmem [#allocation19], %s14586_s8 }
0x1509   : > { %v9106_v53 = vpop.xlane.xlu0 %9105 }
0x150a   : > { %13874 = vrcp.f32 %v9106_v53 }
0x150d   : > { %v9110_v54 = vpop.permute.xlu0 %9109 }
0x150e   : > { %v9146_v60 = vand.u32 4294901760, %v9110_v54 }
0x1510   : > { %v9223_v42 = vsub.f32 %v9110_v54, %v9146_v60  ;;  %13410 = vmatpush3.msra.mxu0 %v9146_v60 }
0x1511   : > { %13419 = vmatprep.subr.mxu0 %v14258_v0 }
0x1512   : > { %v9224_v62 = vand.u32 4294901760, %v9223_v42 }
0x1514   : > { %v9225_v1 = vsub.f32 %v9223_v42, %v9224_v62 }
0x1516   : > { %v9226_v3 = vand.u32 4294901760, %v9225_v1 }
0x1517   : > { %v13875_v8 = vpop.eup %13874 }
0x1518   : > { %13415 = vmatpush3.msra.mxu1 %v9226_v3  ;;  %v9108_v6 = vmul.f32 %v13875_v8, %v13873_v21 }
0x1519   : > { %13424 = vmatprep.subr.mxu1 %v14258_v0 }
0x151a   : > { %v9113_v13 = vsel %vm1590_vm2, %v9108_v6, 0 }
0x151b   : > { %v9181_v14 = vand.u32 4294901760, %v9113_v13 }
0x151d   : > { %v9182_v18 = vsub.f32 %v9113_v13, %v9181_v14  ;;  %13417 = vmatmul.mubr.f32.vlgmr.msra.gmra.mxu1 %v9181_v14 }
0x151e   : > { %13425 = vmatpush3.msra.mxu1 %v9146_v60  ;;  %13426 = vmatprep.mubr.msk.f32.mxu1 %vm14259_vm0, %v14258_v0 }
0x151f   : > { %13434 = vmatprep.subr.mxu1 %v14258_v0  ;;  %v9183_v22 = vand.u32 4294901760, %v9182_v18 }
0x1521   : > { %13427 = vmatmul.mubr.f32.vlgmr.msra.gmra.mxu1 %v9183_v22  ;;  %v9184_v31 = vsub.f32 %v9182_v18, %v9183_v22 }
0x1522   : > { %13435 = vmatpush3.msra.mxu1 %v9146_v60  ;;  %13436 = vmatprep.mubr.msk.f32.mxu1 %vm14259_vm0, %v14258_v0 }
0x1523   : > { %13444 = vmatprep.subr.mxu1 %v14258_v0  ;;  %v9185_v25 = vand.u32 4294901760, %v9184_v31 }
0x1525   : > { %13412 = vmatmul.mubr.f32.vlgmr.msra.gmra.mxu0 %v9185_v25  ;;  %13437 = vmatmul.mubr.f32.vlgmr.msra.gmra.mxu1 %v9181_v14 }
0x1526   : > { %13420 = vmatpush3.msra.mxu0 %v9223_v42  ;;  %13445 = vmatpush3.xpose.msra.mxu1 %v9680_v26 }
0x1527   : > { %13421 = vmatprep.mubr.msk.f32.mxu0 %vm14259_vm0, %v14258_v0  ;;  %13429 = vmatprep.subr.mxu0 %v14258_v0 }
0x1528   : > { %13446 = vmatprep.mubr.msk.f32.mxu1 %vm14259_vm0, %v14258_v0  ;;  %13454 = vmatprep.subr.mxu1 %v14258_v0 }
0x1529   : > { %13422 = vmatmul.mubr.f32.vlgmr.msra.gmra.mxu0 %v9182_v18  ;;  %13447 = vmatmul.mubr.f32.vlgmr.msra.gmra.mxu1 %v9635_v15 }
0x152a   : > { %13430 = vmatpush3.msra.mxu0 %v9224_v62  ;;  %13455 = vmatpush3.xpose.msra.mxu1 %v9600_v11 }
0x152b   : > { %13431 = vmatprep.mubr.msk.f32.mxu0 %vm14259_vm0, %v14258_v0  ;;  %13439 = vmatprep.subr.mxu0 %v14258_v0 }
0x152c   : > { %13456 = vmatprep.mubr.msk.f32.mxu1 %vm14259_vm0, %v14258_v0  ;;  %13464 = vmatprep.subr.mxu1 %v14258_v0 }
0x152d   : > { %13432 = vmatmul.mubr.f32.vlgmr.msra.gmra.mxu0 %v9181_v14  ;;  %13457 = vmatmul.mubr.f32.vlgmr.msra.gmra.mxu1 %v9637_v27 }
0x152e   : > { %13440 = vmatpush3.xpose.msra.mxu0 %v9600_v11  ;;  %13465 = vmatpush3.xpose.msra.mxu1 %v9600_v11 }
0x152f   : > { %13441 = vmatprep.mubr.msk.f32.mxu0 %vm14259_vm0, %v14258_v0  ;;  %13449 = vmatprep.subr.mxu0 %v14258_v0 }
0x1530   : > { %13466 = vmatprep.mubr.msk.f32.mxu1 %vm14259_vm0, %v14258_v0  ;;  %13474 = vmatprep.subr.mxu1 %v14258_v0 }
0x1531   : > { %13442 = vmatmul.mubr.f32.vlgmr.msra.gmra.mxu0 %v9639_v30  ;;  %13467 = vmatmul.mubr.f32.vlgmr.msra.gmra.mxu1 %v9635_v15 }
0x1532   : > { %13450 = vmatpush3.xpose.msra.mxu0 %v9677_v5  ;;  %13451 = vmatprep.mubr.msk.f32.mxu0 %vm14259_vm0, %v14258_v0 }
0x1533   : > { %13459 = vmatprep.subr.mxu0 %v14258_v0  ;;  %13476 = vmatprep.mubr.msk.f32.mxu1 %vm14259_vm0, %v14258_v0 }
0x1535   : > { %13452 = vmatmul.mubr.f32.vlgmr.msra.gmra.mxu0 %v9636_v7 }
0x1536   : > { %13460 = vmatpush3.xpose.msra.mxu0 %v9678_v4  ;;  %13461 = vmatprep.mubr.msk.f32.mxu0 %vm14259_vm0, %v14258_v0 }
0x1537   : > { %13469 = vmatprep.subr.mxu0 %v14258_v0 }
0x1539   : > { %13462 = vmatmul.mubr.f32.vlgmr.msra.gmra.mxu0 %v9635_v15 }
0x153a   : > { %13471 = vmatprep.mubr.msk.f32.mxu0 %vm14259_vm0, %v14258_v0 }
0x15dd   : > { %v9263_v32 = vpop.f32.mrf.mxu1 }
0x15df   : > { %v13418_v33 = vpop.f32.mrf.mxu1 }
0x15e0   : > { %v5813_v33 = vld [vmem:[#allocation14 + $0x18] sm:$0xff] }
0x15e1   : > { %v9411_v34 = vpop.f32.mrf.mxu1 }
0x15e3   : > { %v13428_v35 = vpop.f32.mrf.mxu1 }
0x15e4   : > { %v15575_v35 = vand.u32 4294901760, %v5813_v33 }
0x15e5   : > { %v9187_v37 = vpop.f32.mrf.mxu0  ;;  %v9557_v38 = vpop.f32.mrf.mxu1 }
0x15e6   : > { %v9264_v11 = vadd.f32 %v9263_v32, %v9187_v37 }
0x15e7   : > { %v13413_v40 = vpop.f32.mrf.mxu0  ;;  %v13438_v41 = vpop.f32.mrf.mxu1 }
0x15e9   : > { %v9337_v43 = vpop.f32.mrf.mxu0  ;;  %v9717_v44 = vpop.f32.mrf.mxu1 }
0x15ea   : > { %v9338_v1 = vadd.f32 %v9337_v43, %v9264_v11 }
0x15eb   : > { %v13423_v45 = vpop.f32.mrf.mxu0  ;;  %v13448_v46 = vpop.f32.mrf.mxu1 }
0x15ec   : > { %v9412_v3 = vadd.f32 %v9411_v34, %v9338_v1  ;;  %v5812_v34 = vld [vmem:[#allocation14 + $0x10] sm:$0xff] }
0x15ed   : > { %v9485_v47 = vpop.f32.mrf.mxu0  ;;  %v9865_v55 = vpop.f32.mrf.mxu1  ;;  %v15577_v37 = vand.u32 4294901760, %v5812_v34 }
0x15ee   : > { %v9486_v8 = vadd.f32 %v9485_v47, %v9412_v3 }
0x15ef   : > { %v13433_v56 = vpop.f32.mrf.mxu0  ;;  %v13458_v48 = vpop.f32.mrf.mxu1  ;;  %v15583_v40 = vsub.f32 %v5812_v34, %v15577_v37 }
0x15f0   : > { %v9558_v5 = vadd.f32 %v9557_v38, %v9486_v8  ;;  %v15580_v38 = vsub.f32 %v5813_v33, %v15575_v35 }
0x15f1   : > { %v9641_v57 = vpop.f32.mrf.mxu0  ;;  %v10011_v58 = vpop.f32.mrf.mxu1  ;;  %v10614_v43 = vand.u32 4294901760, %v15583_v40 }
0x15f2   : > { %v9718_v51 = vadd.f32 %v9717_v44, %v9641_v57  ;;  %v10607_v41 = vand.u32 4294901760, %v15580_v38  ;;  %v5810_v57 = vld [vmem:[#allocation14] sm:$0xff] }
0x15f3   : > { %v13443_v49 = vpop.f32.mrf.mxu0  ;;  %v13468_v39 = vpop.f32.mrf.mxu1  ;;  %v10615_v45 = vsub.f32 %v15583_v40, %v10614_v43 }
0x15f4   : > { %v10608_v44 = vsub.f32 %v15580_v38, %v10607_v41  ;;  %v15604_v49 = vand.u32 4294901760, %v5810_v57 }
0x15f5   : > { %v9791_v50 = vpop.f32.mrf.mxu0  ;;  %v10616_v47 = vand.u32 4294901760, %v10615_v45 }
0x15f6   : > { %v9792_v21 = vadd.f32 %v9791_v50, %v9718_v51  ;;  %v10609_v46 = vand.u32 4294901760, %v10608_v44  ;;  %v15610_v50 = vsub.f32 %v5810_v57, %v15604_v49 }
0x15f7   : > { %v13453_v52 = vpop.f32.mrf.mxu0 }
0x15f8   : > { %v9866_v53 = vadd.f32 %v9865_v55, %v9792_v21  ;;  %v5811_v55 = vld [vmem:[#allocation14 + $0x8] sm:$0xff] }
0x15f9   : > { %v9939_v54 = vpop.f32.mrf.mxu0  ;;  %v15599_v56 = vand.u32 4294901760, %v5811_v55 }
0x15fa   : > { %v9940_v59 = vadd.f32 %v9939_v54, %v9866_v53  ;;  %v10628_v53 = vand.u32 4294901760, %v15610_v50 }
0x15fb   : > { %v13463_v60 = vpop.f32.mrf.mxu0 }
0x15fc   : > { %v10012_v42 = vadd.f32 %v10011_v58, %v9940_v59  ;;  %v15602_v58 = vsub.f32 %v5811_v55, %v15599_v56  ;;  %v10629_v60 = vsub.f32 %v15610_v50, %v10628_v53 }
0x15fe   : > { %v10015_v20 = vmul.f32 0.35355338, %v10012_v42  ;;  %v10621_v51 = vand.u32 4294901760, %v15602_v58 }
0x1600   : > { %v10016_v62 = vsel %vm1590_vm2, %v10015_v20, -inf  ;;  %v10622_v52 = vsub.f32 %v15602_v58, %v10621_v51 }
0x1601   : > { %10017 = vmax.xlane.f32.xlu0 %v10016_v62  ;;  %v10630_v62 = vand.u32 4294901760, %v10629_v60  ;;  %v11018_v60 = vld [vmem:[#allocation16 + $0x10] sm:$0xff] }
0x1602   : > { %v10623_v59 = vand.u32 4294901760, %v10622_v52 }
0x1617   : > { %10027 = vrot.lane.b32.xlu0 %v15406_v19, %s14267_s15  ;;  %s12056_s15 = sshll.u32 %s581_s7, 4  ;;  %s12057_s15 = int_to_ptr.vmem [resolvable:$true] %s12056_s15 }
0x1618   : > { %s14156_s18 = scalar_lea.vmem %s12057_s15, 128  ;;  %p14163_p3 = scmp.lt.s32.totalorder %s12057_s15, %s14161_s10 }
0x1619   : > { %p14157_p1 = scmp.ne.s32.totalorder %s12057_s15, %s14156_s18  ;;  %p14164_p7 = scmp.lt.s32.totalorder %s14162_s27, %s14156_s18 }
0x161b   : > { %10484 = vrot.lane.b32.xlu0 %v9558_v5, %s14268_s30  ;;  %p14158_p6 = pnand %p14157_p1, %p15988_p4  ;;  %p14165_p8 = por %p14164_p7, %p14163_p3 }
0x161d   : > { %p14159_p11 = pneg %p14158_p6 }
0x161f   : > { %p14166_p10 = pnand %p14165_p8, %p14159_p11 }
0x168a   : > { %v10018_v6 = vpop.xlane.xlu0 %10017 }
0x168b   : > { %v10019_v10 = vsub.f32 %v10015_v20, %v10018_v6 }
0x168d   : > { %v10020_v13 = vmul.f32 1.442695, %v10019_v10 }
0x168e   : > { %v10028_v14 = vpop.permute.xlu0 %10027 }
0x168f   : > { %13876 = vpow2.f32 %v10020_v13  ;;  %v10064_v4 = vand.u32 4294901760, %v10028_v14 }
0x1691   : > { %v10141_v16 = vsub.f32 %v10028_v14, %v10064_v4  ;;  %13470 = vmatpush3.msra.mxu0 %v10064_v4 }
0x1692   : > { %13479 = vmatprep.subr.mxu0 %v14258_v0 }
0x1693   : > { %v10142_v18 = vand.u32 4294901760, %v10141_v16 }
0x1695   : > { %v10143_v15 = vsub.f32 %v10141_v16, %v10142_v18 }
0x1697   : > { %v10144_v22 = vand.u32 4294901760, %v10143_v15 }
0x1699   : > { %13475 = vmatpush3.msra.mxu1 %v10144_v22  ;;  %v10485_v22 = vpop.permute.xlu0 %10484 }
0x169a   : > { %13484 = vmatprep.subr.mxu1 %v14258_v0 }
0x169c   : > { %v13877_v19 = vpop.eup %13876 }
0x169d   : > { %v10022_v23 = vsel %vm1590_vm2, %v13877_v19, 0.0 }
0x169e   : > { %10023 = vadd.xlane.f32.xlu1 %v10022_v23 }
0x16af   : > { %10480 = vrot.lane.b32.xlu1 %v15500_v36, %s14269_s13 }
0x1727   : > { %v10024_v31 = vpop.xlane.xlu1 %10023 }
0x1728   : > { %13878 = vrcp.f32 %v10024_v31 }
0x1735   : > { %v13879_v7 = vpop.eup %13878 }
0x1736   : > { %v10026_v25 = vmul.f32 %v13879_v7, %v13877_v19 }
0x1738   : > { %v10031_v26 = vsel %vm1590_vm2, %v10026_v25, 0 }
0x1739   : > { %v10099_v27 = vand.u32 4294901760, %v10031_v26 }
0x173b   : > { %v10100_v28 = vsub.f32 %v10031_v26, %v10099_v27  ;;  %13477 = vmatmul.mubr.f32.vlgmr.msra.gmra.mxu1 %v10099_v27 }
0x173c   : > { %13485 = vmatpush3.msra.mxu1 %v10064_v4  ;;  %13486 = vmatprep.mubr.msk.f32.mxu1 %vm14259_vm0, %v14258_v0 }
0x173d   : > { %13494 = vmatprep.subr.mxu1 %v14258_v0  ;;  %v10101_v30 = vand.u32 4294901760, %v10100_v28 }
0x173f   : > { %13487 = vmatmul.mubr.f32.vlgmr.msra.gmra.mxu1 %v10101_v30  ;;  %v10102_v32 = vsub.f32 %v10100_v28, %v10101_v30 }
0x1740   : > { %13495 = vmatpush3.msra.mxu1 %v10064_v4  ;;  %13496 = vmatprep.mubr.msk.f32.mxu1 %vm14259_vm0, %v14258_v0 }
0x1741   : > { %v10103_v36 = vand.u32 4294901760, %v10102_v32  ;;  %13510 = vmatprep.subr.mxu1 %v14258_v0 }
0x1743   : > { %13472 = vmatmul.mubr.f32.vlgmr.msra.gmra.mxu0 %v10103_v36  ;;  %13497 = vmatmul.mubr.f32.vlgmr.msra.gmra.mxu1 %v10099_v27  ;;  %v10496_v36 = vsub.s32 7, %v14807_v63 }
0x1744   : > { %13480 = vmatpush3.msra.mxu0 %v10141_v16  ;;  %13481 = vmatprep.mubr.msk.f32.mxu0 %vm14259_vm0, %v14258_v0 }
0x1745   : > { %13489 = vmatprep.subr.mxu0 %v14258_v0  ;;  %13518 = vmatprep.mubr.msk.f32.mxu1 %vm14259_vm0, %v14258_v0 }
0x1746   : > { %13511 = vmatpush3.msra.mxu1 %v10609_v46 }
0x1747   : > { %13482 = vmatmul.mubr.f32.vlgmr.msra.gmra.mxu0 %v10100_v28  ;;  %13512 = vmatprep.subr.mxu1 %v14258_v0 }
0x1748   : > { %13490 = vmatpush3.msra.mxu0 %v10142_v18  ;;  %13491 = vmatprep.mubr.msk.f32.mxu0 %vm14259_vm0, %v14258_v0  ;;  %v10481_v18 = vpop.permute.xlu1 %10480 }
0x1749   : > { %13499 = vmatprep.subr.mxu0 %v14258_v0  ;;  %13513 = vmatpush3.msra.mxu1 %v10616_v47  ;;  %v10491_v15 = vsel %vm1590_vm2, %v15451_v24, %v10481_v18 }
0x174a   : > { %13514 = vmatprep.subr.mxu1 %v14258_v0  ;;  %v10492_v19 = vsel %vm5275_vm3, %v10491_v15, %v10485_v22 }
0x174b   : > { %13492 = vmatmul.mubr.f32.vlgmr.msra.gmra.mxu0 %v10099_v27  ;;  %13515 = vmatpush3.msra.mxu1 %v10623_v59  ;;  %v11019_v59 = vld [vmem:[#allocation16 + $0x18] sm:$0xff] }
0x174c   : > { %13507 = vmatprep.mubr.msk.f32.mxu0 %vm14259_vm0, %v14258_v0  ;;  %13500 = vmatpush3.msra.mxu0 %v15575_v35 }
0x174d   : > { %13501 = vmatprep.subr.mxu0 %v14258_v0  ;;  %13516 = vmatprep.subr.mxu1 %v14258_v0 }
0x174e   : > { %13502 = vmatpush3.msra.mxu0 %v15577_v37  ;;  %13517 = vmatpush3.msra.mxu1 %v10630_v62  ;;  %v15686_v62 = vand.u32 4294901760, %v11018_v60 }
0x174f   : > { %13503 = vmatprep.subr.mxu0 %v14258_v0  ;;  %13532 = vmatprep.subr.mxu1 %v14258_v0 }
0x1750   : > { %13504 = vmatpush3.msra.mxu0 %v15599_v56 }
0x1751   : > { %13505 = vmatprep.subr.mxu0 %v14258_v0 }
0x1752   : > { %13506 = vmatpush3.msra.mxu0 %v15604_v49 }
0x1753   : > { %13521 = vmatprep.subr.mxu0 %v14258_v0 }
0x17fb   : > { %v10181_v48 = vpop.f32.mrf.mxu1 }
0x17fd   : > { %v13478_v39 = vpop.f32.mrf.mxu1 }
0x17ff   : > { %v10329_v21 = vpop.f32.mrf.mxu1 }
0x1801   : > { %v13488_v54 = vpop.f32.mrf.mxu1 }
0x1803   : > { %v10105_v42 = vpop.f32.mrf.mxu0  ;;  %v10475_v20 = vpop.f32.mrf.mxu1 }
0x1804   : > { %v10182_v3 = vadd.f32 %v10181_v48, %v10105_v42  ;;  %v11017_v42 = vld [vmem:[#allocation16 + $0x8] sm:$0xff] }
0x1805   : > { %v13473_v11 = vpop.f32.mrf.mxu0  ;;  %v13498_v1 = vpop.f32.mrf.mxu1 }
0x1806   : > { %v15688_v11 = vand.u32 4294901760, %v11017_v42 }
0x1807   : > { %v10255_v8 = vpop.f32.mrf.mxu0 }
0x1808   : > { %v10256_v5 = vadd.f32 %v10255_v8, %v10182_v3  ;;  %v15696_v8 = vsub.f32 %v11018_v60, %v15686_v62 }
0x1809   : > { %v13483_v6 = vpop.f32.mrf.mxu0 }
0x180a   : > { %v10330_v10 = vadd.f32 %v10329_v21, %v10256_v5  ;;  %v15699_v5 = vsub.f32 %v11017_v42, %v15688_v11 }
0x180b   : > { %v10403_v13 = vpop.f32.mrf.mxu0 }
0x180c   : > { %v10404_v14 = vadd.f32 %v10403_v13, %v10330_v10  ;;  %v11143_v13 = vand.u32 4294901760, %v15696_v8 }
0x180d   : > { %v13493_v4 = vpop.f32.mrf.mxu0 }
0x180e   : > { %v10476_v16 = vadd.f32 %v10475_v20, %v10404_v14  ;;  %v15684_v20 = vand.u32 4294901760, %v11019_v59  ;;  %v11150_v14 = vand.u32 4294901760, %v15699_v5  ;;  %v11144_v18 = vsub.f32 %v15696_v8, %v11143_v13 }
0x1810   : > { %10488 = vrot.lane.b32.xlu1 %v10476_v16, %s14270_s4  ;;  %v15693_v3 = vsub.f32 %v11019_v59, %v15684_v20  ;;  %v11151_v15 = vsub.f32 %v15699_v5, %v11150_v14  ;;  %s12054_s4 = scalar_lea.hbm %s15946_s12, %s12254_s3 }
0x1812   : > { %v11136_v10 = vand.u32 4294901760, %v15693_v3 }
0x1814   : > { %v11137_v16 = vsub.f32 %v15693_v3, %v11136_v10 }
0x1816   : > { %v11138_v22 = vand.u32 4294901760, %v11137_v16 }
0x1882   : > { %v10489_v23 = vpop.permute.xlu1 %10488 }
0x1883   : > { %v10493_v31 = vsel %vm5277_vm4, %v10492_v19, %v10489_v23  ;;  %v11145_v19 = vand.u32 4294901760, %v11144_v18 }
0x1884   : > { %v10499_v7 = vsel %vm602_vm1, %v10493_v31, 0  ;;  %v11152_v31 = vand.u32 4294901760, %v11151_v15 }
0x1885   : > { %v10570_v25 = vand.u32 4294901760, %v10499_v7 }
0x1887   : > { %v10571_v26 = vsub.f32 %v10499_v7, %v10570_v25  ;;  %13519 = vmatmul.mubr.f32.vlgmr.msra.gmra.mxu1 %v10570_v25 }
0x1888   : > { %13533 = vmatpush3.msra.mxu1 %v15575_v35  ;;  %13540 = vmatprep.mubr.msk.f32.mxu1 %vm14259_vm0, %v14258_v0 }
0x1889   : > { %v10572_v27 = vand.u32 4294901760, %v10571_v26  ;;  %13534 = vmatprep.subr.mxu1 %v14258_v0 }
0x188a   : > { %13535 = vmatpush3.msra.mxu1 %v15577_v37 }
0x188b   : > { %v10573_v24 = vsub.f32 %v10571_v26, %v10572_v27  ;;  %13536 = vmatprep.subr.mxu1 %v14258_v0 }
0x188c   : > { %13537 = vmatpush3.msra.mxu1 %v15599_v56 }
0x188d   : > { %v10574_v28 = vand.u32 4294901760, %v10573_v24  ;;  %13538 = vmatprep.subr.mxu1 %v14258_v0 }
0x188e   : > { %13539 = vmatpush3.msra.mxu1 %v15604_v49 }
0x188f   : > { %13541 = vmatmul.mubr.f32.vlgmr.msra.gmra.mxu1 %v10572_v27  ;;  %13554 = vmatprep.subr.mxu1 %v14258_v0 }
0x1890   : > { %13508 = vmatmul.mubr.f32.vlgmr.msra.gmra.mxu0 %v10574_v28  ;;  %13555 = vmatpush3.msra.mxu1 %v15575_v35 }
0x1891   : > { %13522 = vmatpush3.msra.mxu0 %v15580_v38  ;;  %13556 = vmatprep.subr.mxu1 %v14258_v0 }
0x1892   : > { %13523 = vmatprep.subr.mxu0 %v14258_v0  ;;  %13557 = vmatpush3.msra.mxu1 %v15577_v37  ;;  %v13890_v37 = vld [vmem:[%s15945_s11] sm:$0xff] }
0x1893   : > { %13524 = vmatpush3.msra.mxu0 %v15583_v40  ;;  %13558 = vmatprep.subr.mxu1 %v14258_v0  ;;  %v10497_v38 = vrot.slane %v13890_v37, %v10496_v36  ;;  %v15735_v36 = vld [vmem:[%s15945_s11 + $0x8] sm:$0x7f] }
0x1894   : > { %13525 = vmatprep.subr.mxu0 %v14258_v0  ;;  %13559 = vmatpush3.msra.mxu1 %v15599_v56 }
0x1895   : > { %13526 = vmatpush3.msra.mxu0 %v15602_v58  ;;  %13560 = vmatprep.subr.mxu1 %v14258_v0 }
0x1896   : > { %13527 = vmatprep.subr.mxu0 %v14258_v0  ;;  %13529 = vmatprep.mubr.msk.f32.mxu0 %vm14259_vm0, %v14258_v0 }
0x1897   : > { %13528 = vmatpush3.msra.mxu0 %v15610_v50  ;;  %13561 = vmatpush3.msra.mxu1 %v15604_v49 }
0x1898   : > { %13562 = vmatprep.mubr.msk.f32.mxu1 %vm14259_vm0, %v14258_v0  ;;  %13530 = vmatmul.mubr.f32.vlgmr.msra.gmra.mxu0 %v10571_v26 }
0x1899   : > { %13543 = vmatprep.subr.mxu0 %v14258_v0  ;;  %13563 = vmatmul.mubr.f32.vlgmr.msra.gmra.mxu1 %v10570_v25 }
0x189a   : > { %13544 = vmatpush3.msra.mxu0 %v10607_v41  ;;  %13551 = vmatprep.mubr.msk.f32.mxu0 %vm14259_vm0, %v14258_v0 }
0x189b   : > { %13545 = vmatprep.subr.mxu0 %v14258_v0  ;;  %13576 = vmatprep.subr.mxu1 %v14258_v0 }
0x189c   : > { %13546 = vmatpush3.msra.mxu0 %v10614_v43  ;;  %13584 = vmatprep.mubr.msk.f32.mxu1 %vm14259_vm0, %v14258_v0 }
0x189d   : > { %13547 = vmatprep.subr.mxu0 %v14258_v0  ;;  %13577 = vmatpush3.msra.mxu1 %v11138_v22 }
0x189e   : > { %13548 = vmatpush3.msra.mxu0 %v10621_v51  ;;  %13578 = vmatprep.subr.mxu1 %v14258_v0 }
0x189f   : > { %13549 = vmatprep.subr.mxu0 %v14258_v0  ;;  %13579 = vmatpush3.msra.mxu1 %v11145_v19 }
0x18a0   : > { %13550 = vmatpush3.msra.mxu0 %v10628_v53  ;;  %13580 = vmatprep.subr.mxu1 %v14258_v0 }
0x18a1   : > { %13552 = vmatmul.mubr.f32.vlgmr.msra.gmra.mxu0 %v10570_v25  ;;  %13565 = vmatprep.subr.mxu0 %v14258_v0 }
0x18a2   : > { %13573 = vmatprep.mubr.msk.f32.mxu0 %vm14259_vm0, %v14258_v0  ;;  %13566 = vmatpush3.msra.mxu0 %v15684_v20 }
0x18a3   : > { %13567 = vmatprep.subr.mxu0 %v14258_v0  ;;  %13581 = vmatpush3.msra.mxu1 %v11152_v31 }
0x18a4   : > { %13568 = vmatpush3.msra.mxu0 %v15686_v62  ;;  %13582 = vmatprep.subr.mxu1 %v14258_v0 }
0x18a5   : > { %13569 = vmatprep.subr.mxu0 %v14258_v0 }
0x18a6   : > { %13570 = vmatpush3.msra.mxu0 %v15688_v11 }
0x18a7   : > { %13571 = vmatprep.subr.mxu0 %v14258_v0 }
0x1947   : > { %v10667_v30 = vpop.f32.mrf.mxu1 }
0x1949   : > { %v13520_v32 = vpop.f32.mrf.mxu1 }
0x194f   : > { %v10824_v33 = vpop.f32.mrf.mxu1 }
0x1950   : > { %v10576_v34 = vpop.f32.mrf.mxu0 }
0x1951   : > { %v13542_v35 = vpop.f32.mrf.mxu1  ;;  %v10577_v41 = vadd.f32 %v10576_v34, %v10497_v38 }
0x1952   : > { %v13509_v40 = vpop.f32.mrf.mxu0  ;;  %v11014_v35 = vrot.slane %v15735_v36, %v5816_v61 }
0x1953   : > { %v10668_v45 = vadd.f32 %v10667_v30, %v10577_v41 }
0x1958   : > { %v10747_v43 = vpop.f32.mrf.mxu0 }
0x1959   : > { %v10982_v44 = vpop.f32.mrf.mxu1  ;;  %v10748_v55 = vadd.f32 %v10747_v43, %v10668_v45 }
0x195a   : > { %v13531_v46 = vpop.f32.mrf.mxu0 }
0x195b   : > { %v13564_v47 = vpop.f32.mrf.mxu1  ;;  %v10825_v56 = vadd.f32 %v10824_v33, %v10748_v55  ;;  %v11009_v33 = vrot.slane %v15735_v36, %v5281_v12  ;;  %v11519_v46 = vld [vmem:[#allocation17 + $0x18] sm:$0xff]  ;;  %v11518_v55 = vld [vmem:[#allocation17 + $0x10] sm:$0xff] }
0x195c   : > { %v15792_v47 = vand.u32 4294901760, %v11519_v46 }
0x1961   : > { %v10907_v48 = vpop.f32.mrf.mxu0 }
0x1962   : > { %v10908_v57 = vadd.f32 %v10907_v48, %v10825_v56  ;;  %v15795_v56 = vsub.f32 %v11519_v46, %v15792_v47  ;;  %v15797_v48 = vand.u32 4294901760, %v11518_v55 }
0x1963   : > { %v13553_v58 = vpop.f32.mrf.mxu0 }
0x1964   : > { %v10983_v49 = vadd.f32 %v10982_v44, %v10908_v57  ;;  %v11517_v57 = vld [vmem:[#allocation17 + $0x8] sm:$0xff]  ;;  %v11633_v58 = vand.u32 4294901760, %v15795_v56 }
0x1966   : > { %v10986_v39 = vadd.f32 %v10983_v49, %v15196_v17  ;;  %v11016_v17 = vld [vmem:[#allocation16] sm:$0xff]  ;;  %v15803_v49 = vsub.f32 %v11518_v55, %v15797_v48 }
0x1967   : > { %v15690_v1 = vand.u32 4294901760, %v11016_v17 }
0x1968   : > { %v10987_v51 = vsel %vm602_vm1, %v10986_v39, 0.0 }
0x1969   : > { %10988 = vadd.xlane.f32.xlu0 %v10987_v51  ;;  %v15703_v6 = vsub.f32 %v11016_v17, %v15690_v1  ;;  %13572 = vmatpush3.msra.mxu0 %v15690_v1  ;;  %v11516_v51 = vld [vmem:[#allocation17] sm:$0xff] }
0x196a   : > { %13587 = vmatprep.subr.mxu0 %v14258_v0 }
0x196b   : > { %v11157_v4 = vand.u32 4294901760, %v15703_v6 }
0x196d   : > { %v11158_v23 = vsub.f32 %v15703_v6, %v11157_v4 }
0x196f   : > { %v11159_v7 = vand.u32 4294901760, %v11158_v23 }
0x1971   : > { %13583 = vmatpush3.msra.mxu1 %v11159_v7 }
0x1972   : > { %13598 = vmatprep.subr.mxu1 %v14258_v0 }
0x19f2   : > { %v10989_v50 = vpop.xlane.xlu0 %10988 }
0x19f3   : > { %v10990_v21 = vmul.f32 0.03125, %v10989_v50  ;;  %v11634_v50 = vsub.f32 %v15795_v56, %v11633_v58 }
0x19f5   : > { %v10991_v52 = vsub.f32 %v10986_v39, %v10990_v21  ;;  %v15805_v39 = vand.u32 4294901760, %v11517_v57  ;;  %v11640_v21 = vand.u32 4294901760, %v15803_v49 }
0x19f7   : > { %v10992_v53 = vmul.f32 %v10991_v52, %v10991_v52  ;;  %v11641_v59 = vsub.f32 %v15803_v49, %v11640_v21 }
0x19f9   : > { %v10993_v54 = vsel %vm602_vm1, %v10992_v53, 0.0  ;;  %v15816_v53 = vand.u32 4294901760, %v11516_v51 }
0x19fa   : > { %10994 = vadd.xlane.f32.xlu1 %v10993_v54  ;;  %v11635_v54 = vand.u32 4294901760, %v11634_v50 }
0x19fb   : > { %v15825_v42 = vsub.f32 %v11516_v51, %v15816_v53 }
0x1a83   : > { %v10995_v25 = vpop.xlane.xlu1 %10994 }
0x1a84   : > { %v10996_v26 = vmul.f32 0.03125, %v10995_v25 }
0x1a86   : > { %13880 = vrsqrt.f32 %v10996_v26  ;;  %vm10999_vm7 = vcmp.eq.f32.partialorder %v10996_v26, inf  ;;  %v11002_v28 = vand.u32 2147483648, %v10996_v26  ;;  %vm11001_vm8 = vcmp.eq.f32.partialorder %v10996_v26, 0.0 }
0x1a93   : > { %v13881_v27 = vpop.eup %13880 }
0x1a94   : > { %v10998_v24 = vmul.f32 %v13881_v27, %v10996_v26 }
0x1a96   : > { %v11000_v30 = vsel %vm10999_vm7, %v10996_v26, %v10998_v24 }
0x1a97   : > { %v11003_v32 = vsel %vm11001_vm8, %v11002_v28, %v11000_v30 }
0x1a98   : > { %13882 = vrcp.f32 %v11003_v32 }
0x1aa5   : > { %v13883_v34 = vpop.eup %13882 }
0x1aa6   : > { %v11005_v37 = vmul.f32 %v13883_v34, %v10991_v52  ;;  %v15814_v52 = vsub.f32 %v11517_v57, %v15805_v39 }
0x1aa8   : > { %v11010_v38 = vmul.f32 %v11009_v33, %v11005_v37  ;;  %v11647_v60 = vand.u32 4294901760, %v15814_v52 }
0x1aaa   : > { %v11015_v40 = vadd.f32 %v11014_v35, %v11010_v38 }
0x1aac   : > { %v11028_v41 = vsel %vm602_vm1, %v11015_v40, 0 }
0x1aad   : > { %v11099_v43 = vand.u32 4294901760, %v11028_v41 }
0x1aaf   : > { %v11100_v44 = vsub.f32 %v11028_v41, %v11099_v43  ;;  %13585 = vmatmul.mubr.f32.vlgmr.msra.gmra.mxu1 %v11099_v43 }
0x1ab0   : > { %13599 = vmatpush3.msra.mxu1 %v15684_v20  ;;  %13606 = vmatprep.mubr.msk.f32.mxu1 %vm14259_vm0, %v14258_v0 }
0x1ab1   : > { %13600 = vmatprep.subr.mxu1 %v14258_v0  ;;  %v11101_v12 = vand.u32 4294901760, %v11100_v44 }
0x1ab2   : > { %13601 = vmatpush3.msra.mxu1 %v15686_v62 }
0x1ab3   : > { %13602 = vmatprep.subr.mxu1 %v14258_v0  ;;  %v11102_v61 = vsub.f32 %v11100_v44, %v11101_v12 }
0x1ab4   : > { %13603 = vmatpush3.msra.mxu1 %v15688_v11 }
0x1ab5   : > { %13604 = vmatprep.subr.mxu1 %v14258_v0  ;;  %v11103_v45 = vand.u32 4294901760, %v11102_v61 }
0x1ab6   : > { %13605 = vmatpush3.msra.mxu1 %v15690_v1 }
0x1ab7   : > { %13607 = vmatmul.mubr.f32.vlgmr.msra.gmra.mxu1 %v11101_v12  ;;  %13620 = vmatprep.subr.mxu1 %v14258_v0  ;;  %v11523_v12 = vrot.slane %v15735_v36, %v600_v2 }
0x1ab8   : > { %13574 = vmatmul.mubr.f32.vlgmr.msra.gmra.mxu0 %v11103_v45  ;;  %13621 = vmatpush3.msra.mxu1 %v15684_v20  ;;  %v11642_v20 = vand.u32 4294901760, %v11641_v59 }
0x1ab9   : > { %13588 = vmatpush3.msra.mxu0 %v15693_v3  ;;  %13622 = vmatprep.subr.mxu1 %v14258_v0 }
0x1aba   : > { %13589 = vmatprep.subr.mxu0 %v14258_v0  ;;  %13623 = vmatpush3.msra.mxu1 %v15686_v62  ;;  %v11648_v62 = vsub.f32 %v15814_v52, %v11647_v60 }
0x1abb   : > { %13590 = vmatpush3.msra.mxu0 %v15696_v8  ;;  %13624 = vmatprep.subr.mxu1 %v14258_v0 }
0x1abc   : > { %13591 = vmatprep.subr.mxu0 %v14258_v0  ;;  %13625 = vmatpush3.msra.mxu1 %v15688_v11  ;;  %v11654_v11 = vand.u32 4294901760, %v15825_v42  ;;  %v11649_v17 = vand.u32 4294901760, %v11648_v62 }
0x1abd   : > { %13592 = vmatpush3.msra.mxu0 %v15699_v5  ;;  %13626 = vmatprep.subr.mxu1 %v14258_v0 }
0x1abe   : > { %13593 = vmatprep.subr.mxu0 %v14258_v0  ;;  %13595 = vmatprep.mubr.msk.f32.mxu0 %vm14259_vm0, %v14258_v0 }
0x1abf   : > { %13594 = vmatpush3.msra.mxu0 %v15703_v6  ;;  %13627 = vmatpush3.msra.mxu1 %v15690_v1  ;;  %v11655_v1 = vsub.f32 %v15825_v42, %v11654_v11 }
0x1ac0   : > { %13628 = vmatprep.mubr.msk.f32.mxu1 %vm14259_vm0, %v14258_v0  ;;  %13596 = vmatmul.mubr.f32.vlgmr.msra.gmra.mxu0 %v11100_v44 }
0x1ac1   : > { %13609 = vmatprep.subr.mxu0 %v14258_v0  ;;  %13629 = vmatmul.mubr.f32.vlgmr.msra.gmra.mxu1 %v11099_v43  ;;  %v11656_v3 = vand.u32 4294901760, %v11655_v1  ;;  %v12034_v1 = vrot.slane %v15735_v36, %v6796_v29 }
0x1ac2   : > { %13610 = vmatpush3.msra.mxu0 %v11136_v10  ;;  %13617 = vmatprep.mubr.msk.f32.mxu0 %vm14259_vm0, %v14258_v0 }
0x1ac3   : > { %13611 = vmatprep.subr.mxu0 %v14258_v0  ;;  %13642 = vmatprep.subr.mxu1 %v14258_v0 }
0x1ac4   : > { %13612 = vmatpush3.msra.mxu0 %v11143_v13  ;;  %13650 = vmatprep.mubr.msk.f32.mxu1 %vm14259_vm0, %v14258_v0 }
0x1ac5   : > { %13613 = vmatprep.subr.mxu0 %v14258_v0  ;;  %13643 = vmatpush3.msra.mxu1 %v11635_v54 }
0x1ac6   : > { %13614 = vmatpush3.msra.mxu0 %v11150_v14  ;;  %13644 = vmatprep.subr.mxu1 %v14258_v0 }
0x1ac7   : > { %13615 = vmatprep.subr.mxu0 %v14258_v0  ;;  %13645 = vmatpush3.msra.mxu1 %v11642_v20 }
0x1ac8   : > { %13616 = vmatpush3.msra.mxu0 %v11157_v4  ;;  %13646 = vmatprep.subr.mxu1 %v14258_v0  ;;  %v12252_v4 = vld [vmem:[%s15943_s9] ss:$0 sm:$0xff] }
0x1ac9   : > { %13618 = vmatmul.mubr.f32.vlgmr.msra.gmra.mxu0 %v11099_v43  ;;  %13631 = vmatprep.subr.mxu0 %v14258_v0 }
0x1aca   : > { %13639 = vmatprep.mubr.msk.f32.mxu0 %vm14259_vm0, %v14258_v0  ;;  %13632 = vmatpush3.msra.mxu0 %v15792_v47 }
0x1acb   : > { %13633 = vmatprep.subr.mxu0 %v14258_v0  ;;  %13647 = vmatpush3.msra.mxu1 %v11649_v17 }
0x1acc   : > { %13634 = vmatpush3.msra.mxu0 %v15797_v48  ;;  %13648 = vmatprep.subr.mxu1 %v14258_v0 }
0x1acd   : > { %13635 = vmatprep.subr.mxu0 %v14258_v0  ;;  %13649 = vmatpush3.msra.mxu1 %v11656_v3 }
0x1ace   : > { %13636 = vmatpush3.msra.mxu0 %v15805_v39  ;;  %13664 = vmatprep.subr.mxu1 %v14258_v0 }
0x1acf   : > { %13637 = vmatprep.subr.mxu0 %v14258_v0 }
0x1ad0   : > { %13638 = vmatpush3.msra.mxu0 %v15816_v53 }
0x1ad1   : > { %13653 = vmatprep.subr.mxu0 %v14258_v0 }
0x1b6f   : > { %v11196_v8 = vpop.f32.mrf.mxu1 }
0x1b71   : > { %v13586_v5 = vpop.f32.mrf.mxu1 }
0x1b77   : > { %v11353_v6 = vpop.f32.mrf.mxu1 }
0x1b78   : > { %v11105_v10 = vpop.f32.mrf.mxu0 }
0x1b79   : > { %v13608_v13 = vpop.f32.mrf.mxu1  ;;  %v11106_v16 = vadd.f32 %v12252_v4, %v11105_v10 }
0x1b7a   : > { %v13575_v14 = vpop.f32.mrf.mxu0 }
0x1b7b   : > { %v11197_v22 = vadd.f32 %v11196_v8, %v11106_v16  ;;  %v12039_v8 = vrot.slane %v15735_v36, %v6801_v9 }
0x1b80   : > { %v11276_v18 = vpop.f32.mrf.mxu0 }
0x1b81   : > { %v11511_v15 = vpop.f32.mrf.mxu1  ;;  %v11277_v31 = vadd.f32 %v11276_v18, %v11197_v22 }
0x1b82   : > { %v13597_v19 = vpop.f32.mrf.mxu0 }
0x1b83   : > { %v13630_v23 = vpop.f32.mrf.mxu1  ;;  %v11354_v7 = vadd.f32 %v11353_v6, %v11277_v31 }
0x1b89   : > { %v11436_v25 = vpop.f32.mrf.mxu0 }
0x1b8a   : > { %v11437_v26 = vadd.f32 %v11436_v25, %v11354_v7 }
0x1b8b   : > { %v13619_v27 = vpop.f32.mrf.mxu0 }
0x1b8c   : > { %v11512_v24 = vadd.f32 %v11511_v15, %v11437_v26 }
0x1b8e   : > { %v11515_v28 = vmax.f32 %v11512_v24, 0.0 }
0x1b90   : > { %v11525_v30 = vsel %vm602_vm1, %v11515_v28, 0 }
0x1b91   : > { %v11596_v32 = vand.u32 4294901760, %v11525_v30 }
0x1b93   : > { %v11597_v33 = vsub.f32 %v11525_v30, %v11596_v32  ;;  %13651 = vmatmul.mubr.f32.vlgmr.msra.gmra.mxu1 %v11596_v32 }
0x1b94   : > { %13665 = vmatpush3.msra.mxu1 %v15792_v47  ;;  %13672 = vmatprep.mubr.msk.f32.mxu1 %vm14259_vm0, %v14258_v0 }
0x1b95   : > { %v11598_v34 = vand.u32 4294901760, %v11597_v33  ;;  %13666 = vmatprep.subr.mxu1 %v14258_v0 }
0x1b96   : > { %13667 = vmatpush3.msra.mxu1 %v15797_v48 }
0x1b97   : > { %v11599_v35 = vsub.f32 %v11597_v33, %v11598_v34  ;;  %13668 = vmatprep.subr.mxu1 %v14258_v0 }
0x1b98   : > { %13669 = vmatpush3.msra.mxu1 %v15805_v39 }
0x1b99   : > { %v11600_v37 = vand.u32 4294901760, %v11599_v35  ;;  %13670 = vmatprep.subr.mxu1 %v14258_v0 }
0x1b9a   : > { %13671 = vmatpush3.msra.mxu1 %v15816_v53 }
0x1b9b   : > { %13673 = vmatmul.mubr.f32.vlgmr.msra.gmra.mxu1 %v11598_v34  ;;  %13686 = vmatprep.subr.mxu1 %v14258_v0 }
0x1b9c   : > { %13640 = vmatmul.mubr.f32.vlgmr.msra.gmra.mxu0 %v11600_v37  ;;  %13687 = vmatpush3.msra.mxu1 %v15792_v47 }
0x1b9d   : > { %13654 = vmatpush3.msra.mxu0 %v15795_v56  ;;  %13688 = vmatprep.subr.mxu1 %v14258_v0 }
0x1b9e   : > { %13655 = vmatprep.subr.mxu0 %v14258_v0  ;;  %13689 = vmatpush3.msra.mxu1 %v15797_v48 }
0x1b9f   : > { %13656 = vmatpush3.msra.mxu0 %v15803_v49  ;;  %13690 = vmatprep.subr.mxu1 %v14258_v0 }
0x1ba0   : > { %13657 = vmatprep.subr.mxu0 %v14258_v0  ;;  %13691 = vmatpush3.msra.mxu1 %v15805_v39 }
0x1ba1   : > { %13658 = vmatpush3.msra.mxu0 %v15814_v52  ;;  %13692 = vmatprep.subr.mxu1 %v14258_v0 }
0x1ba2   : > { %13659 = vmatprep.subr.mxu0 %v14258_v0  ;;  %13661 = vmatprep.mubr.msk.f32.mxu0 %vm14259_vm0, %v14258_v0 }
0x1ba3   : > { %13660 = vmatpush3.msra.mxu0 %v15825_v42  ;;  %13693 = vmatpush3.msra.mxu1 %v15816_v53 }
0x1ba4   : > { %13694 = vmatprep.mubr.msk.f32.mxu1 %vm14259_vm0, %v14258_v0  ;;  %13662 = vmatmul.mubr.f32.vlgmr.msra.gmra.mxu0 %v11597_v33 }
0x1ba5   : > { %13675 = vmatprep.subr.mxu0 %v14258_v0  ;;  %13695 = vmatmul.mubr.f32.vlgmr.msra.gmra.mxu1 %v11596_v32 }
0x1ba6   : > { %13676 = vmatpush3.msra.mxu0 %v11633_v58  ;;  %13683 = vmatprep.mubr.msk.f32.mxu0 %vm14259_vm0, %v14258_v0 }
0x1ba7   : > { %13677 = vmatprep.subr.mxu0 %v14258_v0 }
0x1ba8   : > { %13678 = vmatpush3.msra.mxu0 %v11640_v21 }
0x1ba9   : > { %13679 = vmatprep.subr.mxu0 %v14258_v0 }
0x1baa   : > { %13680 = vmatpush3.msra.mxu0 %v11647_v60 }
0x1bab   : > { %13681 = vmatprep.subr.mxu0 %v14258_v0 }
0x1bac   : > { %13682 = vmatpush3.msra.mxu0 %v11654_v11 }
0x1bad   : > { %13684 = vmatmul.mubr.f32.vlgmr.msra.gmra.mxu0 %v11596_v32 }
0x1c53   : > { %v11693_v38 = vpop.f32.mrf.mxu1 }
0x1c55   : > { %v13652_v40 = vpop.f32.mrf.mxu1 }
0x1c5b   : > { %v11850_v41 = vpop.f32.mrf.mxu1 }
0x1c5c   : > { %v11602_v43 = vpop.f32.mrf.mxu0 }
0x1c5d   : > { %v13674_v44 = vpop.f32.mrf.mxu1  ;;  %v11603_v45 = vadd.f32 %v11602_v43, %v11523_v12 }
0x1c5e   : > { %v13641_v61 = vpop.f32.mrf.mxu0 }
0x1c5f   : > { %v11694_v55 = vadd.f32 %v11693_v38, %v11603_v45 }
0x1c64   : > { %v11773_v46 = vpop.f32.mrf.mxu0 }
0x1c65   : > { %v12008_v47 = vpop.f32.mrf.mxu1  ;;  %v11774_v48 = vadd.f32 %v11773_v46, %v11694_v55 }
0x1c66   : > { %v13663_v56 = vpop.f32.mrf.mxu0 }
0x1c67   : > { %v13696_v0 = vpop.f32.mrf.mxu1  ;;  %v11851_v57 = vadd.f32 %v11850_v41, %v11774_v48 }
0x1c6d   : > { %v11933_v58 = vpop.f32.mrf.mxu0 }
0x1c6e   : > { %v11934_v49 = vadd.f32 %v11933_v58, %v11851_v57 }
0x1c6f   : > { %v13685_v39 = vpop.f32.mrf.mxu0 }
0x1c70   : > { %v12009_v51 = vadd.f32 %v12008_v47, %v11934_v49 }
0x1c72   : > { %v12012_v50 = vsel %vm602_vm1, %v12009_v51, 0.0 }
0x1c73   : > { %12013 = vadd.xlane.f32.xlu0 %v12012_v50 }
0x1cfc   : > { %v12014_v21 = vpop.xlane.xlu0 %12013 }
0x1cfd   : > { %v12015_v52 = vmul.f32 0.03125, %v12014_v21 }
0x1cff   : > { %v12016_v53 = vsub.f32 %v12009_v51, %v12015_v52 }
0x1d01   : > { %v12017_v2 = vmul.f32 %v12016_v53, %v12016_v53 }
0x1d03   : > { %v12018_v54 = vsel %vm602_vm1, %v12017_v2, 0.0 }
0x1d04   : > { %12019 = vadd.xlane.f32.xlu0 %v12018_v54 }
0x1d8d   : > { %v12020_v59 = vpop.xlane.xlu0 %12019 }
0x1d8e   : > { %v12021_v60 = vmul.f32 0.03125, %v12020_v59 }
0x1d90   : > { %13884 = vrsqrt.f32 %v12021_v60  ;;  %vm12024_vm9 = vcmp.eq.f32.partialorder %v12021_v60, inf  ;;  %v12027_v62 = vand.u32 2147483648, %v12021_v60  ;;  %vm12026_vm10 = vcmp.eq.f32.partialorder %v12021_v60, 0.0 }
0x1d9d   : > { %v13885_v42 = vpop.eup %13884 }
0x1d9e   : > { %v12023_v20 = vmul.f32 %v13885_v42, %v12021_v60 }
0x1da0   : > { %v12025_v11 = vsel %vm12024_vm9, %v12021_v60, %v12023_v20 }
0x1da1   : > { %v12028_v17 = vsel %vm12026_vm10, %v12027_v62, %v12025_v11 }
0x1da2   : > { %13886 = vrcp.f32 %v12028_v17 }
0x1daf   : > { %v13887_v3 = vpop.eup %13886 }
0x1db0   : > { %v12030_v5 = vmul.f32 %v13887_v3, %v12016_v53 }
0x1db2   : > { %v12035_v6 = vmul.f32 %v12034_v1, %v12030_v5 }
0x1db4   : > { %v12040_v10 = vadd.f32 %v12039_v8, %v12035_v6 }
0x1db6   : > { %12041 = vst.msk [vmem:[%s581_s7] sm:$0xff] %vm602_vm1, %v12040_v10 }
0x1db7   : > { %14169 = shalt.err (!%p14166_p10)
}
0x1db8   : > { %s14170_s8 = scalar_lea.hbm %s12054_s4, 128  ;;  %s14174_s2 = scalar_lea.hbm %s15946_s12, 256 }
0x1db9   : > { %p14171_p0 = scmp.ne.s32.totalorder %s12054_s4, %s14170_s8  ;;  %p14175_p9 = scmp.lt.s32.totalorder %s12054_s4, %s15946_s12 }
0x1dba   : > { %p14176_p12 = scmp.lt.s32.totalorder %s14174_s2, %s14170_s8 }
0x1dbb   : > { %p14172_p2 = pnand %p14171_p0, %p15988_p4 }
0x1dbc   : > { %p14177_p13 = por %p14176_p12, %p14175_p9 }
0x1dbd   : > { %p14173_p5 = pneg %p14172_p2 }
0x1dbf   : > { %p14178_p1 = pnand %p14177_p13, %p14173_p5 }
0x1dc1   : > { %14181 = shalt.err (!%p14178_p1)
}
0x1dc2   : > { %13733 = dma.vmem_to_hbm [thread:$0]  (%p15988_p4), %s12057_s15, 128, %s12054_s4, %s12043_s28  }
0x1dc3 PF: > { %s12068_s17 = sand.u32 1, %s14232_s21   ;;  %p15989_p6 = scmp.ne.s32.totalorder %s15974_s26, 0 }
0x1dc4   : > { %p15990_p11 = scmp.ge.s32.totalorder %s14244_s24, 2  ;;  %s12069_s14 = scalar_lea.sflag [#allocation4], %s12068_s17 }
0x1dc6   : > { %p13768_p3 = pnand %p15990_p11, %p15989_p6 }
0x1dc8   : > { %p13769_p7 = pneg %p13768_p3 }
0x1dca   : > { %14227 = dma.done.wait (%p13769_p7), %s12069_s14, 128  }
0x1dcb   : > { %14229 = vsyncadd (%p13769_p7), %s12069_s14, 4294967168  ;;  %s15991_s3 = sld [smem:[#allocation28_spill]]  ;;  %p32_p8 = scmp.ge.s32.totalorder %s14478_s16, 4  }
0x1dcc   : > { %s15992_s21 = smov %s14236_s22  ;;  %s15993_s22 = smov %s14240_s23 }
0x1dcd   : > { %s15995_s24 = smov %s14478_s16  ;;  %34 = sbr.rel (!%p32_p8) target bundleno = 20 (0x14), region = 158 }
0x1dd1   : > { %s15994_s23 = smov %s15991_s3 }
0x1dd2   :  { %12074 = vsyncpa [#allocation3], 1 }
0x1dd3   :  { %12076 = vsyncpa [#allocation3 + $0x1], 1 }
0x1dd4   :  { %12077 = vsyncpa [#allocation6], 1 }
0x1dd5   :  { %12079 = vsyncpa [#allocation6 + $0x1], 1 }
0x1dd6   :  { %12080 = vsyncpa [#allocation9], 1 }
0x1dd7   :  { %12081 = vsyncpa [#allocation12], 1 }
0x1dd8   :  { %12082 = vsyncpa [#allocation15], 1 }
0x1dd9   :  { %12083 = vsyncpa [#allocation18], 1 }
0x1dda   :  { %12084 = vsyncpa [#allocation4], 1 }
0x1ddb   :  { %12086 = vsyncpa [#allocation4 + $0x1], 1 }

</bundles_post_ra>
